<compile_context>
chip_gen: v5e
topology: v5e:2x2
jax: 0.10.0
libtpu: 0.0.40
codegen_flags: <defaults>
</compile_context>

<pallas_src>
import functools

import jax
import jax.numpy as jnp
import numpy as np
from jax import lax
from jax.experimental import pallas as pl
from jax.experimental.pallas import tpu as pltpu

C_PAD = 128     # channel lanes (every layer kept lane-dense)
K = 3           # ResNetFeat default kernel_size for every conv
EPS = 1e-5      # nn.BatchNorm1d default eps


# ----------------------------------------------------------------------------
# helpers
# ----------------------------------------------------------------------------
def _round_up8(n):
    return ((n + 7) // 8) * 8


def _blk(L):
    # per-batch block stride: 8 leading zero rows + 8-padded data region
    return 8 + _round_up8(L)


def _pad_axis(a, axis, target):
    pad = target - a.shape[axis]
    if pad == 0:
        return a
    cfg = [(0, 0)] * a.ndim
    cfg[axis] = (0, pad)
    return jnp.pad(a, cfg)


def _full_spec(a):
    nd = a.ndim
    return pl.BlockSpec(a.shape, lambda i, _n=nd: (0,) * _n)


# ----------------------------------------------------------------------------
# the single fused kernel
# ----------------------------------------------------------------------------
def _resnetfeat_kernel(x_ref, w_ref, bn_ref, out_ref, buf0, buf1, buf2,
                       *, plan, batch, eps, pool):
    bufs = (buf0, buf1, buf2)
    B = batch

    def zero_rows(buf, start, n):
        if n > 0:
            buf[pl.ds(start, n), :] = jnp.zeros((n, C_PAD), jnp.float32)

    def zero_margins(buf, S, L):
        # leading 8 zero rows of block 0, then the zero gap after each block's
        # data (covers the next block's leading margin too); the last range is
        # extended so the one extra row read by the next conv is also zero.
        zero_rows(buf, 0, 8)
        for b in range(B):
            start = b * S + 8 + L
            end = (b + 1) * S + 8 if b < B - 1 else B * S + 16
            zero_rows(buf, start, end - start)

    for op in plan:
        tag = op[0]

        if tag == "load":
            # copy (B, L, 128) input into the aligned canonical layout
            _, dst_i, L, S = op
            dst = bufs[dst_i]
            for b in range(B):
                dst[pl.ds(b * S + 8, L), :] = x_ref[b]
            zero_margins(dst, S, L)

        elif tag == "conv":
            (_, w_row, bn_row, src_i, dst_i, res_i,
             Lin, Lout, Sin, Sout, stride, relu) = op
            src, dst = bufs[src_i], bufs[dst_i]

            # One MXU matmul per tap over the batch-flat padded buffer (f32
            # operands, f32 accumulation).  Conv bias is omitted: it cancels
            # exactly under the training-mode BN that always follows.
            if stride == 1:
                M = B * Sin                       # acc row j = batch-flat pos
                row_stride = Sin                  # batch b data at j = b*Sin+i
            else:                                  # stride 2
                row_stride = Sin // 2
                M = B * row_stride                # batch b data at j = b*half+i

            acc = None
            for dk in range(K):
                if stride == 1:
                    lhs = src[pl.ds(7 + dk, M), :]
                else:
                    lhs = src[pl.ds(7 + dk, M, stride=2), :]
                t = jnp.dot(lhs, w_ref[w_row + dk],
                            preferred_element_type=jnp.float32)
                acc = t if acc is None else acc + t

            # BatchNorm1d training-mode batch statistics over the valid data
            # rows only (seam / margin rows are never part of the stats).
            ys = [acc[b * row_stride: b * row_stride + Lout, :]
                  for b in range(B)]
            n = float(B * Lout)
            mean = sum(jnp.sum(y, axis=0, keepdims=True) for y in ys) / n
            var = sum(jnp.sum((y - mean) ** 2, axis=0, keepdims=True)
                      for y in ys) / n
            gamma = bn_ref[pl.ds(bn_row, 1), :]
            beta = bn_ref[pl.ds(bn_row + 1, 1), :]
            scale = gamma * lax.rsqrt(var + eps)
            shift = beta - mean * scale

            # BN affine hoisted over the whole accumulator (seam rows get
            # garbage that is re-zeroed after the store).
            y = acc * scale + shift

            if stride == 1:
                # same layout in and out: residual add + ReLU + ONE flat,
                # 8-aligned, lane-dense store over all B*Sin rows.
                if res_i is not None:
                    y = y + bufs[res_i][pl.ds(8, M), :]
                if relu:
                    y = jnp.maximum(y, 0.0)
                dst[pl.ds(8, M), :] = y
            else:
                if relu:
                    y = jnp.maximum(y, 0.0)
                for b in range(B):
                    dst[pl.ds(b * Sout + 8, Lout), :] = \
                        y[b * row_stride: b * row_stride + Lout, :]
            zero_margins(dst, Sout, Lout)

        elif tag == "pool":
            # MaxPool1d(k): elementwise max of k strided sublane reads (VPU).
            _, src_i, dst_i, Lin, Lout, Sin, Sout, k = op
            src, dst = bufs[src_i], bufs[dst_i]
            for b in range(B):
                m = src[pl.ds(b * Sin + 8, Lout, stride=k), :]
                for j in range(1, k):
                    m = jnp.maximum(
                        m, src[pl.ds(b * Sin + 8 + j, Lout, stride=k), :])
                dst[pl.ds(b * Sout + 8, Lout), :] = m
            zero_margins(dst, Sout, Lout)

        else:  # "gpool": torch.max(x, 2) / torch.mean(x, 2)
            _, src_i, L, S = op
            src = bufs[src_i]
            for b in range(B):
                xb = src[pl.ds(b * S + 8, L), :]
                if pool == "max":
                    v = jnp.max(xb, axis=0, keepdims=True)
                else:
                    v = jnp.mean(xb, axis=0, keepdims=True)
                out_ref[pl.ds(b, 1), :] = v.astype(out_ref.dtype)


# ----------------------------------------------------------------------------
# one-time parameter packing (hoisted out of the per-step path)
# ----------------------------------------------------------------------------
def pack_params(params, scales_pooling):
    """Pack all conv weights / BN params into two lane-dense slabs."""
    w_blocks = []   # each (K, 128, 128) f32
    bn_rows = []    # each (128,) f32 ; row 2i = gamma_i, 2i+1 = beta_i
    net = []

    def add_w(w):                                   # (K, Cin, Cout) f32
        assert w.shape[0] == K, "fused kernel assumes kernel_size=3 convs"
        wp = _pad_axis(_pad_axis(w, 1, C_PAD), 2, C_PAD).astype(jnp.float32)
        w_blocks.append(wp)
        return (len(w_blocks) - 1) * K              # base row in the slab

    def add_bn(g, be):                              # pad gamma/beta with ZEROS
        row = len(bn_rows)
        bn_rows.append(_pad_axis(g.reshape(1, -1), 1, C_PAD)[0].astype(jnp.float32))
        bn_rows.append(_pad_axis(be.reshape(1, -1), 1, C_PAD)[0].astype(jnp.float32))
        return row

    for i, (w, _bias) in enumerate(params["conv_up"]):
        wr = add_w(w)
        br = add_bn(*params["bn_up"][i])
        net.append(("stem", wr, br, int(scales_pooling[i])))

    # ResNet blocks (bn2 shared by conv1/conv2/conv3, exactly as in PyTorch;
    # bn1 exists in the module but is unused by forward)
    for blk_p in params["resnet"]:
        br = add_bn(*blk_p["bn2"])
        w1 = add_w(blk_p["conv1"][0])
        w2 = add_w(blk_p["conv2"][0])
        if blk_p["in"] == blk_p["out"]:
            net.append(("same", w1, w2, br))
        else:
            w3 = add_w(blk_p["conv3"][0])
            net.append(("down", w1, w2, w3, br))

    if params["resnet"]:
        c_out = params["resnet"][-1]["out"]
    else:
        c_out = params["bn_up"][-1][0].shape[0]

    return {
        "w": jnp.concatenate(w_blocks, axis=0),     # (n_conv*K, 128, 128) f32
        "bn": jnp.stack(bn_rows, axis=0),           # (2*n_bn, 128) f32
        "net": tuple(net),
        "c_out": c_out,
    }


# ----------------------------------------------------------------------------
# wrapper: builds the static layer plan, one pallas_call
# ----------------------------------------------------------------------------
def pallas_forward(x_ncl, packed, pool="max", feat_type="yolo"):
    if feat_type != "yolo":
        raise NotImplementedError("only the default feat_type='yolo' is fused")
    B, _, L0 = x_ncl.shape

    # TODO(synk): fold NCL->NLC transpose + channel pad into the kernel load op
    x = jnp.transpose(x_ncl, (0, 2, 1)).astype(jnp.float32)
    x = _pad_axis(x, 2, C_PAD)

    def others(c):
        return [i for i in range(3) if i != c]

    plan = []
    L = L0
    cur = 0
    plan.append(("load", cur, L, _blk(L)))

    for item in packed["net"]:
        if item[0] == "stem":                       # conv -> BN -> ReLU -> pool
            _, wr, br, k = item
            a, b = others(cur)
            S = _blk(L)
            plan.append(("conv", wr, br, cur, a, None, L, L, S, S, 1, True))
            Lp = L // k
            plan.append(("pool", a, b, L, Lp, S, _blk(Lp), k))
            L = Lp
            cur = b
        elif item[0] == "same":                     # ResNetBlock, in == out
            _, w1, w2, br = item
            a, b = others(cur)
            S = _blk(L)
            plan.append(("conv", w1, br, cur, a, None, L, L, S, S, 1, True))
            plan.append(("conv", w2, br, a, b, cur, L, L, S, S, 1, True))
            cur = b
        else:                                       # ResNetBlock, in != out
            _, w1, w2, w3, br = item
            a, b = others(cur)
            Sin = _blk(L)
            assert Sin % 2 == 0
            Lout = (L - 1) // 2 + 1
            Sout = _blk(Lout)
            plan.append(("conv", w1, br, cur, a, None, L, Lout, Sin, Sout, 2, True))
            plan.append(("conv", w3, br, cur, b, None, L, Lout, Sin, Sout, 2, False))
            plan.append(("conv", w2, br, a, cur, b, Lout, Lout, Sout, Sout, 1, True))
            L = Lout

    plan.append(("gpool", cur, L, _blk(L)))

    R = B * _blk(L0) + 16                           # rows per VMEM activation buffer
    kernel = functools.partial(_resnetfeat_kernel, plan=tuple(plan),
                               batch=B, eps=EPS, pool=pool)

    out = pl.pallas_call(
        kernel,
        out_shape=jax.ShapeDtypeStruct((B, C_PAD), jnp.float32),
        grid=(1,),
        in_specs=[_full_spec(x), _full_spec(packed["w"]), _full_spec(packed["bn"])],
        out_specs=pl.BlockSpec((B, C_PAD), lambda i: (0, 0)),
        scratch_shapes=[pltpu.VMEM((R, C_PAD), jnp.float32) for _ in range(3)],
        compiler_params=pltpu.CompilerParams(
            dimension_semantics=("arbitrary",),
            vmem_limit_bytes=32 * 1024 * 1024),     # explicit budget (v7x-safe)
    )(x, packed["w"], packed["bn"])

    return out[:, :packed["c_out"]]


# ----------------------------------------------------------------------------
# deterministic synthetic parameters (mirrors the PyTorch module structure)
# ----------------------------------------------------------------------------
def init_params(key, n_feats, dims_up, scales_up, dims_resnet):
    keys = jax.random.split(key, 64)
    ki = [0]

    def nxt():
        k = keys[ki[0]]
        ki[0] += 1
        return k

    def conv_init(cin, cout, k):
        w = 0.1 * jax.random.normal(nxt(), (k, cin, cout), jnp.float32)
        b = 0.1 * jax.random.normal(nxt(), (cout,), jnp.float32)
        return w, b

    def bn_init(c):
        g = 1.0 + 0.1 * jax.random.normal(nxt(), (c,), jnp.float32)
        be = 0.1 * jax.random.normal(nxt(), (c,), jnp.float32)
        return g, be

    params = {"conv_up": [], "bn_up": [], "resnet": []}
    dims = [n_feats] + list(dims_up)
    for i in range(1, len(dims)):
        params["conv_up"].append(conv_init(dims[i - 1], dims[i], scales_up[i - 1]))
        params["bn_up"].append(bn_init(dims[i]))

    dims = [dims_up[-1]] + list(dims_resnet)
    for i in range(1, len(dims)):
        cin, cout = dims[i - 1], dims[i]
        blk_p = {"in": cin, "out": cout,
                 "conv1": conv_init(cin, cout, 3),
                 "conv2": conv_init(cout, cout, 3),
                 "bn2": bn_init(cout)}
        if cin != cout:
            blk_p["conv3"] = conv_init(cin, cout, 3)
        params["resnet"].append(blk_p)
    return params


# ----------------------------------------------------------------------------
# pure-JAX reference (full-f32 math, PyTorch-equivalent forward)
# ----------------------------------------------------------------------------
def _ref_conv1d(x, w, b, stride):
    Kk = w.shape[0]
    pad = 0 if Kk == 1 else Kk // 2
    xp = jnp.pad(x, ((0, 0), (pad, pad), (0, 0)))
    L_s1 = x.shape[1] + 2 * pad - Kk + 1
    y = sum(jnp.einsum("blc,cd->bld", xp[:, dk:dk + L_s1, :], w[dk],
                       preferred_element_type=jnp.float32,
                       precision=lax.Precision.HIGHEST)
            for dk in range(Kk)) + b
    return y[:, ::stride, :]


def _ref_bn(y, g, be, eps=EPS):
    mean = jnp.mean(y, axis=(0, 1), keepdims=True)
    var = jnp.mean((y - mean) ** 2, axis=(0, 1), keepdims=True)
    return (y - mean) * lax.rsqrt(var + eps) * g + be


def _ref_maxpool(x, k):
    B, L, C = x.shape
    Lo = L // k
    return jnp.max(x[:, :Lo * k, :].reshape(B, Lo, k, C), axis=2)


def ref_forward(x_ncl, params, scales_pooling, pool="max"):
    x = jnp.transpose(x_ncl, (0, 2, 1))
    for i, (w, b) in enumerate(params["conv_up"]):
        g, be = params["bn_up"][i]
        x = jax.nn.relu(_ref_bn(_ref_conv1d(x, w, b, 1), g, be))
        x = _ref_maxpool(x, scales_pooling[i])
    for blk_p in params["resnet"]:
        g, be = blk_p["bn2"]
        if blk_p["in"] == blk_p["out"]:
            h = jax.nn.relu(_ref_bn(_ref_conv1d(x, *blk_p["conv1"], 1), g, be))
            h2 = _ref_bn(_ref_conv1d(h, *blk_p["conv2"], 1), g, be)
            x = jax.nn.relu(h2 + x)
        else:
            h = jax.nn.relu(_ref_bn(_ref_conv1d(x, *blk_p["conv1"], 2), g, be))
            h2 = _ref_bn(_ref_conv1d(h, *blk_p["conv2"], 1), g, be)
            sc = _ref_bn(_ref_conv1d(x, *blk_p["conv3"], 2), g, be)
            x = jax.nn.relu(h2 + sc)
    x = jnp.max(x, axis=1) if pool == "max" else jnp.mean(x, axis=1)
    return x


# ----------------------------------------------------------------------------
if __name__ == "__main__":
    # Small shapes consistent with the ResNetFeat constructor arguments.
    n_feats = 4
    dims_up = [16, 32]
    scales_up = [3, 3]
    scales_pooling = [2, 2]
    dims_resnet = [32, 64, 128]
    B, L = 2, 32

    key = jax.random.PRNGKey(0)
    pkey, xkey = jax.random.split(key)
    params = init_params(pkey, n_feats, dims_up, scales_up, dims_resnet)
    x = jax.random.normal(xkey, (B, n_feats, L), jnp.float32)   # PyTorch NCL input

    packed = pack_params(params, scales_pooling)                # done ONCE
    out = jax.block_until_ready(
        pallas_forward(x, packed, pool="max", feat_type="yolo"))
    assert out.shape == (B, dims_resnet[-1]), out.shape

    # Single semantic check vs. full-f32 math (PyTorch-equivalent forward);
    # the kernel now also does f32 matmuls, so 5e-3 is comfortable.
    ref = jax.block_until_ready(ref_forward(x, params, scales_pooling, pool="max"))
    np.testing.assert_allclose(np.asarray(out), np.asarray(ref),
                               rtol=5e-3, atol=5e-3)

    print("KERNEL_OK")
</pallas_src>

<mosaic_0001>
module attributes {stable_mosaic.version = 11 : i64} {
  func.func @_resnetfeat_kernel(%arg0: i32, %arg1: memref<2x32x128xf32, #tpu.memory_space<vmem>>, %arg2: memref<30x128x128xf32, #tpu.memory_space<vmem>>, %arg3: memref<10x128xf32, #tpu.memory_space<vmem>>, %arg4: memref<2x128xf32, #tpu.memory_space<vmem>>, %arg5: memref<96x128xf32, #tpu.memory_space<vmem>>, %arg6: memref<96x128xf32, #tpu.memory_space<vmem>>, %arg7: memref<96x128xf32, #tpu.memory_space<vmem>>) attributes {dimension_semantics = [#tpu.dimension_semantics<arbitrary>], iteration_bounds = array<i64: 1>, scalar_prefetch = 0 : i64, scratch_operands = 3 : i64, tpu.core_type = #tpu.core_type<tc>, window_params = [{pipeline_mode = #tpu.pipeline_mode<synchronous>, transform_indices = @transform_0, window_bounds = array<i64: 2, 32, 128>}, {pipeline_mode = #tpu.pipeline_mode<synchronous>, transform_indices = @transform_1, window_bounds = array<i64: 30, 128, 128>}, {pipeline_mode = #tpu.pipeline_mode<synchronous>, transform_indices = @transform_2, window_bounds = array<i64: 10, 128>}, {pipeline_mode = #tpu.pipeline_mode<synchronous>, transform_indices = @transform_3, window_bounds = array<i64: 2, 128>}]} {
    %c0 = arith.constant 0 : index
    %c0_0 = arith.constant 0 : index
    %c0_1 = arith.constant 0 : index
    %0 = vector.load %arg1[%c0, %c0_0, %c0_1] : memref<2x32x128xf32, #tpu.memory_space<vmem>>, vector<1x32x128xf32>
    %1 = vector.shape_cast %0 : vector<1x32x128xf32> to vector<32x128xf32>
    %c8 = arith.constant 8 : index
    %c0_2 = arith.constant 0 : index
    %2 = vector.load %arg5[%c8, %c0_2] : memref<96x128xf32, #tpu.memory_space<vmem>>, vector<32x128xf32>
    tpu.vector_store %arg5[%c8, %c0_2], %1 {strides = array<i32>} : memref<96x128xf32, #tpu.memory_space<vmem>>, vector<32x128xf32>,
    %c1 = arith.constant 1 : index
    %c0_3 = arith.constant 0 : index
    %c0_4 = arith.constant 0 : index
    %3 = vector.load %arg1[%c1, %c0_3, %c0_4] : memref<2x32x128xf32, #tpu.memory_space<vmem>>, vector<1x32x128xf32>
    %4 = vector.shape_cast %3 : vector<1x32x128xf32> to vector<32x128xf32>
    %c48 = arith.constant 48 : index
    %c0_5 = arith.constant 0 : index
    %5 = vector.load %arg5[%c48, %c0_5] : memref<96x128xf32, #tpu.memory_space<vmem>>, vector<32x128xf32>
    tpu.vector_store %arg5[%c48, %c0_5], %4 {strides = array<i32>} : memref<96x128xf32, #tpu.memory_space<vmem>>, vector<32x128xf32>,
    %cst = arith.constant 0.000000e+00 : f32
    %6 = vector.broadcast %cst : f32 to vector<8x128xf32>
    %c0_6 = arith.constant 0 : index
    %c0_7 = arith.constant 0 : index
    %7 = vector.load %arg5[%c0_6, %c0_7] : memref<96x128xf32, #tpu.memory_space<vmem>>, vector<8x128xf32>
    tpu.vector_store %arg5[%c0_6, %c0_7], %6 {strides = array<i32>} : memref<96x128xf32, #tpu.memory_space<vmem>>, vector<8x128xf32>,
    %cst_8 = arith.constant 0.000000e+00 : f32
    %8 = vector.broadcast %cst_8 : f32 to vector<8x128xf32>
    %c40 = arith.constant 40 : index
    %c0_9 = arith.constant 0 : index
    %9 = vector.load %arg5[%c40, %c0_9] : memref<96x128xf32, #tpu.memory_space<vmem>>, vector<8x128xf32>
    tpu.vector_store %arg5[%c40, %c0_9], %8 {strides = array<i32>} : memref<96x128xf32, #tpu.memory_space<vmem>>, vector<8x128xf32>,
    %cst_10 = arith.constant 0.000000e+00 : f32
    %10 = vector.broadcast %cst_10 : f32 to vector<16x128xf32>
    %c80 = arith.constant 80 : index
    %c0_11 = arith.constant 0 : index
    %11 = vector.load %arg5[%c80, %c0_11] : memref<96x128xf32, #tpu.memory_space<vmem>>, vector<16x128xf32>
    tpu.vector_store %arg5[%c80, %c0_11], %10 {strides = array<i32>} : memref<96x128xf32, #tpu.memory_space<vmem>>, vector<16x128xf32>,
    %c7 = arith.constant 7 : index
    %c0_12 = arith.constant 0 : index
    %12 = vector.load %arg5[%c7, %c0_12] : memref<96x128xf32, #tpu.memory_space<vmem>>, vector<80x128xf32>
    %c0_13 = arith.constant 0 : index
    %c0_14 = arith.constant 0 : index
    %c0_15 = arith.constant 0 : index
    %13 = vector.load %arg2[%c0_13, %c0_14, %c0_15] : memref<30x128x128xf32, #tpu.memory_space<vmem>>, vector<1x128x128xf32>
    %14 = vector.shape_cast %13 : vector<1x128x128xf32> to vector<128x128xf32>
    %cst_16 = arith.constant dense<0.000000e+00> : vector<80x128xf32>
    %15 = tpu.matmul %12, %14, %cst_16 {dimension_numbers = #tpu.dot_dimension_numbers<[1], [0], [0], [1], [0, 0, 1, 1], [], []>} : vector<80x128xf32>, vector<128x128xf32>, vector<80x128xf32> -> vector<80x128xf32>
    %c8_17 = arith.constant 8 : index
    %c0_18 = arith.constant 0 : index
    %16 = vector.load %arg5[%c8_17, %c0_18] : memref<96x128xf32, #tpu.memory_space<vmem>>, vector<80x128xf32>
    %c1_19 = arith.constant 1 : index
    %c0_20 = arith.constant 0 : index
    %c0_21 = arith.constant 0 : index
    %17 = vector.load %arg2[%c1_19, %c0_20, %c0_21] : memref<30x128x128xf32, #tpu.memory_space<vmem>>, vector<1x128x128xf32>
    %18 = vector.shape_cast %17 : vector<1x128x128xf32> to vector<128x128xf32>
    %cst_22 = arith.constant dense<0.000000e+00> : vector<80x128xf32>
    %19 = tpu.matmul %16, %18, %cst_22 {dimension_numbers = #tpu.dot_dimension_numbers<[1], [0], [0], [1], [0, 0, 1, 1], [], []>} : vector<80x128xf32>, vector<128x128xf32>, vector<80x128xf32> -> vector<80x128xf32>
    %20 = arith.addf %15, %19 : vector<80x128xf32>
    %c9 = arith.constant 9 : index
    %c0_23 = arith.constant 0 : index
    %21 = vector.load %arg5[%c9, %c0_23] : memref<96x128xf32, #tpu.memory_space<vmem>>, vector<80x128xf32>
    %c2 = arith.constant 2 : index
    %c0_24 = arith.constant 0 : index
    %c0_25 = arith.constant 0 : index
    %22 = vector.load %arg2[%c2, %c0_24, %c0_25] : memref<30x128x128xf32, #tpu.memory_space<vmem>>, vector<1x128x128xf32>
    %23 = vector.shape_cast %22 : vector<1x128x128xf32> to vector<128x128xf32>
    %cst_26 = arith.constant dense<0.000000e+00> : vector<80x128xf32>
    %24 = tpu.matmul %21, %23, %cst_26 {dimension_numbers = #tpu.dot_dimension_numbers<[1], [0], [0], [1], [0, 0, 1, 1], [], []>} : vector<80x128xf32>, vector<128x128xf32>, vector<80x128xf32> -> vector<80x128xf32>
    %25 = arith.addf %20, %24 : vector<80x128xf32>
    %26 = vector.extract_strided_slice %25 {offsets = [0, 0], sizes = [32, 128], strides = [1, 1]} : vector<80x128xf32> to vector<32x128xf32>
    %27 = vector.extract_strided_slice %25 {offsets = [40, 0], sizes = [32, 128], strides = [1, 1]} : vector<80x128xf32> to vector<32x128xf32>
    %cst_27 = arith.constant dense<0.000000e+00> : vector<128xf32>
    %28 = vector.multi_reduction <add>, %26, %cst_27 [0] : vector<32x128xf32> to vector<128xf32>
    %29 = vector.shape_cast %28 : vector<128xf32> to vector<1x128xf32>
    %cst_28 = arith.constant 0.000000e+00 : f32
    %30 = vector.broadcast %cst_28 : f32 to vector<1x128xf32>
    %31 = arith.addf %30, %29 : vector<1x128xf32>
    %cst_29 = arith.constant dense<0.000000e+00> : vector<128xf32>
    %32 = vector.multi_reduction <add>, %27, %cst_29 [0] : vector<32x128xf32> to vector<128xf32>
    %33 = vector.shape_cast %32 : vector<128xf32> to vector<1x128xf32>
    %34 = arith.addf %31, %33 : vector<1x128xf32>
    %cst_30 = arith.constant 6.400000e+01 : f32
    %35 = vector.broadcast %cst_30 : f32 to vector<1x128xf32>
    %36 = arith.divf %34, %35 : vector<1x128xf32>
    %37 = vector.broadcast %36 : vector<1x128xf32> to vector<32x128xf32>
    %38 = arith.subf %26, %37 : vector<32x128xf32>
    %39 = arith.mulf %38, %38 : vector<32x128xf32>
    %cst_31 = arith.constant dense<0.000000e+00> : vector<128xf32>
    %40 = vector.multi_reduction <add>, %39, %cst_31 [0] : vector<32x128xf32> to vector<128xf32>
    %41 = vector.shape_cast %40 : vector<128xf32> to vector<1x128xf32>
    %cst_32 = arith.constant 0.000000e+00 : f32
    %42 = vector.broadcast %cst_32 : f32 to vector<1x128xf32>
    %43 = arith.addf %42, %41 : vector<1x128xf32>
    %44 = vector.broadcast %36 : vector<1x128xf32> to vector<32x128xf32>
    %45 = arith.subf %27, %44 : vector<32x128xf32>
    %46 = arith.mulf %45, %45 : vector<32x128xf32>
    %cst_33 = arith.constant dense<0.000000e+00> : vector<128xf32>
    %47 = vector.multi_reduction <add>, %46, %cst_33 [0] : vector<32x128xf32> to vector<128xf32>
    %48 = vector.shape_cast %47 : vector<128xf32> to vector<1x128xf32>
    %49 = arith.addf %43, %48 : vector<1x128xf32>
    %cst_34 = arith.constant 6.400000e+01 : f32
    %50 = vector.broadcast %cst_34 : f32 to vector<1x128xf32>
    %51 = arith.divf %49, %50 : vector<1x128xf32>
    %c0_35 = arith.constant 0 : index
    %c0_36 = arith.constant 0 : index
    %52 = vector.load %arg3[%c0_35, %c0_36] : memref<10x128xf32, #tpu.memory_space<vmem>>, vector<1x128xf32>
    %c1_37 = arith.constant 1 : index
    %c0_38 = arith.constant 0 : index
    %53 = vector.load %arg3[%c1_37, %c0_38] : memref<10x128xf32, #tpu.memory_space<vmem>>, vector<1x128xf32>
    %cst_39 = arith.constant 9.99999974E-6 : f32
    %54 = vector.broadcast %cst_39 : f32 to vector<1x128xf32>
    %55 = arith.addf %51, %54 : vector<1x128xf32>
    %56 = math.rsqrt %55 : vector<1x128xf32>
    %57 = arith.mulf %52, %56 : vector<1x128xf32>
    %58 = arith.mulf %36, %57 : vector<1x128xf32>
    %59 = arith.subf %53, %58 : vector<1x128xf32>
    %60 = vector.broadcast %57 : vector<1x128xf32> to vector<80x128xf32>
    %61 = arith.mulf %25, %60 : vector<80x128xf32>
    %62 = vector.broadcast %59 : vector<1x128xf32> to vector<80x128xf32>
    %63 = arith.addf %61, %62 : vector<80x128xf32>
    %cst_40 = arith.constant 0.000000e+00 : f32
    %64 = vector.broadcast %cst_40 : f32 to vector<80x128xf32>
    %65 = arith.maximumf %63, %64 : vector<80x128xf32>
    %c8_41 = arith.constant 8 : index
    %c0_42 = arith.constant 0 : index
    %66 = vector.load %arg6[%c8_41, %c0_42] : memref<96x128xf32, #tpu.memory_space<vmem>>, vector<80x128xf32>
    tpu.vector_store %arg6[%c8_41, %c0_42], %65 {strides = array<i32>} : memref<96x128xf32, #tpu.memory_space<vmem>>, vector<80x128xf32>,
    %cst_43 = arith.constant 0.000000e+00 : f32
    %67 = vector.broadcast %cst_43 : f32 to vector<8x128xf32>
    %c0_44 = arith.constant 0 : index
    %c0_45 = arith.constant 0 : index
    %68 = vector.load %arg6[%c0_44, %c0_45] : memref<96x128xf32, #tpu.memory_space<vmem>>, vector<8x128xf32>
    tpu.vector_store %arg6[%c0_44, %c0_45], %67 {strides = array<i32>} : memref<96x128xf32, #tpu.memory_space<vmem>>, vector<8x128xf32>,
    %cst_46 = arith.constant 0.000000e+00 : f32
    %69 = vector.broadcast %cst_46 : f32 to vector<8x128xf32>
    %c40_47 = arith.constant 40 : index
    %c0_48 = arith.constant 0 : index
    %70 = vector.load %arg6[%c40_47, %c0_48] : memref<96x128xf32, #tpu.memory_space<vmem>>, vector<8x128xf32>
    tpu.vector_store %arg6[%c40_47, %c0_48], %69 {strides = array<i32>} : memref<96x128xf32, #tpu.memory_space<vmem>>, vector<8x128xf32>,
    %cst_49 = arith.constant 0.000000e+00 : f32
    %71 = vector.broadcast %cst_49 : f32 to vector<16x128xf32>
    %c80_50 = arith.constant 80 : index
    %c0_51 = arith.constant 0 : index
    %72 = vector.load %arg6[%c80_50, %c0_51] : memref<96x128xf32, #tpu.memory_space<vmem>>, vector<16x128xf32>
    tpu.vector_store %arg6[%c80_50, %c0_51], %71 {strides = array<i32>} : memref<96x128xf32, #tpu.memory_space<vmem>>, vector<16x128xf32>,
    %c8_52 = arith.constant 8 : index
    %c0_53 = arith.constant 0 : index
    %73 = tpu.strided_load %arg6[%c8_52, %c0_53] {strides = array<i32: 2, 1>} : memref<96x128xf32, #tpu.memory_space<vmem>>, vector<16x128xf32>
    %c9_54 = arith.constant 9 : index
    %c0_55 = arith.constant 0 : index
    %74 = tpu.strided_load %arg6[%c9_54, %c0_55] {strides = array<i32: 2, 1>} : memref<96x128xf32, #tpu.memory_space<vmem>>, vector<16x128xf32>
    %75 = arith.maximumf %73, %74 : vector<16x128xf32>
    %c8_56 = arith.constant 8 : index
    %c0_57 = arith.constant 0 : index
    %76 = vector.load %arg7[%c8_56, %c0_57] : memref<96x128xf32, #tpu.memory_space<vmem>>, vector<16x128xf32>
    tpu.vector_store %arg7[%c8_56, %c0_57], %75 {strides = array<i32>} : memref<96x128xf32, #tpu.memory_space<vmem>>, vector<16x128xf32>,
    %c48_58 = arith.constant 48 : index
    %c0_59 = arith.constant 0 : index
    %77 = tpu.strided_load %arg6[%c48_58, %c0_59] {strides = array<i32: 2, 1>} : memref<96x128xf32, #tpu.memory_space<vmem>>, vector<16x128xf32>
    %c49 = arith.constant 49 : index
    %c0_60 = arith.constant 0 : index
    %78 = tpu.strided_load %arg6[%c49, %c0_60] {strides = array<i32: 2, 1>} : memref<96x128xf32, #tpu.memory_space<vmem>>, vector<16x128xf32>
    %79 = arith.maximumf %77, %78 : vector<16x128xf32>
    %c32 = arith.constant 32 : index
    %c0_61 = arith.constant 0 : index
    %80 = vector.load %arg7[%c32, %c0_61] : memref<96x128xf32, #tpu.memory_space<vmem>>, vector<16x128xf32>
    tpu.vector_store %arg7[%c32, %c0_61], %79 {strides = array<i32>} : memref<96x128xf32, #tpu.memory_space<vmem>>, vector<16x128xf32>,
    %cst_62 = arith.constant 0.000000e+00 : f32
    %81 = vector.broadcast %cst_62 : f32 to vector<8x128xf32>
    %c0_63 = arith.constant 0 : index
    %c0_64 = arith.constant 0 : index
    %82 = vector.load %arg7[%c0_63, %c0_64] : memref<96x128xf32, #tpu.memory_space<vmem>>, vector<8x128xf32>
    tpu.vector_store %arg7[%c0_63, %c0_64], %81 {strides = array<i32>} : memref<96x128xf32, #tpu.memory_space<vmem>>, vector<8x128xf32>,
    %cst_65 = arith.constant 0.000000e+00 : f32
    %83 = vector.broadcast %cst_65 : f32 to vector<8x128xf32>
    %c24 = arith.constant 24 : index
    %c0_66 = arith.constant 0 : index
    %84 = vector.load %arg7[%c24, %c0_66] : memref<96x128xf32, #tpu.memory_space<vmem>>, vector<8x128xf32>
    tpu.vector_store %arg7[%c24, %c0_66], %83 {strides = array<i32>} : memref<96x128xf32, #tpu.memory_space<vmem>>, vector<8x128xf32>,
    %cst_67 = arith.constant 0.000000e+00 : f32
    %85 = vector.broadcast %cst_67 : f32 to vector<16x128xf32>
    %c48_68 = arith.constant 48 : index
    %c0_69 = arith.constant 0 : index
    %86 = vector.load %arg7[%c48_68, %c0_69] : memref<96x128xf32, #tpu.memory_space<vmem>>, vector<16x128xf32>
    tpu.vector_store %arg7[%c48_68, %c0_69], %85 {strides = array<i32>} : memref<96x128xf32, #tpu.memory_space<vmem>>, vector<16x128xf32>,
    %c7_70 = arith.constant 7 : index
    %c0_71 = arith.constant 0 : index
    %87 = vector.load %arg7[%c7_70, %c0_71] : memref<96x128xf32, #tpu.memory_space<vmem>>, vector<48x128xf32>
    %c3 = arith.constant 3 : index
    %c0_72 = arith.constant 0 : index
    %c0_73 = arith.constant 0 : index
    %88 = vector.load %arg2[%c3, %c0_72, %c0_73] : memref<30x128x128xf32, #tpu.memory_space<vmem>>, vector<1x128x128xf32>
    %89 = vector.shape_cast %88 : vector<1x128x128xf32> to vector<128x128xf32>
    %cst_74 = arith.constant dense<0.000000e+00> : vector<48x128xf32>
    %90 = tpu.matmul %87, %89, %cst_74 {dimension_numbers = #tpu.dot_dimension_numbers<[1], [0], [0], [1], [0, 0, 1, 1], [], []>} : vector<48x128xf32>, vector<128x128xf32>, vector<48x128xf32> -> vector<48x128xf32>
    %c8_75 = arith.constant 8 : index
    %c0_76 = arith.constant 0 : index
    %91 = vector.load %arg7[%c8_75, %c0_76] : memref<96x128xf32, #tpu.memory_space<vmem>>, vector<48x128xf32>
    %c4 = arith.constant 4 : index
    %c0_77 = arith.constant 0 : index
    %c0_78 = arith.constant 0 : index
    %92 = vector.load %arg2[%c4, %c0_77, %c0_78] : memref<30x128x128xf32, #tpu.memory_space<vmem>>, vector<1x128x128xf32>
    %93 = vector.shape_cast %92 : vector<1x128x128xf32> to vector<128x128xf32>
    %cst_79 = arith.constant dense<0.000000e+00> : vector<48x128xf32>
    %94 = tpu.matmul %91, %93, %cst_79 {dimension_numbers = #tpu.dot_dimension_numbers<[1], [0], [0], [1], [0, 0, 1, 1], [], []>} : vector<48x128xf32>, vector<128x128xf32>, vector<48x128xf32> -> vector<48x128xf32>
    %95 = arith.addf %90, %94 : vector<48x128xf32>
    %c9_80 = arith.constant 9 : index
    %c0_81 = arith.constant 0 : index
    %96 = vector.load %arg7[%c9_80, %c0_81] : memref<96x128xf32, #tpu.memory_space<vmem>>, vector<48x128xf32>
    %c5 = arith.constant 5 : index
    %c0_82 = arith.constant 0 : index
    %c0_83 = arith.constant 0 : index
    %97 = vector.load %arg2[%c5, %c0_82, %c0_83] : memref<30x128x128xf32, #tpu.memory_space<vmem>>, vector<1x128x128xf32>
    %98 = vector.shape_cast %97 : vector<1x128x128xf32> to vector<128x128xf32>
    %cst_84 = arith.constant dense<0.000000e+00> : vector<48x128xf32>
    %99 = tpu.matmul %96, %98, %cst_84 {dimension_numbers = #tpu.dot_dimension_numbers<[1], [0], [0], [1], [0, 0, 1, 1], [], []>} : vector<48x128xf32>, vector<128x128xf32>, vector<48x128xf32> -> vector<48x128xf32>
    %100 = arith.addf %95, %99 : vector<48x128xf32>
    %101 = vector.extract_strided_slice %100 {offsets = [0, 0], sizes = [16, 128], strides = [1, 1]} : vector<48x128xf32> to vector<16x128xf32>
    %102 = vector.extract_strided_slice %100 {offsets = [24, 0], sizes = [16, 128], strides = [1, 1]} : vector<48x128xf32> to vector<16x128xf32>
    %cst_85 = arith.constant dense<0.000000e+00> : vector<128xf32>
    %103 = vector.multi_reduction <add>, %101, %cst_85 [0] : vector<16x128xf32> to vector<128xf32>
    %104 = vector.shape_cast %103 : vector<128xf32> to vector<1x128xf32>
    %cst_86 = arith.constant 0.000000e+00 : f32
    %105 = vector.broadcast %cst_86 : f32 to vector<1x128xf32>
    %106 = arith.addf %105, %104 : vector<1x128xf32>
    %cst_87 = arith.constant dense<0.000000e+00> : vector<128xf32>
    %107 = vector.multi_reduction <add>, %102, %cst_87 [0] : vector<16x128xf32> to vector<128xf32>
    %108 = vector.shape_cast %107 : vector<128xf32> to vector<1x128xf32>
    %109 = arith.addf %106, %108 : vector<1x128xf32>
    %cst_88 = arith.constant 3.200000e+01 : f32
    %110 = vector.broadcast %cst_88 : f32 to vector<1x128xf32>
    %111 = arith.divf %109, %110 : vector<1x128xf32>
    %112 = vector.broadcast %111 : vector<1x128xf32> to vector<16x128xf32>
    %113 = arith.subf %101, %112 : vector<16x128xf32>
    %114 = arith.mulf %113, %113 : vector<16x128xf32>
    %cst_89 = arith.constant dense<0.000000e+00> : vector<128xf32>
    %115 = vector.multi_reduction <add>, %114, %cst_89 [0] : vector<16x128xf32> to vector<128xf32>
    %116 = vector.shape_cast %115 : vector<128xf32> to vector<1x128xf32>
    %cst_90 = arith.constant 0.000000e+00 : f32
    %117 = vector.broadcast %cst_90 : f32 to vector<1x128xf32>
    %118 = arith.addf %117, %116 : vector<1x128xf32>
    %119 = vector.broadcast %111 : vector<1x128xf32> to vector<16x128xf32>
    %120 = arith.subf %102, %119 : vector<16x128xf32>
    %121 = arith.mulf %120, %120 : vector<16x128xf32>
    %cst_91 = arith.constant dense<0.000000e+00> : vector<128xf32>
    %122 = vector.multi_reduction <add>, %121, %cst_91 [0] : vector<16x128xf32> to vector<128xf32>
    %123 = vector.shape_cast %122 : vector<128xf32> to vector<1x128xf32>
    %124 = arith.addf %118, %123 : vector<1x128xf32>
    %cst_92 = arith.constant 3.200000e+01 : f32
    %125 = vector.broadcast %cst_92 : f32 to vector<1x128xf32>
    %126 = arith.divf %124, %125 : vector<1x128xf32>
    %c2_93 = arith.constant 2 : index
    %c0_94 = arith.constant 0 : index
    %127 = vector.load %arg3[%c2_93, %c0_94] : memref<10x128xf32, #tpu.memory_space<vmem>>, vector<1x128xf32>
    %c3_95 = arith.constant 3 : index
    %c0_96 = arith.constant 0 : index
    %128 = vector.load %arg3[%c3_95, %c0_96] : memref<10x128xf32, #tpu.memory_space<vmem>>, vector<1x128xf32>
    %cst_97 = arith.constant 9.99999974E-6 : f32
    %129 = vector.broadcast %cst_97 : f32 to vector<1x128xf32>
    %130 = arith.addf %126, %129 : vector<1x128xf32>
    %131 = math.rsqrt %130 : vector<1x128xf32>
    %132 = arith.mulf %127, %131 : vector<1x128xf32>
    %133 = arith.mulf %111, %132 : vector<1x128xf32>
    %134 = arith.subf %128, %133 : vector<1x128xf32>
    %135 = vector.broadcast %132 : vector<1x128xf32> to vector<48x128xf32>
    %136 = arith.mulf %100, %135 : vector<48x128xf32>
    %137 = vector.broadcast %134 : vector<1x128xf32> to vector<48x128xf32>
    %138 = arith.addf %136, %137 : vector<48x128xf32>
    %cst_98 = arith.constant 0.000000e+00 : f32
    %139 = vector.broadcast %cst_98 : f32 to vector<48x128xf32>
    %140 = arith.maximumf %138, %139 : vector<48x128xf32>
    %c8_99 = arith.constant 8 : index
    %c0_100 = arith.constant 0 : index
    %141 = vector.load %arg5[%c8_99, %c0_100] : memref<96x128xf32, #tpu.memory_space<vmem>>, vector<48x128xf32>
    tpu.vector_store %arg5[%c8_99, %c0_100], %140 {strides = array<i32>} : memref<96x128xf32, #tpu.memory_space<vmem>>, vector<48x128xf32>,
    %cst_101 = arith.constant 0.000000e+00 : f32
    %142 = vector.broadcast %cst_101 : f32 to vector<8x128xf32>
    %c0_102 = arith.constant 0 : index
    %c0_103 = arith.constant 0 : index
    %143 = vector.load %arg5[%c0_102, %c0_103] : memref<96x128xf32, #tpu.memory_space<vmem>>, vector<8x128xf32>
    tpu.vector_store %arg5[%c0_102, %c0_103], %142 {strides = array<i32>} : memref<96x128xf32, #tpu.memory_space<vmem>>, vector<8x128xf32>,
    %cst_104 = arith.constant 0.000000e+00 : f32
    %144 = vector.broadcast %cst_104 : f32 to vector<8x128xf32>
    %c24_105 = arith.constant 24 : index
    %c0_106 = arith.constant 0 : index
    %145 = vector.load %arg5[%c24_105, %c0_106] : memref<96x128xf32, #tpu.memory_space<vmem>>, vector<8x128xf32>
    tpu.vector_store %arg5[%c24_105, %c0_106], %144 {strides = array<i32>} : memref<96x128xf32, #tpu.memory_space<vmem>>, vector<8x128xf32>,
    %cst_107 = arith.constant 0.000000e+00 : f32
    %146 = vector.broadcast %cst_107 : f32 to vector<16x128xf32>
    %c48_108 = arith.constant 48 : index
    %c0_109 = arith.constant 0 : index
    %147 = vector.load %arg5[%c48_108, %c0_109] : memref<96x128xf32, #tpu.memory_space<vmem>>, vector<16x128xf32>
    tpu.vector_store %arg5[%c48_108, %c0_109], %146 {strides = array<i32>} : memref<96x128xf32, #tpu.memory_space<vmem>>, vector<16x128xf32>,
    %c8_110 = arith.constant 8 : index
    %c0_111 = arith.constant 0 : index
    %148 = tpu.strided_load %arg5[%c8_110, %c0_111] {strides = array<i32: 2, 1>} : memref<96x128xf32, #tpu.memory_space<vmem>>, vector<8x128xf32>
    %c9_112 = arith.constant 9 : index
    %c0_113 = arith.constant 0 : index
    %149 = tpu.strided_load %arg5[%c9_112, %c0_113] {strides = array<i32: 2, 1>} : memref<96x128xf32, #tpu.memory_space<vmem>>, vector<8x128xf32>
    %150 = arith.maximumf %148, %149 : vector<8x128xf32>
    %c8_114 = arith.constant 8 : index
    %c0_115 = arith.constant 0 : index
    %151 = vector.load %arg6[%c8_114, %c0_115] : memref<96x128xf32, #tpu.memory_space<vmem>>, vector<8x128xf32>
    tpu.vector_store %arg6[%c8_114, %c0_115], %150 {strides = array<i32>} : memref<96x128xf32, #tpu.memory_space<vmem>>, vector<8x128xf32>,
    %c32_116 = arith.constant 32 : index
    %c0_117 = arith.constant 0 : index
    %152 = tpu.strided_load %arg5[%c32_116, %c0_117] {strides = array<i32: 2, 1>} : memref<96x128xf32, #tpu.memory_space<vmem>>, vector<8x128xf32>
    %c33 = arith.constant 33 : index
    %c0_118 = arith.constant 0 : index
    %153 = tpu.strided_load %arg5[%c33, %c0_118] {strides = array<i32: 2, 1>} : memref<96x128xf32, #tpu.memory_space<vmem>>, vector<8x128xf32>
    %154 = arith.maximumf %152, %153 : vector<8x128xf32>
    %c24_119 = arith.constant 24 : index
    %c0_120 = arith.constant 0 : index
    %155 = vector.load %arg6[%c24_119, %c0_120] : memref<96x128xf32, #tpu.memory_space<vmem>>, vector<8x128xf32>
    tpu.vector_store %arg6[%c24_119, %c0_120], %154 {strides = array<i32>} : memref<96x128xf32, #tpu.memory_space<vmem>>, vector<8x128xf32>,
    %cst_121 = arith.constant 0.000000e+00 : f32
    %156 = vector.broadcast %cst_121 : f32 to vector<8x128xf32>
    %c0_122 = arith.constant 0 : index
    %c0_123 = arith.constant 0 : index
    %157 = vector.load %arg6[%c0_122, %c0_123] : memref<96x128xf32, #tpu.memory_space<vmem>>, vector<8x128xf32>
    tpu.vector_store %arg6[%c0_122, %c0_123], %156 {strides = array<i32>} : memref<96x128xf32, #tpu.memory_space<vmem>>, vector<8x128xf32>,
    %cst_124 = arith.constant 0.000000e+00 : f32
    %158 = vector.broadcast %cst_124 : f32 to vector<8x128xf32>
    %c16 = arith.constant 16 : index
    %c0_125 = arith.constant 0 : index
    %159 = vector.load %arg6[%c16, %c0_125] : memref<96x128xf32, #tpu.memory_space<vmem>>, vector<8x128xf32>
    tpu.vector_store %arg6[%c16, %c0_125], %158 {strides = array<i32>} : memref<96x128xf32, #tpu.memory_space<vmem>>, vector<8x128xf32>,
    %cst_126 = arith.constant 0.000000e+00 : f32
    %160 = vector.broadcast %cst_126 : f32 to vector<16x128xf32>
    %c32_127 = arith.constant 32 : index
    %c0_128 = arith.constant 0 : index
    %161 = vector.load %arg6[%c32_127, %c0_128] : memref<96x128xf32, #tpu.memory_space<vmem>>, vector<16x128xf32>
    tpu.vector_store %arg6[%c32_127, %c0_128], %160 {strides = array<i32>} : memref<96x128xf32, #tpu.memory_space<vmem>>, vector<16x128xf32>,
    %c7_129 = arith.constant 7 : index
    %c0_130 = arith.constant 0 : index
    %162 = vector.load %arg6[%c7_129, %c0_130] : memref<96x128xf32, #tpu.memory_space<vmem>>, vector<32x128xf32>
    %c6 = arith.constant 6 : index
    %c0_131 = arith.constant 0 : index
    %c0_132 = arith.constant 0 : index
    %163 = vector.load %arg2[%c6, %c0_131, %c0_132] : memref<30x128x128xf32, #tpu.memory_space<vmem>>, vector<1x128x128xf32>
    %164 = vector.shape_cast %163 : vector<1x128x128xf32> to vector<128x128xf32>
    %cst_133 = arith.constant dense<0.000000e+00> : vector<32x128xf32>
    %165 = tpu.matmul %162, %164, %cst_133 {dimension_numbers = #tpu.dot_dimension_numbers<[1], [0], [0], [1], [0, 0, 1, 1], [], []>} : vector<32x128xf32>, vector<128x128xf32>, vector<32x128xf32> -> vector<32x128xf32>
    %c8_134 = arith.constant 8 : index
    %c0_135 = arith.constant 0 : index
    %166 = vector.load %arg6[%c8_134, %c0_135] : memref<96x128xf32, #tpu.memory_space<vmem>>, vector<32x128xf32>
    %c7_136 = arith.constant 7 : index
    %c0_137 = arith.constant 0 : index
    %c0_138 = arith.constant 0 : index
    %167 = vector.load %arg2[%c7_136, %c0_137, %c0_138] : memref<30x128x128xf32, #tpu.memory_space<vmem>>, vector<1x128x128xf32>
    %168 = vector.shape_cast %167 : vector<1x128x128xf32> to vector<128x128xf32>
    %cst_139 = arith.constant dense<0.000000e+00> : vector<32x128xf32>
    %169 = tpu.matmul %166, %168, %cst_139 {dimension_numbers = #tpu.dot_dimension_numbers<[1], [0], [0], [1], [0, 0, 1, 1], [], []>} : vector<32x128xf32>, vector<128x128xf32>, vector<32x128xf32> -> vector<32x128xf32>
    %170 = arith.addf %165, %169 : vector<32x128xf32>
    %c9_140 = arith.constant 9 : index
    %c0_141 = arith.constant 0 : index
    %171 = vector.load %arg6[%c9_140, %c0_141] : memref<96x128xf32, #tpu.memory_space<vmem>>, vector<32x128xf32>
    %c8_142 = arith.constant 8 : index
    %c0_143 = arith.constant 0 : index
    %c0_144 = arith.constant 0 : index
    %172 = vector.load %arg2[%c8_142, %c0_143, %c0_144] : memref<30x128x128xf32, #tpu.memory_space<vmem>>, vector<1x128x128xf32>
    %173 = vector.shape_cast %172 : vector<1x128x128xf32> to vector<128x128xf32>
    %cst_145 = arith.constant dense<0.000000e+00> : vector<32x128xf32>
    %174 = tpu.matmul %171, %173, %cst_145 {dimension_numbers = #tpu.dot_dimension_numbers<[1], [0], [0], [1], [0, 0, 1, 1], [], []>} : vector<32x128xf32>, vector<128x128xf32>, vector<32x128xf32> -> vector<32x128xf32>
    %175 = arith.addf %170, %174 : vector<32x128xf32>
    %176 = vector.extract_strided_slice %175 {offsets = [0, 0], sizes = [8, 128], strides = [1, 1]} : vector<32x128xf32> to vector<8x128xf32>
    %177 = vector.extract_strided_slice %175 {offsets = [16, 0], sizes = [8, 128], strides = [1, 1]} : vector<32x128xf32> to vector<8x128xf32>
    %cst_146 = arith.constant dense<0.000000e+00> : vector<128xf32>
    %178 = vector.multi_reduction <add>, %176, %cst_146 [0] : vector<8x128xf32> to vector<128xf32>
    %179 = vector.shape_cast %178 : vector<128xf32> to vector<1x128xf32>
    %cst_147 = arith.constant 0.000000e+00 : f32
    %180 = vector.broadcast %cst_147 : f32 to vector<1x128xf32>
    %181 = arith.addf %180, %179 : vector<1x128xf32>
    %cst_148 = arith.constant dense<0.000000e+00> : vector<128xf32>
    %182 = vector.multi_reduction <add>, %177, %cst_148 [0] : vector<8x128xf32> to vector<128xf32>
    %183 = vector.shape_cast %182 : vector<128xf32> to vector<1x128xf32>
    %184 = arith.addf %181, %183 : vector<1x128xf32>
    %cst_149 = arith.constant 1.600000e+01 : f32
    %185 = vector.broadcast %cst_149 : f32 to vector<1x128xf32>
    %186 = arith.divf %184, %185 : vector<1x128xf32>
    %187 = vector.broadcast %186 : vector<1x128xf32> to vector<8x128xf32>
    %188 = arith.subf %176, %187 : vector<8x128xf32>
    %189 = arith.mulf %188, %188 : vector<8x128xf32>
    %cst_150 = arith.constant dense<0.000000e+00> : vector<128xf32>
    %190 = vector.multi_reduction <add>, %189, %cst_150 [0] : vector<8x128xf32> to vector<128xf32>
    %191 = vector.shape_cast %190 : vector<128xf32> to vector<1x128xf32>
    %cst_151 = arith.constant 0.000000e+00 : f32
    %192 = vector.broadcast %cst_151 : f32 to vector<1x128xf32>
    %193 = arith.addf %192, %191 : vector<1x128xf32>
    %194 = vector.broadcast %186 : vector<1x128xf32> to vector<8x128xf32>
    %195 = arith.subf %177, %194 : vector<8x128xf32>
    %196 = arith.mulf %195, %195 : vector<8x128xf32>
    %cst_152 = arith.constant dense<0.000000e+00> : vector<128xf32>
    %197 = vector.multi_reduction <add>, %196, %cst_152 [0] : vector<8x128xf32> to vector<128xf32>
    %198 = vector.shape_cast %197 : vector<128xf32> to vector<1x128xf32>
    %199 = arith.addf %193, %198 : vector<1x128xf32>
    %cst_153 = arith.constant 1.600000e+01 : f32
    %200 = vector.broadcast %cst_153 : f32 to vector<1x128xf32>
    %201 = arith.divf %199, %200 : vector<1x128xf32>
    %c4_154 = arith.constant 4 : index
    %c0_155 = arith.constant 0 : index
    %202 = vector.load %arg3[%c4_154, %c0_155] : memref<10x128xf32, #tpu.memory_space<vmem>>, vector<1x128xf32>
    %c5_156 = arith.constant 5 : index
    %c0_157 = arith.constant 0 : index
    %203 = vector.load %arg3[%c5_156, %c0_157] : memref<10x128xf32, #tpu.memory_space<vmem>>, vector<1x128xf32>
    %cst_158 = arith.constant 9.99999974E-6 : f32
    %204 = vector.broadcast %cst_158 : f32 to vector<1x128xf32>
    %205 = arith.addf %201, %204 : vector<1x128xf32>
    %206 = math.rsqrt %205 : vector<1x128xf32>
    %207 = arith.mulf %202, %206 : vector<1x128xf32>
    %208 = arith.mulf %186, %207 : vector<1x128xf32>
    %209 = arith.subf %203, %208 : vector<1x128xf32>
    %210 = vector.broadcast %207 : vector<1x128xf32> to vector<32x128xf32>
    %211 = arith.mulf %175, %210 : vector<32x128xf32>
    %212 = vector.broadcast %209 : vector<1x128xf32> to vector<32x128xf32>
    %213 = arith.addf %211, %212 : vector<32x128xf32>
    %cst_159 = arith.constant 0.000000e+00 : f32
    %214 = vector.broadcast %cst_159 : f32 to vector<32x128xf32>
    %215 = arith.maximumf %213, %214 : vector<32x128xf32>
    %c8_160 = arith.constant 8 : index
    %c0_161 = arith.constant 0 : index
    %216 = vector.load %arg5[%c8_160, %c0_161] : memref<96x128xf32, #tpu.memory_space<vmem>>, vector<32x128xf32>
    tpu.vector_store %arg5[%c8_160, %c0_161], %215 {strides = array<i32>} : memref<96x128xf32, #tpu.memory_space<vmem>>, vector<32x128xf32>,
    %cst_162 = arith.constant 0.000000e+00 : f32
    %217 = vector.broadcast %cst_162 : f32 to vector<8x128xf32>
    %c0_163 = arith.constant 0 : index
    %c0_164 = arith.constant 0 : index
    %218 = vector.load %arg5[%c0_163, %c0_164] : memref<96x128xf32, #tpu.memory_space<vmem>>, vector<8x128xf32>
    tpu.vector_store %arg5[%c0_163, %c0_164], %217 {strides = array<i32>} : memref<96x128xf32, #tpu.memory_space<vmem>>, vector<8x128xf32>,
    %cst_165 = arith.constant 0.000000e+00 : f32
    %219 = vector.broadcast %cst_165 : f32 to vector<8x128xf32>
    %c16_166 = arith.constant 16 : index
    %c0_167 = arith.constant 0 : index
    %220 = vector.load %arg5[%c16_166, %c0_167] : memref<96x128xf32, #tpu.memory_space<vmem>>, vector<8x128xf32>
    tpu.vector_store %arg5[%c16_166, %c0_167], %219 {strides = array<i32>} : memref<96x128xf32, #tpu.memory_space<vmem>>, vector<8x128xf32>,
    %cst_168 = arith.constant 0.000000e+00 : f32
    %221 = vector.broadcast %cst_168 : f32 to vector<16x128xf32>
    %c32_169 = arith.constant 32 : index
    %c0_170 = arith.constant 0 : index
    %222 = vector.load %arg5[%c32_169, %c0_170] : memref<96x128xf32, #tpu.memory_space<vmem>>, vector<16x128xf32>
    tpu.vector_store %arg5[%c32_169, %c0_170], %221 {strides = array<i32>} : memref<96x128xf32, #tpu.memory_space<vmem>>, vector<16x128xf32>,
    %c7_171 = arith.constant 7 : index
    %c0_172 = arith.constant 0 : index
    %223 = vector.load %arg5[%c7_171, %c0_172] : memref<96x128xf32, #tpu.memory_space<vmem>>, vector<32x128xf32>
    %c9_173 = arith.constant 9 : index
    %c0_174 = arith.constant 0 : index
    %c0_175 = arith.constant 0 : index
    %224 = vector.load %arg2[%c9_173, %c0_174, %c0_175] : memref<30x128x128xf32, #tpu.memory_space<vmem>>, vector<1x128x128xf32>
    %225 = vector.shape_cast %224 : vector<1x128x128xf32> to vector<128x128xf32>
    %cst_176 = arith.constant dense<0.000000e+00> : vector<32x128xf32>
    %226 = tpu.matmul %223, %225, %cst_176 {dimension_numbers = #tpu.dot_dimension_numbers<[1], [0], [0], [1], [0, 0, 1, 1], [], []>} : vector<32x128xf32>, vector<128x128xf32>, vector<32x128xf32> -> vector<32x128xf32>
    %c8_177 = arith.constant 8 : index
    %c0_178 = arith.constant 0 : index
    %227 = vector.load %arg5[%c8_177, %c0_178] : memref<96x128xf32, #tpu.memory_space<vmem>>, vector<32x128xf32>
    %c10 = arith.constant 10 : index
    %c0_179 = arith.constant 0 : index
    %c0_180 = arith.constant 0 : index
    %228 = vector.load %arg2[%c10, %c0_179, %c0_180] : memref<30x128x128xf32, #tpu.memory_space<vmem>>, vector<1x128x128xf32>
    %229 = vector.shape_cast %228 : vector<1x128x128xf32> to vector<128x128xf32>
    %cst_181 = arith.constant dense<0.000000e+00> : vector<32x128xf32>
    %230 = tpu.matmul %227, %229, %cst_181 {dimension_numbers = #tpu.dot_dimension_numbers<[1], [0], [0], [1], [0, 0, 1, 1], [], []>} : vector<32x128xf32>, vector<128x128xf32>, vector<32x128xf32> -> vector<32x128xf32>
    %231 = arith.addf %226, %230 : vector<32x128xf32>
    %c9_182 = arith.constant 9 : index
    %c0_183 = arith.constant 0 : index
    %232 = vector.load %arg5[%c9_182, %c0_183] : memref<96x128xf32, #tpu.memory_space<vmem>>, vector<32x128xf32>
    %c11 = arith.constant 11 : index
    %c0_184 = arith.constant 0 : index
    %c0_185 = arith.constant 0 : index
    %233 = vector.load %arg2[%c11, %c0_184, %c0_185] : memref<30x128x128xf32, #tpu.memory_space<vmem>>, vector<1x128x128xf32>
    %234 = vector.shape_cast %233 : vector<1x128x128xf32> to vector<128x128xf32>
    %cst_186 = arith.constant dense<0.000000e+00> : vector<32x128xf32>
    %235 = tpu.matmul %232, %234, %cst_186 {dimension_numbers = #tpu.dot_dimension_numbers<[1], [0], [0], [1], [0, 0, 1, 1], [], []>} : vector<32x128xf32>, vector<128x128xf32>, vector<32x128xf32> -> vector<32x128xf32>
    %236 = arith.addf %231, %235 : vector<32x128xf32>
    %237 = vector.extract_strided_slice %236 {offsets = [0, 0], sizes = [8, 128], strides = [1, 1]} : vector<32x128xf32> to vector<8x128xf32>
    %238 = vector.extract_strided_slice %236 {offsets = [16, 0], sizes = [8, 128], strides = [1, 1]} : vector<32x128xf32> to vector<8x128xf32>
    %cst_187 = arith.constant dense<0.000000e+00> : vector<128xf32>
    %239 = vector.multi_reduction <add>, %237, %cst_187 [0] : vector<8x128xf32> to vector<128xf32>
    %240 = vector.shape_cast %239 : vector<128xf32> to vector<1x128xf32>
    %cst_188 = arith.constant 0.000000e+00 : f32
    %241 = vector.broadcast %cst_188 : f32 to vector<1x128xf32>
    %242 = arith.addf %241, %240 : vector<1x128xf32>
    %cst_189 = arith.constant dense<0.000000e+00> : vector<128xf32>
    %243 = vector.multi_reduction <add>, %238, %cst_189 [0] : vector<8x128xf32> to vector<128xf32>
    %244 = vector.shape_cast %243 : vector<128xf32> to vector<1x128xf32>
    %245 = arith.addf %242, %244 : vector<1x128xf32>
    %cst_190 = arith.constant 1.600000e+01 : f32
    %246 = vector.broadcast %cst_190 : f32 to vector<1x128xf32>
    %247 = arith.divf %245, %246 : vector<1x128xf32>
    %248 = vector.broadcast %247 : vector<1x128xf32> to vector<8x128xf32>
    %249 = arith.subf %237, %248 : vector<8x128xf32>
    %250 = arith.mulf %249, %249 : vector<8x128xf32>
    %cst_191 = arith.constant dense<0.000000e+00> : vector<128xf32>
    %251 = vector.multi_reduction <add>, %250, %cst_191 [0] : vector<8x128xf32> to vector<128xf32>
    %252 = vector.shape_cast %251 : vector<128xf32> to vector<1x128xf32>
    %cst_192 = arith.constant 0.000000e+00 : f32
    %253 = vector.broadcast %cst_192 : f32 to vector<1x128xf32>
    %254 = arith.addf %253, %252 : vector<1x128xf32>
    %255 = vector.broadcast %247 : vector<1x128xf32> to vector<8x128xf32>
    %256 = arith.subf %238, %255 : vector<8x128xf32>
    %257 = arith.mulf %256, %256 : vector<8x128xf32>
    %cst_193 = arith.constant dense<0.000000e+00> : vector<128xf32>
    %258 = vector.multi_reduction <add>, %257, %cst_193 [0] : vector<8x128xf32> to vector<128xf32>
    %259 = vector.shape_cast %258 : vector<128xf32> to vector<1x128xf32>
    %260 = arith.addf %254, %259 : vector<1x128xf32>
    %cst_194 = arith.constant 1.600000e+01 : f32
    %261 = vector.broadcast %cst_194 : f32 to vector<1x128xf32>
    %262 = arith.divf %260, %261 : vector<1x128xf32>
    %c4_195 = arith.constant 4 : index
    %c0_196 = arith.constant 0 : index
    %263 = vector.load %arg3[%c4_195, %c0_196] : memref<10x128xf32, #tpu.memory_space<vmem>>, vector<1x128xf32>
    %c5_197 = arith.constant 5 : index
    %c0_198 = arith.constant 0 : index
    %264 = vector.load %arg3[%c5_197, %c0_198] : memref<10x128xf32, #tpu.memory_space<vmem>>, vector<1x128xf32>
    %cst_199 = arith.constant 9.99999974E-6 : f32
    %265 = vector.broadcast %cst_199 : f32 to vector<1x128xf32>
    %266 = arith.addf %262, %265 : vector<1x128xf32>
    %267 = math.rsqrt %266 : vector<1x128xf32>
    %268 = arith.mulf %263, %267 : vector<1x128xf32>
    %269 = arith.mulf %247, %268 : vector<1x128xf32>
    %270 = arith.subf %264, %269 : vector<1x128xf32>
    %271 = vector.broadcast %268 : vector<1x128xf32> to vector<32x128xf32>
    %272 = arith.mulf %236, %271 : vector<32x128xf32>
    %273 = vector.broadcast %270 : vector<1x128xf32> to vector<32x128xf32>
    %274 = arith.addf %272, %273 : vector<32x128xf32>
    %c8_200 = arith.constant 8 : index
    %c0_201 = arith.constant 0 : index
    %275 = vector.load %arg6[%c8_200, %c0_201] : memref<96x128xf32, #tpu.memory_space<vmem>>, vector<32x128xf32>
    %276 = arith.addf %274, %275 : vector<32x128xf32>
    %cst_202 = arith.constant 0.000000e+00 : f32
    %277 = vector.broadcast %cst_202 : f32 to vector<32x128xf32>
    %278 = arith.maximumf %276, %277 : vector<32x128xf32>
    %c8_203 = arith.constant 8 : index
    %c0_204 = arith.constant 0 : index
    %279 = vector.load %arg7[%c8_203, %c0_204] : memref<96x128xf32, #tpu.memory_space<vmem>>, vector<32x128xf32>
    tpu.vector_store %arg7[%c8_203, %c0_204], %278 {strides = array<i32>} : memref<96x128xf32, #tpu.memory_space<vmem>>, vector<32x128xf32>,
    %cst_205 = arith.constant 0.000000e+00 : f32
    %280 = vector.broadcast %cst_205 : f32 to vector<8x128xf32>
    %c0_206 = arith.constant 0 : index
    %c0_207 = arith.constant 0 : index
    %281 = vector.load %arg7[%c0_206, %c0_207] : memref<96x128xf32, #tpu.memory_space<vmem>>, vector<8x128xf32>
    tpu.vector_store %arg7[%c0_206, %c0_207], %280 {strides = array<i32>} : memref<96x128xf32, #tpu.memory_space<vmem>>, vector<8x128xf32>,
    %cst_208 = arith.constant 0.000000e+00 : f32
    %282 = vector.broadcast %cst_208 : f32 to vector<8x128xf32>
    %c16_209 = arith.constant 16 : index
    %c0_210 = arith.constant 0 : index
    %283 = vector.load %arg7[%c16_209, %c0_210] : memref<96x128xf32, #tpu.memory_space<vmem>>, vector<8x128xf32>
    tpu.vector_store %arg7[%c16_209, %c0_210], %282 {strides = array<i32>} : memref<96x128xf32, #tpu.memory_space<vmem>>, vector<8x128xf32>,
    %cst_211 = arith.constant 0.000000e+00 : f32
    %284 = vector.broadcast %cst_211 : f32 to vector<16x128xf32>
    %c32_212 = arith.constant 32 : index
    %c0_213 = arith.constant 0 : index
    %285 = vector.load %arg7[%c32_212, %c0_213] : memref<96x128xf32, #tpu.memory_space<vmem>>, vector<16x128xf32>
    tpu.vector_store %arg7[%c32_212, %c0_213], %284 {strides = array<i32>} : memref<96x128xf32, #tpu.memory_space<vmem>>, vector<16x128xf32>,
    %c7_214 = arith.constant 7 : index
    %c0_215 = arith.constant 0 : index
    %286 = tpu.strided_load %arg7[%c7_214, %c0_215] {strides = array<i32: 2, 1>} : memref<96x128xf32, #tpu.memory_space<vmem>>, vector<16x128xf32>
    %c12 = arith.constant 12 : index
    %c0_216 = arith.constant 0 : index
    %c0_217 = arith.constant 0 : index
    %287 = vector.load %arg2[%c12, %c0_216, %c0_217] : memref<30x128x128xf32, #tpu.memory_space<vmem>>, vector<1x128x128xf32>
    %288 = vector.shape_cast %287 : vector<1x128x128xf32> to vector<128x128xf32>
    %cst_218 = arith.constant dense<0.000000e+00> : vector<16x128xf32>
    %289 = tpu.matmul %286, %288, %cst_218 {dimension_numbers = #tpu.dot_dimension_numbers<[1], [0], [0], [1], [0, 0, 1, 1], [], []>} : vector<16x128xf32>, vector<128x128xf32>, vector<16x128xf32> -> vector<16x128xf32>
    %c8_219 = arith.constant 8 : index
    %c0_220 = arith.constant 0 : index
    %290 = tpu.strided_load %arg7[%c8_219, %c0_220] {strides = array<i32: 2, 1>} : memref<96x128xf32, #tpu.memory_space<vmem>>, vector<16x128xf32>
    %c13 = arith.constant 13 : index
    %c0_221 = arith.constant 0 : index
    %c0_222 = arith.constant 0 : index
    %291 = vector.load %arg2[%c13, %c0_221, %c0_222] : memref<30x128x128xf32, #tpu.memory_space<vmem>>, vector<1x128x128xf32>
    %292 = vector.shape_cast %291 : vector<1x128x128xf32> to vector<128x128xf32>
    %cst_223 = arith.constant dense<0.000000e+00> : vector<16x128xf32>
    %293 = tpu.matmul %290, %292, %cst_223 {dimension_numbers = #tpu.dot_dimension_numbers<[1], [0], [0], [1], [0, 0, 1, 1], [], []>} : vector<16x128xf32>, vector<128x128xf32>, vector<16x128xf32> -> vector<16x128xf32>
    %294 = arith.addf %289, %293 : vector<16x128xf32>
    %c9_224 = arith.constant 9 : index
    %c0_225 = arith.constant 0 : index
    %295 = tpu.strided_load %arg7[%c9_224, %c0_225] {strides = array<i32: 2, 1>} : memref<96x128xf32, #tpu.memory_space<vmem>>, vector<16x128xf32>
    %c14 = arith.constant 14 : index
    %c0_226 = arith.constant 0 : index
    %c0_227 = arith.constant 0 : index
    %296 = vector.load %arg2[%c14, %c0_226, %c0_227] : memref<30x128x128xf32, #tpu.memory_space<vmem>>, vector<1x128x128xf32>
    %297 = vector.shape_cast %296 : vector<1x128x128xf32> to vector<128x128xf32>
    %cst_228 = arith.constant dense<0.000000e+00> : vector<16x128xf32>
    %298 = tpu.matmul %295, %297, %cst_228 {dimension_numbers = #tpu.dot_dimension_numbers<[1], [0], [0], [1], [0, 0, 1, 1], [], []>} : vector<16x128xf32>, vector<128x128xf32>, vector<16x128xf32> -> vector<16x128xf32>
    %299 = arith.addf %294, %298 : vector<16x128xf32>
    %300 = vector.extract_strided_slice %299 {offsets = [0, 0], sizes = [4, 128], strides = [1, 1]} : vector<16x128xf32> to vector<4x128xf32>
    %301 = vector.extract_strided_slice %299 {offsets = [8, 0], sizes = [4, 128], strides = [1, 1]} : vector<16x128xf32> to vector<4x128xf32>
    %cst_229 = arith.constant dense<0.000000e+00> : vector<128xf32>
    %302 = vector.multi_reduction <add>, %300, %cst_229 [0] : vector<4x128xf32> to vector<128xf32>
    %303 = vector.shape_cast %302 : vector<128xf32> to vector<1x128xf32>
    %cst_230 = arith.constant 0.000000e+00 : f32
    %304 = vector.broadcast %cst_230 : f32 to vector<1x128xf32>
    %305 = arith.addf %304, %303 : vector<1x128xf32>
    %cst_231 = arith.constant dense<0.000000e+00> : vector<128xf32>
    %306 = vector.multi_reduction <add>, %301, %cst_231 [0] : vector<4x128xf32> to vector<128xf32>
    %307 = vector.shape_cast %306 : vector<128xf32> to vector<1x128xf32>
    %308 = arith.addf %305, %307 : vector<1x128xf32>
    %cst_232 = arith.constant 8.000000e+00 : f32
    %309 = vector.broadcast %cst_232 : f32 to vector<1x128xf32>
    %310 = arith.divf %308, %309 : vector<1x128xf32>
    %311 = vector.broadcast %310 : vector<1x128xf32> to vector<4x128xf32>
    %312 = arith.subf %300, %311 : vector<4x128xf32>
    %313 = arith.mulf %312, %312 : vector<4x128xf32>
    %cst_233 = arith.constant dense<0.000000e+00> : vector<128xf32>
    %314 = vector.multi_reduction <add>, %313, %cst_233 [0] : vector<4x128xf32> to vector<128xf32>
    %315 = vector.shape_cast %314 : vector<128xf32> to vector<1x128xf32>
    %cst_234 = arith.constant 0.000000e+00 : f32
    %316 = vector.broadcast %cst_234 : f32 to vector<1x128xf32>
    %317 = arith.addf %316, %315 : vector<1x128xf32>
    %318 = vector.broadcast %310 : vector<1x128xf32> to vector<4x128xf32>
    %319 = arith.subf %301, %318 : vector<4x128xf32>
    %320 = arith.mulf %319, %319 : vector<4x128xf32>
    %cst_235 = arith.constant dense<0.000000e+00> : vector<128xf32>
    %321 = vector.multi_reduction <add>, %320, %cst_235 [0] : vector<4x128xf32> to vector<128xf32>
    %322 = vector.shape_cast %321 : vector<128xf32> to vector<1x128xf32>
    %323 = arith.addf %317, %322 : vector<1x128xf32>
    %cst_236 = arith.constant 8.000000e+00 : f32
    %324 = vector.broadcast %cst_236 : f32 to vector<1x128xf32>
    %325 = arith.divf %323, %324 : vector<1x128xf32>
    %c6_237 = arith.constant 6 : index
    %c0_238 = arith.constant 0 : index
    %326 = vector.load %arg3[%c6_237, %c0_238] : memref<10x128xf32, #tpu.memory_space<vmem>>, vector<1x128xf32>
    %c7_239 = arith.constant 7 : index
    %c0_240 = arith.constant 0 : index
    %327 = vector.load %arg3[%c7_239, %c0_240] : memref<10x128xf32, #tpu.memory_space<vmem>>, vector<1x128xf32>
    %cst_241 = arith.constant 9.99999974E-6 : f32
    %328 = vector.broadcast %cst_241 : f32 to vector<1x128xf32>
    %329 = arith.addf %325, %328 : vector<1x128xf32>
    %330 = math.rsqrt %329 : vector<1x128xf32>
    %331 = arith.mulf %326, %330 : vector<1x128xf32>
    %332 = arith.mulf %310, %331 : vector<1x128xf32>
    %333 = arith.subf %327, %332 : vector<1x128xf32>
    %334 = vector.broadcast %331 : vector<1x128xf32> to vector<16x128xf32>
    %335 = arith.mulf %299, %334 : vector<16x128xf32>
    %336 = vector.broadcast %333 : vector<1x128xf32> to vector<16x128xf32>
    %337 = arith.addf %335, %336 : vector<16x128xf32>
    %cst_242 = arith.constant 0.000000e+00 : f32
    %338 = vector.broadcast %cst_242 : f32 to vector<16x128xf32>
    %339 = arith.maximumf %337, %338 : vector<16x128xf32>
    %340 = vector.extract_strided_slice %339 {offsets = [0, 0], sizes = [4, 128], strides = [1, 1]} : vector<16x128xf32> to vector<4x128xf32>
    %c8_243 = arith.constant 8 : index
    %c0_244 = arith.constant 0 : index
    %341 = vector.load %arg5[%c8_243, %c0_244] : memref<96x128xf32, #tpu.memory_space<vmem>>, vector<4x128xf32>
    tpu.vector_store %arg5[%c8_243, %c0_244], %340 {strides = array<i32>} : memref<96x128xf32, #tpu.memory_space<vmem>>, vector<4x128xf32>,
    %342 = vector.extract_strided_slice %339 {offsets = [8, 0], sizes = [4, 128], strides = [1, 1]} : vector<16x128xf32> to vector<4x128xf32>
    %c24_245 = arith.constant 24 : index
    %c0_246 = arith.constant 0 : index
    %343 = vector.load %arg5[%c24_245, %c0_246] : memref<96x128xf32, #tpu.memory_space<vmem>>, vector<4x128xf32>
    tpu.vector_store %arg5[%c24_245, %c0_246], %342 {strides = array<i32>} : memref<96x128xf32, #tpu.memory_space<vmem>>, vector<4x128xf32>,
    %cst_247 = arith.constant 0.000000e+00 : f32
    %344 = vector.broadcast %cst_247 : f32 to vector<8x128xf32>
    %c0_248 = arith.constant 0 : index
    %c0_249 = arith.constant 0 : index
    %345 = vector.load %arg5[%c0_248, %c0_249] : memref<96x128xf32, #tpu.memory_space<vmem>>, vector<8x128xf32>
    tpu.vector_store %arg5[%c0_248, %c0_249], %344 {strides = array<i32>} : memref<96x128xf32, #tpu.memory_space<vmem>>, vector<8x128xf32>,
    %cst_250 = arith.constant 0.000000e+00 : f32
    %346 = vector.broadcast %cst_250 : f32 to vector<12x128xf32>
    %c12_251 = arith.constant 12 : index
    %c0_252 = arith.constant 0 : index
    %347 = vector.load %arg5[%c12_251, %c0_252] : memref<96x128xf32, #tpu.memory_space<vmem>>, vector<12x128xf32>
    tpu.vector_store %arg5[%c12_251, %c0_252], %346 {strides = array<i32>} : memref<96x128xf32, #tpu.memory_space<vmem>>, vector<12x128xf32>,
    %cst_253 = arith.constant 0.000000e+00 : f32
    %348 = vector.broadcast %cst_253 : f32 to vector<20x128xf32>
    %c28 = arith.constant 28 : index
    %c0_254 = arith.constant 0 : index
    %349 = vector.load %arg5[%c28, %c0_254] : memref<96x128xf32, #tpu.memory_space<vmem>>, vector<20x128xf32>
    tpu.vector_store %arg5[%c28, %c0_254], %348 {strides = array<i32>} : memref<96x128xf32, #tpu.memory_space<vmem>>, vector<20x128xf32>,
    %c7_255 = arith.constant 7 : index
    %c0_256 = arith.constant 0 : index
    %350 = tpu.strided_load %arg7[%c7_255, %c0_256] {strides = array<i32: 2, 1>} : memref<96x128xf32, #tpu.memory_space<vmem>>, vector<16x128xf32>
    %c18 = arith.constant 18 : index
    %c0_257 = arith.constant 0 : index
    %c0_258 = arith.constant 0 : index
    %351 = vector.load %arg2[%c18, %c0_257, %c0_258] : memref<30x128x128xf32, #tpu.memory_space<vmem>>, vector<1x128x128xf32>
    %352 = vector.shape_cast %351 : vector<1x128x128xf32> to vector<128x128xf32>
    %cst_259 = arith.constant dense<0.000000e+00> : vector<16x128xf32>
    %353 = tpu.matmul %350, %352, %cst_259 {dimension_numbers = #tpu.dot_dimension_numbers<[1], [0], [0], [1], [0, 0, 1, 1], [], []>} : vector<16x128xf32>, vector<128x128xf32>, vector<16x128xf32> -> vector<16x128xf32>
    %c8_260 = arith.constant 8 : index
    %c0_261 = arith.constant 0 : index
    %354 = tpu.strided_load %arg7[%c8_260, %c0_261] {strides = array<i32: 2, 1>} : memref<96x128xf32, #tpu.memory_space<vmem>>, vector<16x128xf32>
    %c19 = arith.constant 19 : index
    %c0_262 = arith.constant 0 : index
    %c0_263 = arith.constant 0 : index
    %355 = vector.load %arg2[%c19, %c0_262, %c0_263] : memref<30x128x128xf32, #tpu.memory_space<vmem>>, vector<1x128x128xf32>
    %356 = vector.shape_cast %355 : vector<1x128x128xf32> to vector<128x128xf32>
    %cst_264 = arith.constant dense<0.000000e+00> : vector<16x128xf32>
    %357 = tpu.matmul %354, %356, %cst_264 {dimension_numbers = #tpu.dot_dimension_numbers<[1], [0], [0], [1], [0, 0, 1, 1], [], []>} : vector<16x128xf32>, vector<128x128xf32>, vector<16x128xf32> -> vector<16x128xf32>
    %358 = arith.addf %353, %357 : vector<16x128xf32>
    %c9_265 = arith.constant 9 : index
    %c0_266 = arith.constant 0 : index
    %359 = tpu.strided_load %arg7[%c9_265, %c0_266] {strides = array<i32: 2, 1>} : memref<96x128xf32, #tpu.memory_space<vmem>>, vector<16x128xf32>
    %c20 = arith.constant 20 : index
    %c0_267 = arith.constant 0 : index
    %c0_268 = arith.constant 0 : index
    %360 = vector.load %arg2[%c20, %c0_267, %c0_268] : memref<30x128x128xf32, #tpu.memory_space<vmem>>, vector<1x128x128xf32>
    %361 = vector.shape_cast %360 : vector<1x128x128xf32> to vector<128x128xf32>
    %cst_269 = arith.constant dense<0.000000e+00> : vector<16x128xf32>
    %362 = tpu.matmul %359, %361, %cst_269 {dimension_numbers = #tpu.dot_dimension_numbers<[1], [0], [0], [1], [0, 0, 1, 1], [], []>} : vector<16x128xf32>, vector<128x128xf32>, vector<16x128xf32> -> vector<16x128xf32>
    %363 = arith.addf %358, %362 : vector<16x128xf32>
    %364 = vector.extract_strided_slice %363 {offsets = [0, 0], sizes = [4, 128], strides = [1, 1]} : vector<16x128xf32> to vector<4x128xf32>
    %365 = vector.extract_strided_slice %363 {offsets = [8, 0], sizes = [4, 128], strides = [1, 1]} : vector<16x128xf32> to vector<4x128xf32>
    %cst_270 = arith.constant dense<0.000000e+00> : vector<128xf32>
    %366 = vector.multi_reduction <add>, %364, %cst_270 [0] : vector<4x128xf32> to vector<128xf32>
    %367 = vector.shape_cast %366 : vector<128xf32> to vector<1x128xf32>
    %cst_271 = arith.constant 0.000000e+00 : f32
    %368 = vector.broadcast %cst_271 : f32 to vector<1x128xf32>
    %369 = arith.addf %368, %367 : vector<1x128xf32>
    %cst_272 = arith.constant dense<0.000000e+00> : vector<128xf32>
    %370 = vector.multi_reduction <add>, %365, %cst_272 [0] : vector<4x128xf32> to vector<128xf32>
    %371 = vector.shape_cast %370 : vector<128xf32> to vector<1x128xf32>
    %372 = arith.addf %369, %371 : vector<1x128xf32>
    %cst_273 = arith.constant 8.000000e+00 : f32
    %373 = vector.broadcast %cst_273 : f32 to vector<1x128xf32>
    %374 = arith.divf %372, %373 : vector<1x128xf32>
    %375 = vector.broadcast %374 : vector<1x128xf32> to vector<4x128xf32>
    %376 = arith.subf %364, %375 : vector<4x128xf32>
    %377 = arith.mulf %376, %376 : vector<4x128xf32>
    %cst_274 = arith.constant dense<0.000000e+00> : vector<128xf32>
    %378 = vector.multi_reduction <add>, %377, %cst_274 [0] : vector<4x128xf32> to vector<128xf32>
    %379 = vector.shape_cast %378 : vector<128xf32> to vector<1x128xf32>
    %cst_275 = arith.constant 0.000000e+00 : f32
    %380 = vector.broadcast %cst_275 : f32 to vector<1x128xf32>
    %381 = arith.addf %380, %379 : vector<1x128xf32>
    %382 = vector.broadcast %374 : vector<1x128xf32> to vector<4x128xf32>
    %383 = arith.subf %365, %382 : vector<4x128xf32>
    %384 = arith.mulf %383, %383 : vector<4x128xf32>
    %cst_276 = arith.constant dense<0.000000e+00> : vector<128xf32>
    %385 = vector.multi_reduction <add>, %384, %cst_276 [0] : vector<4x128xf32> to vector<128xf32>
    %386 = vector.shape_cast %385 : vector<128xf32> to vector<1x128xf32>
    %387 = arith.addf %381, %386 : vector<1x128xf32>
    %cst_277 = arith.constant 8.000000e+00 : f32
    %388 = vector.broadcast %cst_277 : f32 to vector<1x128xf32>
    %389 = arith.divf %387, %388 : vector<1x128xf32>
    %c6_278 = arith.constant 6 : index
    %c0_279 = arith.constant 0 : index
    %390 = vector.load %arg3[%c6_278, %c0_279] : memref<10x128xf32, #tpu.memory_space<vmem>>, vector<1x128xf32>
    %c7_280 = arith.constant 7 : index
    %c0_281 = arith.constant 0 : index
    %391 = vector.load %arg3[%c7_280, %c0_281] : memref<10x128xf32, #tpu.memory_space<vmem>>, vector<1x128xf32>
    %cst_282 = arith.constant 9.99999974E-6 : f32
    %392 = vector.broadcast %cst_282 : f32 to vector<1x128xf32>
    %393 = arith.addf %389, %392 : vector<1x128xf32>
    %394 = math.rsqrt %393 : vector<1x128xf32>
    %395 = arith.mulf %390, %394 : vector<1x128xf32>
    %396 = arith.mulf %374, %395 : vector<1x128xf32>
    %397 = arith.subf %391, %396 : vector<1x128xf32>
    %398 = vector.broadcast %395 : vector<1x128xf32> to vector<16x128xf32>
    %399 = arith.mulf %363, %398 : vector<16x128xf32>
    %400 = vector.broadcast %397 : vector<1x128xf32> to vector<16x128xf32>
    %401 = arith.addf %399, %400 : vector<16x128xf32>
    %402 = vector.extract_strided_slice %401 {offsets = [0, 0], sizes = [4, 128], strides = [1, 1]} : vector<16x128xf32> to vector<4x128xf32>
    %c8_283 = arith.constant 8 : index
    %c0_284 = arith.constant 0 : index
    %403 = vector.load %arg6[%c8_283, %c0_284] : memref<96x128xf32, #tpu.memory_space<vmem>>, vector<4x128xf32>
    tpu.vector_store %arg6[%c8_283, %c0_284], %402 {strides = array<i32>} : memref<96x128xf32, #tpu.memory_space<vmem>>, vector<4x128xf32>,
    %404 = vector.extract_strided_slice %401 {offsets = [8, 0], sizes = [4, 128], strides = [1, 1]} : vector<16x128xf32> to vector<4x128xf32>
    %c24_285 = arith.constant 24 : index
    %c0_286 = arith.constant 0 : index
    %405 = vector.load %arg6[%c24_285, %c0_286] : memref<96x128xf32, #tpu.memory_space<vmem>>, vector<4x128xf32>
    tpu.vector_store %arg6[%c24_285, %c0_286], %404 {strides = array<i32>} : memref<96x128xf32, #tpu.memory_space<vmem>>, vector<4x128xf32>,
    %cst_287 = arith.constant 0.000000e+00 : f32
    %406 = vector.broadcast %cst_287 : f32 to vector<8x128xf32>
    %c0_288 = arith.constant 0 : index
    %c0_289 = arith.constant 0 : index
    %407 = vector.load %arg6[%c0_288, %c0_289] : memref<96x128xf32, #tpu.memory_space<vmem>>, vector<8x128xf32>
    tpu.vector_store %arg6[%c0_288, %c0_289], %406 {strides = array<i32>} : memref<96x128xf32, #tpu.memory_space<vmem>>, vector<8x128xf32>,
    %cst_290 = arith.constant 0.000000e+00 : f32
    %408 = vector.broadcast %cst_290 : f32 to vector<12x128xf32>
    %c12_291 = arith.constant 12 : index
    %c0_292 = arith.constant 0 : index
    %409 = vector.load %arg6[%c12_291, %c0_292] : memref<96x128xf32, #tpu.memory_space<vmem>>, vector<12x128xf32>
    tpu.vector_store %arg6[%c12_291, %c0_292], %408 {strides = array<i32>} : memref<96x128xf32, #tpu.memory_space<vmem>>, vector<12x128xf32>,
    %cst_293 = arith.constant 0.000000e+00 : f32
    %410 = vector.broadcast %cst_293 : f32 to vector<20x128xf32>
    %c28_294 = arith.constant 28 : index
    %c0_295 = arith.constant 0 : index
    %411 = vector.load %arg6[%c28_294, %c0_295] : memref<96x128xf32, #tpu.memory_space<vmem>>, vector<20x128xf32>
    tpu.vector_store %arg6[%c28_294, %c0_295], %410 {strides = array<i32>} : memref<96x128xf32, #tpu.memory_space<vmem>>, vector<20x128xf32>,
    %c7_296 = arith.constant 7 : index
    %c0_297 = arith.constant 0 : index
    %412 = vector.load %arg5[%c7_296, %c0_297] : memref<96x128xf32, #tpu.memory_space<vmem>>, vector<32x128xf32>
    %c15 = arith.constant 15 : index
    %c0_298 = arith.constant 0 : index
    %c0_299 = arith.constant 0 : index
    %413 = vector.load %arg2[%c15, %c0_298, %c0_299] : memref<30x128x128xf32, #tpu.memory_space<vmem>>, vector<1x128x128xf32>
    %414 = vector.shape_cast %413 : vector<1x128x128xf32> to vector<128x128xf32>
    %cst_300 = arith.constant dense<0.000000e+00> : vector<32x128xf32>
    %415 = tpu.matmul %412, %414, %cst_300 {dimension_numbers = #tpu.dot_dimension_numbers<[1], [0], [0], [1], [0, 0, 1, 1], [], []>} : vector<32x128xf32>, vector<128x128xf32>, vector<32x128xf32> -> vector<32x128xf32>
    %c8_301 = arith.constant 8 : index
    %c0_302 = arith.constant 0 : index
    %416 = vector.load %arg5[%c8_301, %c0_302] : memref<96x128xf32, #tpu.memory_space<vmem>>, vector<32x128xf32>
    %c16_303 = arith.constant 16 : index
    %c0_304 = arith.constant 0 : index
    %c0_305 = arith.constant 0 : index
    %417 = vector.load %arg2[%c16_303, %c0_304, %c0_305] : memref<30x128x128xf32, #tpu.memory_space<vmem>>, vector<1x128x128xf32>
    %418 = vector.shape_cast %417 : vector<1x128x128xf32> to vector<128x128xf32>
    %cst_306 = arith.constant dense<0.000000e+00> : vector<32x128xf32>
    %419 = tpu.matmul %416, %418, %cst_306 {dimension_numbers = #tpu.dot_dimension_numbers<[1], [0], [0], [1], [0, 0, 1, 1], [], []>} : vector<32x128xf32>, vector<128x128xf32>, vector<32x128xf32> -> vector<32x128xf32>
    %420 = arith.addf %415, %419 : vector<32x128xf32>
    %c9_307 = arith.constant 9 : index
    %c0_308 = arith.constant 0 : index
    %421 = vector.load %arg5[%c9_307, %c0_308] : memref<96x128xf32, #tpu.memory_space<vmem>>, vector<32x128xf32>
    %c17 = arith.constant 17 : index
    %c0_309 = arith.constant 0 : index
    %c0_310 = arith.constant 0 : index
    %422 = vector.load %arg2[%c17, %c0_309, %c0_310] : memref<30x128x128xf32, #tpu.memory_space<vmem>>, vector<1x128x128xf32>
    %423 = vector.shape_cast %422 : vector<1x128x128xf32> to vector<128x128xf32>
    %cst_311 = arith.constant dense<0.000000e+00> : vector<32x128xf32>
    %424 = tpu.matmul %421, %423, %cst_311 {dimension_numbers = #tpu.dot_dimension_numbers<[1], [0], [0], [1], [0, 0, 1, 1], [], []>} : vector<32x128xf32>, vector<128x128xf32>, vector<32x128xf32> -> vector<32x128xf32>
    %425 = arith.addf %420, %424 : vector<32x128xf32>
    %426 = vector.extract_strided_slice %425 {offsets = [0, 0], sizes = [4, 128], strides = [1, 1]} : vector<32x128xf32> to vector<4x128xf32>
    %427 = vector.extract_strided_slice %425 {offsets = [16, 0], sizes = [4, 128], strides = [1, 1]} : vector<32x128xf32> to vector<4x128xf32>
    %cst_312 = arith.constant dense<0.000000e+00> : vector<128xf32>
    %428 = vector.multi_reduction <add>, %426, %cst_312 [0] : vector<4x128xf32> to vector<128xf32>
    %429 = vector.shape_cast %428 : vector<128xf32> to vector<1x128xf32>
    %cst_313 = arith.constant 0.000000e+00 : f32
    %430 = vector.broadcast %cst_313 : f32 to vector<1x128xf32>
    %431 = arith.addf %430, %429 : vector<1x128xf32>
    %cst_314 = arith.constant dense<0.000000e+00> : vector<128xf32>
    %432 = vector.multi_reduction <add>, %427, %cst_314 [0] : vector<4x128xf32> to vector<128xf32>
    %433 = vector.shape_cast %432 : vector<128xf32> to vector<1x128xf32>
    %434 = arith.addf %431, %433 : vector<1x128xf32>
    %cst_315 = arith.constant 8.000000e+00 : f32
    %435 = vector.broadcast %cst_315 : f32 to vector<1x128xf32>
    %436 = arith.divf %434, %435 : vector<1x128xf32>
    %437 = vector.broadcast %436 : vector<1x128xf32> to vector<4x128xf32>
    %438 = arith.subf %426, %437 : vector<4x128xf32>
    %439 = arith.mulf %438, %438 : vector<4x128xf32>
    %cst_316 = arith.constant dense<0.000000e+00> : vector<128xf32>
    %440 = vector.multi_reduction <add>, %439, %cst_316 [0] : vector<4x128xf32> to vector<128xf32>
    %441 = vector.shape_cast %440 : vector<128xf32> to vector<1x128xf32>
    %cst_317 = arith.constant 0.000000e+00 : f32
    %442 = vector.broadcast %cst_317 : f32 to vector<1x128xf32>
    %443 = arith.addf %442, %441 : vector<1x128xf32>
    %444 = vector.broadcast %436 : vector<1x128xf32> to vector<4x128xf32>
    %445 = arith.subf %427, %444 : vector<4x128xf32>
    %446 = arith.mulf %445, %445 : vector<4x128xf32>
    %cst_318 = arith.constant dense<0.000000e+00> : vector<128xf32>
    %447 = vector.multi_reduction <add>, %446, %cst_318 [0] : vector<4x128xf32> to vector<128xf32>
    %448 = vector.shape_cast %447 : vector<128xf32> to vector<1x128xf32>
    %449 = arith.addf %443, %448 : vector<1x128xf32>
    %cst_319 = arith.constant 8.000000e+00 : f32
    %450 = vector.broadcast %cst_319 : f32 to vector<1x128xf32>
    %451 = arith.divf %449, %450 : vector<1x128xf32>
    %c6_320 = arith.constant 6 : index
    %c0_321 = arith.constant 0 : index
    %452 = vector.load %arg3[%c6_320, %c0_321] : memref<10x128xf32, #tpu.memory_space<vmem>>, vector<1x128xf32>
    %c7_322 = arith.constant 7 : index
    %c0_323 = arith.constant 0 : index
    %453 = vector.load %arg3[%c7_322, %c0_323] : memref<10x128xf32, #tpu.memory_space<vmem>>, vector<1x128xf32>
    %cst_324 = arith.constant 9.99999974E-6 : f32
    %454 = vector.broadcast %cst_324 : f32 to vector<1x128xf32>
    %455 = arith.addf %451, %454 : vector<1x128xf32>
    %456 = math.rsqrt %455 : vector<1x128xf32>
    %457 = arith.mulf %452, %456 : vector<1x128xf32>
    %458 = arith.mulf %436, %457 : vector<1x128xf32>
    %459 = arith.subf %453, %458 : vector<1x128xf32>
    %460 = vector.broadcast %457 : vector<1x128xf32> to vector<32x128xf32>
    %461 = arith.mulf %425, %460 : vector<32x128xf32>
    %462 = vector.broadcast %459 : vector<1x128xf32> to vector<32x128xf32>
    %463 = arith.addf %461, %462 : vector<32x128xf32>
    %c8_325 = arith.constant 8 : index
    %c0_326 = arith.constant 0 : index
    %464 = vector.load %arg6[%c8_325, %c0_326] : memref<96x128xf32, #tpu.memory_space<vmem>>, vector<32x128xf32>
    %465 = arith.addf %463, %464 : vector<32x128xf32>
    %cst_327 = arith.constant 0.000000e+00 : f32
    %466 = vector.broadcast %cst_327 : f32 to vector<32x128xf32>
    %467 = arith.maximumf %465, %466 : vector<32x128xf32>
    %c8_328 = arith.constant 8 : index
    %c0_329 = arith.constant 0 : index
    %468 = vector.load %arg7[%c8_328, %c0_329] : memref<96x128xf32, #tpu.memory_space<vmem>>, vector<32x128xf32>
    tpu.vector_store %arg7[%c8_328, %c0_329], %467 {strides = array<i32>} : memref<96x128xf32, #tpu.memory_space<vmem>>, vector<32x128xf32>,
    %cst_330 = arith.constant 0.000000e+00 : f32
    %469 = vector.broadcast %cst_330 : f32 to vector<8x128xf32>
    %c0_331 = arith.constant 0 : index
    %c0_332 = arith.constant 0 : index
    %470 = vector.load %arg7[%c0_331, %c0_332] : memref<96x128xf32, #tpu.memory_space<vmem>>, vector<8x128xf32>
    tpu.vector_store %arg7[%c0_331, %c0_332], %469 {strides = array<i32>} : memref<96x128xf32, #tpu.memory_space<vmem>>, vector<8x128xf32>,
    %cst_333 = arith.constant 0.000000e+00 : f32
    %471 = vector.broadcast %cst_333 : f32 to vector<12x128xf32>
    %c12_334 = arith.constant 12 : index
    %c0_335 = arith.constant 0 : index
    %472 = vector.load %arg7[%c12_334, %c0_335] : memref<96x128xf32, #tpu.memory_space<vmem>>, vector<12x128xf32>
    tpu.vector_store %arg7[%c12_334, %c0_335], %471 {strides = array<i32>} : memref<96x128xf32, #tpu.memory_space<vmem>>, vector<12x128xf32>,
    %cst_336 = arith.constant 0.000000e+00 : f32
    %473 = vector.broadcast %cst_336 : f32 to vector<20x128xf32>
    %c28_337 = arith.constant 28 : index
    %c0_338 = arith.constant 0 : index
    %474 = vector.load %arg7[%c28_337, %c0_338] : memref<96x128xf32, #tpu.memory_space<vmem>>, vector<20x128xf32>
    tpu.vector_store %arg7[%c28_337, %c0_338], %473 {strides = array<i32>} : memref<96x128xf32, #tpu.memory_space<vmem>>, vector<20x128xf32>,
    %c7_339 = arith.constant 7 : index
    %c0_340 = arith.constant 0 : index
    %475 = tpu.strided_load %arg7[%c7_339, %c0_340] {strides = array<i32: 2, 1>} : memref<96x128xf32, #tpu.memory_space<vmem>>, vector<16x128xf32>
    %c21 = arith.constant 21 : index
    %c0_341 = arith.constant 0 : index
    %c0_342 = arith.constant 0 : index
    %476 = vector.load %arg2[%c21, %c0_341, %c0_342] : memref<30x128x128xf32, #tpu.memory_space<vmem>>, vector<1x128x128xf32>
    %477 = vector.shape_cast %476 : vector<1x128x128xf32> to vector<128x128xf32>
    %cst_343 = arith.constant dense<0.000000e+00> : vector<16x128xf32>
    %478 = tpu.matmul %475, %477, %cst_343 {dimension_numbers = #tpu.dot_dimension_numbers<[1], [0], [0], [1], [0, 0, 1, 1], [], []>} : vector<16x128xf32>, vector<128x128xf32>, vector<16x128xf32> -> vector<16x128xf32>
    %c8_344 = arith.constant 8 : index
    %c0_345 = arith.constant 0 : index
    %479 = tpu.strided_load %arg7[%c8_344, %c0_345] {strides = array<i32: 2, 1>} : memref<96x128xf32, #tpu.memory_space<vmem>>, vector<16x128xf32>
    %c22 = arith.constant 22 : index
    %c0_346 = arith.constant 0 : index
    %c0_347 = arith.constant 0 : index
    %480 = vector.load %arg2[%c22, %c0_346, %c0_347] : memref<30x128x128xf32, #tpu.memory_space<vmem>>, vector<1x128x128xf32>
    %481 = vector.shape_cast %480 : vector<1x128x128xf32> to vector<128x128xf32>
    %cst_348 = arith.constant dense<0.000000e+00> : vector<16x128xf32>
    %482 = tpu.matmul %479, %481, %cst_348 {dimension_numbers = #tpu.dot_dimension_numbers<[1], [0], [0], [1], [0, 0, 1, 1], [], []>} : vector<16x128xf32>, vector<128x128xf32>, vector<16x128xf32> -> vector<16x128xf32>
    %483 = arith.addf %478, %482 : vector<16x128xf32>
    %c9_349 = arith.constant 9 : index
    %c0_350 = arith.constant 0 : index
    %484 = tpu.strided_load %arg7[%c9_349, %c0_350] {strides = array<i32: 2, 1>} : memref<96x128xf32, #tpu.memory_space<vmem>>, vector<16x128xf32>
    %c23 = arith.constant 23 : index
    %c0_351 = arith.constant 0 : index
    %c0_352 = arith.constant 0 : index
    %485 = vector.load %arg2[%c23, %c0_351, %c0_352] : memref<30x128x128xf32, #tpu.memory_space<vmem>>, vector<1x128x128xf32>
    %486 = vector.shape_cast %485 : vector<1x128x128xf32> to vector<128x128xf32>
    %cst_353 = arith.constant dense<0.000000e+00> : vector<16x128xf32>
    %487 = tpu.matmul %484, %486, %cst_353 {dimension_numbers = #tpu.dot_dimension_numbers<[1], [0], [0], [1], [0, 0, 1, 1], [], []>} : vector<16x128xf32>, vector<128x128xf32>, vector<16x128xf32> -> vector<16x128xf32>
    %488 = arith.addf %483, %487 : vector<16x128xf32>
    %489 = vector.extract_strided_slice %488 {offsets = [0, 0], sizes = [2, 128], strides = [1, 1]} : vector<16x128xf32> to vector<2x128xf32>
    %490 = vector.extract_strided_slice %488 {offsets = [8, 0], sizes = [2, 128], strides = [1, 1]} : vector<16x128xf32> to vector<2x128xf32>
    %cst_354 = arith.constant dense<0.000000e+00> : vector<128xf32>
    %491 = vector.multi_reduction <add>, %489, %cst_354 [0] : vector<2x128xf32> to vector<128xf32>
    %492 = vector.shape_cast %491 : vector<128xf32> to vector<1x128xf32>
    %cst_355 = arith.constant 0.000000e+00 : f32
    %493 = vector.broadcast %cst_355 : f32 to vector<1x128xf32>
    %494 = arith.addf %493, %492 : vector<1x128xf32>
    %cst_356 = arith.constant dense<0.000000e+00> : vector<128xf32>
    %495 = vector.multi_reduction <add>, %490, %cst_356 [0] : vector<2x128xf32> to vector<128xf32>
    %496 = vector.shape_cast %495 : vector<128xf32> to vector<1x128xf32>
    %497 = arith.addf %494, %496 : vector<1x128xf32>
    %cst_357 = arith.constant 4.000000e+00 : f32
    %498 = vector.broadcast %cst_357 : f32 to vector<1x128xf32>
    %499 = arith.divf %497, %498 : vector<1x128xf32>
    %500 = vector.broadcast %499 : vector<1x128xf32> to vector<2x128xf32>
    %501 = arith.subf %489, %500 : vector<2x128xf32>
    %502 = arith.mulf %501, %501 : vector<2x128xf32>
    %cst_358 = arith.constant dense<0.000000e+00> : vector<128xf32>
    %503 = vector.multi_reduction <add>, %502, %cst_358 [0] : vector<2x128xf32> to vector<128xf32>
    %504 = vector.shape_cast %503 : vector<128xf32> to vector<1x128xf32>
    %cst_359 = arith.constant 0.000000e+00 : f32
    %505 = vector.broadcast %cst_359 : f32 to vector<1x128xf32>
    %506 = arith.addf %505, %504 : vector<1x128xf32>
    %507 = vector.broadcast %499 : vector<1x128xf32> to vector<2x128xf32>
    %508 = arith.subf %490, %507 : vector<2x128xf32>
    %509 = arith.mulf %508, %508 : vector<2x128xf32>
    %cst_360 = arith.constant dense<0.000000e+00> : vector<128xf32>
    %510 = vector.multi_reduction <add>, %509, %cst_360 [0] : vector<2x128xf32> to vector<128xf32>
    %511 = vector.shape_cast %510 : vector<128xf32> to vector<1x128xf32>
    %512 = arith.addf %506, %511 : vector<1x128xf32>
    %cst_361 = arith.constant 4.000000e+00 : f32
    %513 = vector.broadcast %cst_361 : f32 to vector<1x128xf32>
    %514 = arith.divf %512, %513 : vector<1x128xf32>
    %c8_362 = arith.constant 8 : index
    %c0_363 = arith.constant 0 : index
    %515 = vector.load %arg3[%c8_362, %c0_363] : memref<10x128xf32, #tpu.memory_space<vmem>>, vector<1x128xf32>
    %c9_364 = arith.constant 9 : index
    %c0_365 = arith.constant 0 : index
    %516 = vector.load %arg3[%c9_364, %c0_365] : memref<10x128xf32, #tpu.memory_space<vmem>>, vector<1x128xf32>
    %cst_366 = arith.constant 9.99999974E-6 : f32
    %517 = vector.broadcast %cst_366 : f32 to vector<1x128xf32>
    %518 = arith.addf %514, %517 : vector<1x128xf32>
    %519 = math.rsqrt %518 : vector<1x128xf32>
    %520 = arith.mulf %515, %519 : vector<1x128xf32>
    %521 = arith.mulf %499, %520 : vector<1x128xf32>
    %522 = arith.subf %516, %521 : vector<1x128xf32>
    %523 = vector.broadcast %520 : vector<1x128xf32> to vector<16x128xf32>
    %524 = arith.mulf %488, %523 : vector<16x128xf32>
    %525 = vector.broadcast %522 : vector<1x128xf32> to vector<16x128xf32>
    %526 = arith.addf %524, %525 : vector<16x128xf32>
    %cst_367 = arith.constant 0.000000e+00 : f32
    %527 = vector.broadcast %cst_367 : f32 to vector<16x128xf32>
    %528 = arith.maximumf %526, %527 : vector<16x128xf32>
    %529 = vector.extract_strided_slice %528 {offsets = [0, 0], sizes = [2, 128], strides = [1, 1]} : vector<16x128xf32> to vector<2x128xf32>
    %c8_368 = arith.constant 8 : index
    %c0_369 = arith.constant 0 : index
    %530 = vector.load %arg5[%c8_368, %c0_369] : memref<96x128xf32, #tpu.memory_space<vmem>>, vector<2x128xf32>
    tpu.vector_store %arg5[%c8_368, %c0_369], %529 {strides = array<i32>} : memref<96x128xf32, #tpu.memory_space<vmem>>, vector<2x128xf32>,
    %531 = vector.extract_strided_slice %528 {offsets = [8, 0], sizes = [2, 128], strides = [1, 1]} : vector<16x128xf32> to vector<2x128xf32>
    %c24_370 = arith.constant 24 : index
    %c0_371 = arith.constant 0 : index
    %532 = vector.load %arg5[%c24_370, %c0_371] : memref<96x128xf32, #tpu.memory_space<vmem>>, vector<2x128xf32>
    tpu.vector_store %arg5[%c24_370, %c0_371], %531 {strides = array<i32>} : memref<96x128xf32, #tpu.memory_space<vmem>>, vector<2x128xf32>,
    %cst_372 = arith.constant 0.000000e+00 : f32
    %533 = vector.broadcast %cst_372 : f32 to vector<8x128xf32>
    %c0_373 = arith.constant 0 : index
    %c0_374 = arith.constant 0 : index
    %534 = vector.load %arg5[%c0_373, %c0_374] : memref<96x128xf32, #tpu.memory_space<vmem>>, vector<8x128xf32>
    tpu.vector_store %arg5[%c0_373, %c0_374], %533 {strides = array<i32>} : memref<96x128xf32, #tpu.memory_space<vmem>>, vector<8x128xf32>,
    %cst_375 = arith.constant 0.000000e+00 : f32
    %535 = vector.broadcast %cst_375 : f32 to vector<14x128xf32>
    %c10_376 = arith.constant 10 : index
    %c0_377 = arith.constant 0 : index
    %536 = vector.load %arg5[%c10_376, %c0_377] : memref<96x128xf32, #tpu.memory_space<vmem>>, vector<14x128xf32>
    tpu.vector_store %arg5[%c10_376, %c0_377], %535 {strides = array<i32>} : memref<96x128xf32, #tpu.memory_space<vmem>>, vector<14x128xf32>,
    %cst_378 = arith.constant 0.000000e+00 : f32
    %537 = vector.broadcast %cst_378 : f32 to vector<22x128xf32>
    %c26 = arith.constant 26 : index
    %c0_379 = arith.constant 0 : index
    %538 = vector.load %arg5[%c26, %c0_379] : memref<96x128xf32, #tpu.memory_space<vmem>>, vector<22x128xf32>
    tpu.vector_store %arg5[%c26, %c0_379], %537 {strides = array<i32>} : memref<96x128xf32, #tpu.memory_space<vmem>>, vector<22x128xf32>,
    %c7_380 = arith.constant 7 : index
    %c0_381 = arith.constant 0 : index
    %539 = tpu.strided_load %arg7[%c7_380, %c0_381] {strides = array<i32: 2, 1>} : memref<96x128xf32, #tpu.memory_space<vmem>>, vector<16x128xf32>
    %c27 = arith.constant 27 : index
    %c0_382 = arith.constant 0 : index
    %c0_383 = arith.constant 0 : index
    %540 = vector.load %arg2[%c27, %c0_382, %c0_383] : memref<30x128x128xf32, #tpu.memory_space<vmem>>, vector<1x128x128xf32>
    %541 = vector.shape_cast %540 : vector<1x128x128xf32> to vector<128x128xf32>
    %cst_384 = arith.constant dense<0.000000e+00> : vector<16x128xf32>
    %542 = tpu.matmul %539, %541, %cst_384 {dimension_numbers = #tpu.dot_dimension_numbers<[1], [0], [0], [1], [0, 0, 1, 1], [], []>} : vector<16x128xf32>, vector<128x128xf32>, vector<16x128xf32> -> vector<16x128xf32>
    %c8_385 = arith.constant 8 : index
    %c0_386 = arith.constant 0 : index
    %543 = tpu.strided_load %arg7[%c8_385, %c0_386] {strides = array<i32: 2, 1>} : memref<96x128xf32, #tpu.memory_space<vmem>>, vector<16x128xf32>
    %c28_387 = arith.constant 28 : index
    %c0_388 = arith.constant 0 : index
    %c0_389 = arith.constant 0 : index
    %544 = vector.load %arg2[%c28_387, %c0_388, %c0_389] : memref<30x128x128xf32, #tpu.memory_space<vmem>>, vector<1x128x128xf32>
    %545 = vector.shape_cast %544 : vector<1x128x128xf32> to vector<128x128xf32>
    %cst_390 = arith.constant dense<0.000000e+00> : vector<16x128xf32>
    %546 = tpu.matmul %543, %545, %cst_390 {dimension_numbers = #tpu.dot_dimension_numbers<[1], [0], [0], [1], [0, 0, 1, 1], [], []>} : vector<16x128xf32>, vector<128x128xf32>, vector<16x128xf32> -> vector<16x128xf32>
    %547 = arith.addf %542, %546 : vector<16x128xf32>
    %c9_391 = arith.constant 9 : index
    %c0_392 = arith.constant 0 : index
    %548 = tpu.strided_load %arg7[%c9_391, %c0_392] {strides = array<i32: 2, 1>} : memref<96x128xf32, #tpu.memory_space<vmem>>, vector<16x128xf32>
    %c29 = arith.constant 29 : index
    %c0_393 = arith.constant 0 : index
    %c0_394 = arith.constant 0 : index
    %549 = vector.load %arg2[%c29, %c0_393, %c0_394] : memref<30x128x128xf32, #tpu.memory_space<vmem>>, vector<1x128x128xf32>
    %550 = vector.shape_cast %549 : vector<1x128x128xf32> to vector<128x128xf32>
    %cst_395 = arith.constant dense<0.000000e+00> : vector<16x128xf32>
    %551 = tpu.matmul %548, %550, %cst_395 {dimension_numbers = #tpu.dot_dimension_numbers<[1], [0], [0], [1], [0, 0, 1, 1], [], []>} : vector<16x128xf32>, vector<128x128xf32>, vector<16x128xf32> -> vector<16x128xf32>
    %552 = arith.addf %547, %551 : vector<16x128xf32>
    %553 = vector.extract_strided_slice %552 {offsets = [0, 0], sizes = [2, 128], strides = [1, 1]} : vector<16x128xf32> to vector<2x128xf32>
    %554 = vector.extract_strided_slice %552 {offsets = [8, 0], sizes = [2, 128], strides = [1, 1]} : vector<16x128xf32> to vector<2x128xf32>
    %cst_396 = arith.constant dense<0.000000e+00> : vector<128xf32>
    %555 = vector.multi_reduction <add>, %553, %cst_396 [0] : vector<2x128xf32> to vector<128xf32>
    %556 = vector.shape_cast %555 : vector<128xf32> to vector<1x128xf32>
    %cst_397 = arith.constant 0.000000e+00 : f32
    %557 = vector.broadcast %cst_397 : f32 to vector<1x128xf32>
    %558 = arith.addf %557, %556 : vector<1x128xf32>
    %cst_398 = arith.constant dense<0.000000e+00> : vector<128xf32>
    %559 = vector.multi_reduction <add>, %554, %cst_398 [0] : vector<2x128xf32> to vector<128xf32>
    %560 = vector.shape_cast %559 : vector<128xf32> to vector<1x128xf32>
    %561 = arith.addf %558, %560 : vector<1x128xf32>
    %cst_399 = arith.constant 4.000000e+00 : f32
    %562 = vector.broadcast %cst_399 : f32 to vector<1x128xf32>
    %563 = arith.divf %561, %562 : vector<1x128xf32>
    %564 = vector.broadcast %563 : vector<1x128xf32> to vector<2x128xf32>
    %565 = arith.subf %553, %564 : vector<2x128xf32>
    %566 = arith.mulf %565, %565 : vector<2x128xf32>
    %cst_400 = arith.constant dense<0.000000e+00> : vector<128xf32>
    %567 = vector.multi_reduction <add>, %566, %cst_400 [0] : vector<2x128xf32> to vector<128xf32>
    %568 = vector.shape_cast %567 : vector<128xf32> to vector<1x128xf32>
    %cst_401 = arith.constant 0.000000e+00 : f32
    %569 = vector.broadcast %cst_401 : f32 to vector<1x128xf32>
    %570 = arith.addf %569, %568 : vector<1x128xf32>
    %571 = vector.broadcast %563 : vector<1x128xf32> to vector<2x128xf32>
    %572 = arith.subf %554, %571 : vector<2x128xf32>
    %573 = arith.mulf %572, %572 : vector<2x128xf32>
    %cst_402 = arith.constant dense<0.000000e+00> : vector<128xf32>
    %574 = vector.multi_reduction <add>, %573, %cst_402 [0] : vector<2x128xf32> to vector<128xf32>
    %575 = vector.shape_cast %574 : vector<128xf32> to vector<1x128xf32>
    %576 = arith.addf %570, %575 : vector<1x128xf32>
    %cst_403 = arith.constant 4.000000e+00 : f32
    %577 = vector.broadcast %cst_403 : f32 to vector<1x128xf32>
    %578 = arith.divf %576, %577 : vector<1x128xf32>
    %c8_404 = arith.constant 8 : index
    %c0_405 = arith.constant 0 : index
    %579 = vector.load %arg3[%c8_404, %c0_405] : memref<10x128xf32, #tpu.memory_space<vmem>>, vector<1x128xf32>
    %c9_406 = arith.constant 9 : index
    %c0_407 = arith.constant 0 : index
    %580 = vector.load %arg3[%c9_406, %c0_407] : memref<10x128xf32, #tpu.memory_space<vmem>>, vector<1x128xf32>
    %cst_408 = arith.constant 9.99999974E-6 : f32
    %581 = vector.broadcast %cst_408 : f32 to vector<1x128xf32>
    %582 = arith.addf %578, %581 : vector<1x128xf32>
    %583 = math.rsqrt %582 : vector<1x128xf32>
    %584 = arith.mulf %579, %583 : vector<1x128xf32>
    %585 = arith.mulf %563, %584 : vector<1x128xf32>
    %586 = arith.subf %580, %585 : vector<1x128xf32>
    %587 = vector.broadcast %584 : vector<1x128xf32> to vector<16x128xf32>
    %588 = arith.mulf %552, %587 : vector<16x128xf32>
    %589 = vector.broadcast %586 : vector<1x128xf32> to vector<16x128xf32>
    %590 = arith.addf %588, %589 : vector<16x128xf32>
    %591 = vector.extract_strided_slice %590 {offsets = [0, 0], sizes = [2, 128], strides = [1, 1]} : vector<16x128xf32> to vector<2x128xf32>
    %c8_409 = arith.constant 8 : index
    %c0_410 = arith.constant 0 : index
    %592 = vector.load %arg6[%c8_409, %c0_410] : memref<96x128xf32, #tpu.memory_space<vmem>>, vector<2x128xf32>
    tpu.vector_store %arg6[%c8_409, %c0_410], %591 {strides = array<i32>} : memref<96x128xf32, #tpu.memory_space<vmem>>, vector<2x128xf32>,
    %593 = vector.extract_strided_slice %590 {offsets = [8, 0], sizes = [2, 128], strides = [1, 1]} : vector<16x128xf32> to vector<2x128xf32>
    %c24_411 = arith.constant 24 : index
    %c0_412 = arith.constant 0 : index
    %594 = vector.load %arg6[%c24_411, %c0_412] : memref<96x128xf32, #tpu.memory_space<vmem>>, vector<2x128xf32>
    tpu.vector_store %arg6[%c24_411, %c0_412], %593 {strides = array<i32>} : memref<96x128xf32, #tpu.memory_space<vmem>>, vector<2x128xf32>,
    %cst_413 = arith.constant 0.000000e+00 : f32
    %595 = vector.broadcast %cst_413 : f32 to vector<8x128xf32>
    %c0_414 = arith.constant 0 : index
    %c0_415 = arith.constant 0 : index
    %596 = vector.load %arg6[%c0_414, %c0_415] : memref<96x128xf32, #tpu.memory_space<vmem>>, vector<8x128xf32>
    tpu.vector_store %arg6[%c0_414, %c0_415], %595 {strides = array<i32>} : memref<96x128xf32, #tpu.memory_space<vmem>>, vector<8x128xf32>,
    %cst_416 = arith.constant 0.000000e+00 : f32
    %597 = vector.broadcast %cst_416 : f32 to vector<14x128xf32>
    %c10_417 = arith.constant 10 : index
    %c0_418 = arith.constant 0 : index
    %598 = vector.load %arg6[%c10_417, %c0_418] : memref<96x128xf32, #tpu.memory_space<vmem>>, vector<14x128xf32>
    tpu.vector_store %arg6[%c10_417, %c0_418], %597 {strides = array<i32>} : memref<96x128xf32, #tpu.memory_space<vmem>>, vector<14x128xf32>,
    %cst_419 = arith.constant 0.000000e+00 : f32
    %599 = vector.broadcast %cst_419 : f32 to vector<22x128xf32>
    %c26_420 = arith.constant 26 : index
    %c0_421 = arith.constant 0 : index
    %600 = vector.load %arg6[%c26_420, %c0_421] : memref<96x128xf32, #tpu.memory_space<vmem>>, vector<22x128xf32>
    tpu.vector_store %arg6[%c26_420, %c0_421], %599 {strides = array<i32>} : memref<96x128xf32, #tpu.memory_space<vmem>>, vector<22x128xf32>,
    %c7_422 = arith.constant 7 : index
    %c0_423 = arith.constant 0 : index
    %601 = vector.load %arg5[%c7_422, %c0_423] : memref<96x128xf32, #tpu.memory_space<vmem>>, vector<32x128xf32>
    %c24_424 = arith.constant 24 : index
    %c0_425 = arith.constant 0 : index
    %c0_426 = arith.constant 0 : index
    %602 = vector.load %arg2[%c24_424, %c0_425, %c0_426] : memref<30x128x128xf32, #tpu.memory_space<vmem>>, vector<1x128x128xf32>
    %603 = vector.shape_cast %602 : vector<1x128x128xf32> to vector<128x128xf32>
    %cst_427 = arith.constant dense<0.000000e+00> : vector<32x128xf32>
    %604 = tpu.matmul %601, %603, %cst_427 {dimension_numbers = #tpu.dot_dimension_numbers<[1], [0], [0], [1], [0, 0, 1, 1], [], []>} : vector<32x128xf32>, vector<128x128xf32>, vector<32x128xf32> -> vector<32x128xf32>
    %c8_428 = arith.constant 8 : index
    %c0_429 = arith.constant 0 : index
    %605 = vector.load %arg5[%c8_428, %c0_429] : memref<96x128xf32, #tpu.memory_space<vmem>>, vector<32x128xf32>
    %c25 = arith.constant 25 : index
    %c0_430 = arith.constant 0 : index
    %c0_431 = arith.constant 0 : index
    %606 = vector.load %arg2[%c25, %c0_430, %c0_431] : memref<30x128x128xf32, #tpu.memory_space<vmem>>, vector<1x128x128xf32>
    %607 = vector.shape_cast %606 : vector<1x128x128xf32> to vector<128x128xf32>
    %cst_432 = arith.constant dense<0.000000e+00> : vector<32x128xf32>
    %608 = tpu.matmul %605, %607, %cst_432 {dimension_numbers = #tpu.dot_dimension_numbers<[1], [0], [0], [1], [0, 0, 1, 1], [], []>} : vector<32x128xf32>, vector<128x128xf32>, vector<32x128xf32> -> vector<32x128xf32>
    %609 = arith.addf %604, %608 : vector<32x128xf32>
    %c9_433 = arith.constant 9 : index
    %c0_434 = arith.constant 0 : index
    %610 = vector.load %arg5[%c9_433, %c0_434] : memref<96x128xf32, #tpu.memory_space<vmem>>, vector<32x128xf32>
    %c26_435 = arith.constant 26 : index
    %c0_436 = arith.constant 0 : index
    %c0_437 = arith.constant 0 : index
    %611 = vector.load %arg2[%c26_435, %c0_436, %c0_437] : memref<30x128x128xf32, #tpu.memory_space<vmem>>, vector<1x128x128xf32>
    %612 = vector.shape_cast %611 : vector<1x128x128xf32> to vector<128x128xf32>
    %cst_438 = arith.constant dense<0.000000e+00> : vector<32x128xf32>
    %613 = tpu.matmul %610, %612, %cst_438 {dimension_numbers = #tpu.dot_dimension_numbers<[1], [0], [0], [1], [0, 0, 1, 1], [], []>} : vector<32x128xf32>, vector<128x128xf32>, vector<32x128xf32> -> vector<32x128xf32>
    %614 = arith.addf %609, %613 : vector<32x128xf32>
    %615 = vector.extract_strided_slice %614 {offsets = [0, 0], sizes = [2, 128], strides = [1, 1]} : vector<32x128xf32> to vector<2x128xf32>
    %616 = vector.extract_strided_slice %614 {offsets = [16, 0], sizes = [2, 128], strides = [1, 1]} : vector<32x128xf32> to vector<2x128xf32>
    %cst_439 = arith.constant dense<0.000000e+00> : vector<128xf32>
    %617 = vector.multi_reduction <add>, %615, %cst_439 [0] : vector<2x128xf32> to vector<128xf32>
    %618 = vector.shape_cast %617 : vector<128xf32> to vector<1x128xf32>
    %cst_440 = arith.constant 0.000000e+00 : f32
    %619 = vector.broadcast %cst_440 : f32 to vector<1x128xf32>
    %620 = arith.addf %619, %618 : vector<1x128xf32>
    %cst_441 = arith.constant dense<0.000000e+00> : vector<128xf32>
    %621 = vector.multi_reduction <add>, %616, %cst_441 [0] : vector<2x128xf32> to vector<128xf32>
    %622 = vector.shape_cast %621 : vector<128xf32> to vector<1x128xf32>
    %623 = arith.addf %620, %622 : vector<1x128xf32>
    %cst_442 = arith.constant 4.000000e+00 : f32
    %624 = vector.broadcast %cst_442 : f32 to vector<1x128xf32>
    %625 = arith.divf %623, %624 : vector<1x128xf32>
    %626 = vector.broadcast %625 : vector<1x128xf32> to vector<2x128xf32>
    %627 = arith.subf %615, %626 : vector<2x128xf32>
    %628 = arith.mulf %627, %627 : vector<2x128xf32>
    %cst_443 = arith.constant dense<0.000000e+00> : vector<128xf32>
    %629 = vector.multi_reduction <add>, %628, %cst_443 [0] : vector<2x128xf32> to vector<128xf32>
    %630 = vector.shape_cast %629 : vector<128xf32> to vector<1x128xf32>
    %cst_444 = arith.constant 0.000000e+00 : f32
    %631 = vector.broadcast %cst_444 : f32 to vector<1x128xf32>
    %632 = arith.addf %631, %630 : vector<1x128xf32>
    %633 = vector.broadcast %625 : vector<1x128xf32> to vector<2x128xf32>
    %634 = arith.subf %616, %633 : vector<2x128xf32>
    %635 = arith.mulf %634, %634 : vector<2x128xf32>
    %cst_445 = arith.constant dense<0.000000e+00> : vector<128xf32>
    %636 = vector.multi_reduction <add>, %635, %cst_445 [0] : vector<2x128xf32> to vector<128xf32>
    %637 = vector.shape_cast %636 : vector<128xf32> to vector<1x128xf32>
    %638 = arith.addf %632, %637 : vector<1x128xf32>
    %cst_446 = arith.constant 4.000000e+00 : f32
    %639 = vector.broadcast %cst_446 : f32 to vector<1x128xf32>
    %640 = arith.divf %638, %639 : vector<1x128xf32>
    %c8_447 = arith.constant 8 : index
    %c0_448 = arith.constant 0 : index
    %641 = vector.load %arg3[%c8_447, %c0_448] : memref<10x128xf32, #tpu.memory_space<vmem>>, vector<1x128xf32>
    %c9_449 = arith.constant 9 : index
    %c0_450 = arith.constant 0 : index
    %642 = vector.load %arg3[%c9_449, %c0_450] : memref<10x128xf32, #tpu.memory_space<vmem>>, vector<1x128xf32>
    %cst_451 = arith.constant 9.99999974E-6 : f32
    %643 = vector.broadcast %cst_451 : f32 to vector<1x128xf32>
    %644 = arith.addf %640, %643 : vector<1x128xf32>
    %645 = math.rsqrt %644 : vector<1x128xf32>
    %646 = arith.mulf %641, %645 : vector<1x128xf32>
    %647 = arith.mulf %625, %646 : vector<1x128xf32>
    %648 = arith.subf %642, %647 : vector<1x128xf32>
    %649 = vector.broadcast %646 : vector<1x128xf32> to vector<32x128xf32>
    %650 = arith.mulf %614, %649 : vector<32x128xf32>
    %651 = vector.broadcast %648 : vector<1x128xf32> to vector<32x128xf32>
    %652 = arith.addf %650, %651 : vector<32x128xf32>
    %c8_452 = arith.constant 8 : index
    %c0_453 = arith.constant 0 : index
    %653 = vector.load %arg6[%c8_452, %c0_453] : memref<96x128xf32, #tpu.memory_space<vmem>>, vector<32x128xf32>
    %654 = arith.addf %652, %653 : vector<32x128xf32>
    %cst_454 = arith.constant 0.000000e+00 : f32
    %655 = vector.broadcast %cst_454 : f32 to vector<32x128xf32>
    %656 = arith.maximumf %654, %655 : vector<32x128xf32>
    %c8_455 = arith.constant 8 : index
    %c0_456 = arith.constant 0 : index
    %657 = vector.load %arg7[%c8_455, %c0_456] : memref<96x128xf32, #tpu.memory_space<vmem>>, vector<32x128xf32>
    tpu.vector_store %arg7[%c8_455, %c0_456], %656 {strides = array<i32>} : memref<96x128xf32, #tpu.memory_space<vmem>>, vector<32x128xf32>,
    %cst_457 = arith.constant 0.000000e+00 : f32
    %658 = vector.broadcast %cst_457 : f32 to vector<8x128xf32>
    %c0_458 = arith.constant 0 : index
    %c0_459 = arith.constant 0 : index
    %659 = vector.load %arg7[%c0_458, %c0_459] : memref<96x128xf32, #tpu.memory_space<vmem>>, vector<8x128xf32>
    tpu.vector_store %arg7[%c0_458, %c0_459], %658 {strides = array<i32>} : memref<96x128xf32, #tpu.memory_space<vmem>>, vector<8x128xf32>,
    %cst_460 = arith.constant 0.000000e+00 : f32
    %660 = vector.broadcast %cst_460 : f32 to vector<14x128xf32>
    %c10_461 = arith.constant 10 : index
    %c0_462 = arith.constant 0 : index
    %661 = vector.load %arg7[%c10_461, %c0_462] : memref<96x128xf32, #tpu.memory_space<vmem>>, vector<14x128xf32>
    tpu.vector_store %arg7[%c10_461, %c0_462], %660 {strides = array<i32>} : memref<96x128xf32, #tpu.memory_space<vmem>>, vector<14x128xf32>,
    %cst_463 = arith.constant 0.000000e+00 : f32
    %662 = vector.broadcast %cst_463 : f32 to vector<22x128xf32>
    %c26_464 = arith.constant 26 : index
    %c0_465 = arith.constant 0 : index
    %663 = vector.load %arg7[%c26_464, %c0_465] : memref<96x128xf32, #tpu.memory_space<vmem>>, vector<22x128xf32>
    tpu.vector_store %arg7[%c26_464, %c0_465], %662 {strides = array<i32>} : memref<96x128xf32, #tpu.memory_space<vmem>>, vector<22x128xf32>,
    %c8_466 = arith.constant 8 : index
    %c0_467 = arith.constant 0 : index
    %664 = vector.load %arg7[%c8_466, %c0_467] : memref<96x128xf32, #tpu.memory_space<vmem>>, vector<2x128xf32>
    %cst_468 = arith.constant dense<0xFF800000> : vector<128xf32>
    %665 = vector.multi_reduction <maximumf>, %664, %cst_468 [0] : vector<2x128xf32> to vector<128xf32>
    %666 = vector.shape_cast %665 : vector<128xf32> to vector<1x128xf32>
    %c0_469 = arith.constant 0 : index
    %c0_470 = arith.constant 0 : index
    %667 = vector.load %arg4[%c0_469, %c0_470] : memref<2x128xf32, #tpu.memory_space<vmem>>, vector<1x128xf32>
    tpu.vector_store %arg4[%c0_469, %c0_470], %666 {strides = array<i32>} : memref<2x128xf32, #tpu.memory_space<vmem>>, vector<1x128xf32>,
    %c24_471 = arith.constant 24 : index
    %c0_472 = arith.constant 0 : index
    %668 = vector.load %arg7[%c24_471, %c0_472] : memref<96x128xf32, #tpu.memory_space<vmem>>, vector<2x128xf32>
    %cst_473 = arith.constant dense<0xFF800000> : vector<128xf32>
    %669 = vector.multi_reduction <maximumf>, %668, %cst_473 [0] : vector<2x128xf32> to vector<128xf32>
    %670 = vector.shape_cast %669 : vector<128xf32> to vector<1x128xf32>
    %c1_474 = arith.constant 1 : index
    %c0_475 = arith.constant 0 : index
    %671 = vector.load %arg4[%c1_474, %c0_475] : memref<2x128xf32, #tpu.memory_space<vmem>>, vector<1x128xf32>
    tpu.vector_store %arg4[%c1_474, %c0_475], %670 {strides = array<i32>} : memref<2x128xf32, #tpu.memory_space<vmem>>, vector<1x128xf32>,
    return
  }
  func.func @transform_0(%arg0: i32) -> (i32, i32, i32) {
    %c0_i32 = arith.constant 0 : i32
    %c0_i32_0 = arith.constant 0 : i32
    %c0_i32_1 = arith.constant 0 : i32
    %c0_i32_2 = arith.constant 0 : i32
    return %c0_i32, %c0_i32_0, %c0_i32_1 : i32, i32, i32
  }
  func.func @transform_1(%arg0: i32) -> (i32, i32, i32) {
    %c0_i32 = arith.constant 0 : i32
    %c0_i32_0 = arith.constant 0 : i32
    %c0_i32_1 = arith.constant 0 : i32
    %c0_i32_2 = arith.constant 0 : i32
    return %c0_i32, %c0_i32_0, %c0_i32_1 : i32, i32, i32
  }
  func.func @transform_2(%arg0: i32) -> (i32, i32) {
    %c0_i32 = arith.constant 0 : i32
    %c0_i32_0 = arith.constant 0 : i32
    %c0_i32_1 = arith.constant 0 : i32
    return %c0_i32, %c0_i32_0 : i32, i32
  }
  func.func @transform_3(%arg0: i32) -> (i32, i32) {
    %c0_i32 = arith.constant 0 : i32
    %c0_i32_0 = arith.constant 0 : i32
    %c0_i32_1 = arith.constant 0 : i32
    return %c0_i32, %c0_i32_0 : i32, i32
  }
}

</mosaic_0001>

<bundles_post_ra>
// kernel: tpu_custom_call.1
= control target key start
LH: loop header
LB: loop body
LE: loop exit
PB: predicated region body
PF: predicated region fallthrough
CT: control target
= control target key end

     0   :  { %8 = vsyncpa [#allocation6], 0  ;;  %s3108_s0 = inlined_call_operand.hbm [shape: f32[2,32,128], index: 0, kind: input, shape index: {}]   ;;  %s3109_s1 = inlined_call_operand.hbm [shape: f32[30,128,128], index: 1, kind: input, shape index: {}]   ;;  %s3110_s2 = inlined_call_operand.hbm [shape: f32[10,128], index: 2, kind: input, shape index: {}]   ;;  %s3111_s3 = inlined_call_operand.hbm [shape: f32[2,128], index: 3, kind: output, shape index: {}]  }
   0x1   :  { %9 = vsyncpa [#allocation9], 0 }
   0x2   :  { %10 = vsyncpa [#allocation7], 0  ;;  %s28_s14 = sshll.u32 %s3109_s1, 4  ;;  %s2700_s15 = smov [#allocation8]   ;;  %s29_s14 = int_to_ptr.hbm [resolvable:$true] %s28_s14 }
   0x3   :  { %s30_s16 = sshll.u32 %s2700_s15, 4  ;;  %s15_s19 = sshll.u32 %s3108_s0, 4  ;;  %s31_s16 = int_to_ptr.vmem [resolvable:$true] %s30_s16  ;;  %s16_s19 = int_to_ptr.hbm [resolvable:$true] %s15_s19 }
   0x4   :  { %s2701_s20 = smov 128   ;;  %s2702_s21 = smov 8  }
   0x5   :  { %36 = dma.hbm_to_vmem [thread:$0]  %s29_s14, 61440, %s31_s16, [#allocation9], %s2701_s20, %s2701_s20, %s2702_s21  }
   0x6   :  { %s2703_s22 = smov [#allocation5]   ;;  %s41_s26 = sshll.u32 %s3110_s2, 4  ;;  %s42_s26 = int_to_ptr.hbm [resolvable:$true] %s41_s26 }
   0x7   :  { %s17_s23 = sshll.u32 %s2703_s22, 4  ;;  %s2704_s1 = smov [#allocation10]   ;;  %s18_s23 = int_to_ptr.vmem [resolvable:$true] %s17_s23 }
   0x8   :  { %23 = dma.hbm_to_vmem [thread:$0]  %s16_s19, 1024, %s18_s23, [#allocation6], %s2701_s20, %s2701_s20, %s2702_s21  }
   0x9   :  { %s43_s27 = sshll.u32 %s2704_s1, 4  ;;  %s44_s27 = int_to_ptr.vmem [resolvable:$true] %s43_s27 }
   0xa   :  { %49 = dma.hbm_to_vmem [thread:$0]  %s42_s26, 256, %s44_s27, [#allocation9], %s2701_s20, %s2701_s20, %s2702_s21  }
   0xb   :  { %2694 = dma.done.wait [#allocation6], 1024  }
   0xc   :  { %2695 = vsyncadd [#allocation6], 4294966272 }
   0xd   :  { %2696 = dma.done.wait [#allocation9], 61696  }
   0xe   :  { %2697 = vsyncadd [#allocation9], 4294905600  ;;  %v2705_v0 = vmov 0.0   ;;  %v256_v1 = vld [vmem:[#allocation8 + $0x178] sm:$0xff]  ;;  %v255_v2 = vld [vmem:[#allocation8 + $0x170] sm:$0xff]  ;;  %vm1361_vm15 = vcmask 1043456  }
   0xf   :  { %440 = vst [vmem:[#allocation3 + $0x58] sm:$0xff] %v2705_v0  ;;  %v135_v3 = vld [vmem:[#allocation8 + $0xf8] sm:$0xff]  ;;  %257 = vmatpush.msra.mxu2 %v256_v1  ;;  %v134_v5 = vld [vmem:[#allocation8 + $0xf0] sm:$0xff]  ;;  %v254_v6 = vld [vmem:[#allocation8 + $0x168] sm:$0xff]  ;;  %s2711_s0 = smov [#allocation11]   ;;  %s2542_s30 = sshll.u32 %s3111_s3, 4  ;;  %s2543_s30 = int_to_ptr.hbm [resolvable:$true] %s2542_s30 }
  0x10   :  { %79 = vst [vmem:[#allocation2] sm:$0xff] %v2705_v0  ;;  %136 = vmatpush.msra.mxu0 %v135_v3  ;;  %v108_v4 = vld [vmem:[#allocation8 + $0x78] sm:$0xff]  ;;  %v107_v7 = vld [vmem:[#allocation8 + $0x70] sm:$0xff]  ;;  %v133_v8 = vld [vmem:[#allocation8 + $0xe8] sm:$0xff]  ;;  %s2540_s2 = sshll.u32 %s2711_s0, 4  ;;  %s2541_s2 = int_to_ptr.vmem [resolvable:$true] %s2540_s2 }
  0x11   :  { %80 = vst [vmem:[#allocation2 + $0x28] sm:$0xff] %v2705_v0  ;;  %183 = vmatpush.msra.mxu1 %v108_v4  ;;  %258 = vmatpush.msra.mxu2 %v255_v2  ;;  %v106_v9 = vld [vmem:[#allocation8 + $0x68] sm:$0xff]  ;;  %v253_v10 = vld [vmem:[#allocation8 + $0x160] sm:$0xff]  ;;  %v252_v13 = vld [vmem:[#allocation8 + $0x158] sm:$0xff] }
  0x12   :  { %81 = vst [vmem:[#allocation2 + $0x50] sm:$0xff] %v2705_v0  ;;  %137 = vmatpush.msra.mxu0 %v134_v5  ;;  %v132_v11 = vld [vmem:[#allocation8 + $0xe0] sm:$0xff]  ;;  %v131_v14 = vld [vmem:[#allocation8 + $0xd8] sm:$0xff]  ;;  %v251_v16 = vld [vmem:[#allocation8 + $0x150] sm:$0xff] }
  0x13   :  { %82 = vst [vmem:[#allocation2 + $0x58] sm:$0xff] %v2705_v0  ;;  %184 = vmatpush.msra.mxu1 %v107_v7  ;;  %259 = vmatpush.msra.mxu2 %v254_v6  ;;  %v105_v12 = vld [vmem:[#allocation8 + $0x60] sm:$0xff]  ;;  %v104_v15 = vld [vmem:[#allocation8 + $0x58] sm:$0xff]  ;;  %v130_v17 = vld [vmem:[#allocation8 + $0xd0] sm:$0xff] }
  0x14   :  { %465 = vst [vmem:[#allocation4] sm:$0xff] %v2705_v0  ;;  %138 = vmatpush.msra.mxu0 %v133_v8  ;;  %v103_v18 = vld [vmem:[#allocation8 + $0x50] sm:$0xff]  ;;  %v250_v19 = vld [vmem:[#allocation8 + $0x148] sm:$0xff]  ;;  %v249_v22 = vld [vmem:[#allocation8 + $0x140] sm:$0xff] }
  0x15   :  { %466 = vst [vmem:[#allocation4 + $0x18] sm:$0xff] %v2705_v0  ;;  %185 = vmatpush.msra.mxu1 %v106_v9  ;;  %260 = vmatpush.msra.mxu2 %v253_v10  ;;  %v129_v20 = vld [vmem:[#allocation8 + $0xc8] sm:$0xff]  ;;  %v128_v23 = vld [vmem:[#allocation8 + $0xc0] sm:$0xff]  ;;  %v248_v25 = vld [vmem:[#allocation8 + $0x138] sm:$0xff] }
  0x16   :  { %467 = vst [vmem:[#allocation4 + $0x30] sm:$0xff] %v2705_v0  ;;  %139 = vmatpush.msra.mxu0 %v132_v11  ;;  %v102_v21 = vld [vmem:[#allocation8 + $0x48] sm:$0xff]  ;;  %v101_v24 = vld [vmem:[#allocation8 + $0x40] sm:$0xff]  ;;  %v127_v26 = vld [vmem:[#allocation8 + $0xb8] sm:$0xff] }
  0x17   :  { %468 = vst [vmem:[#allocation4 + $0x38] sm:$0xff] %v2705_v0  ;;  %186 = vmatpush.msra.mxu1 %v105_v12  ;;  %261 = vmatpush.msra.mxu2 %v252_v13  ;;  %v2752_v27 = vld [vmem:[#allocation5] sm:$0xff]  ;;  %v100_v28 = vld [vmem:[#allocation8 + $0x38] sm:$0xff]  ;;  %v2754_v29 = vld [vmem:[#allocation5 + $0x8] sm:$0xff] }
  0x18   :  { %756 = vst [vmem:[#allocation3] sm:$0xff] %v2705_v0  ;;  %140 = vmatpush.msra.mxu0 %v131_v14  ;;  %v247_v30 = vld [vmem:[#allocation8 + $0x130] sm:$0xff]  ;;  %v2761_v34 = vld [vmem:[#allocation5 + $0x18] sm:$0xff]  ;;  %v246_v35 = vld [vmem:[#allocation8 + $0x128] sm:$0xff] }
  0x19   :  { %759 = vst [vmem:[#allocation3 + $0x28] sm:$0xff] %v2705_v0  ;;  %187 = vmatpush.msra.mxu1 %v104_v15  ;;  %262 = vmatpush.msra.mxu2 %v251_v16  ;;  %v126_v31 = vld [vmem:[#allocation8 + $0xb0] sm:$0xff]  ;;  %v125_v36 = vld [vmem:[#allocation8 + $0xa8] sm:$0xff]  ;;  %v245_v38 = vld [vmem:[#allocation8 + $0x120] sm:$0xff] }
  0x1a   :  { %141 = vmatpush.msra.mxu0 %v130_v17  ;;  %66 = vst [vmem:[#allocation2 + $0x8] sm:$0xff] %v2752_v27  ;;  %v2758_v32 = vld [vmem:[#allocation5 + $0x10] sm:$0xff]  ;;  %v98_v37 = vld [vmem:[#allocation8 + $0x28] sm:$0xff]  ;;  %v124_v39 = vld [vmem:[#allocation8 + $0xa0] sm:$0xff] }
  0x1b   :  { %188 = vmatpush.msra.mxu1 %v103_v18  ;;  %263 = vmatpush.msra.mxu2 %v250_v19  ;;  %67 = vst [vmem:[#allocation2 + $0x10] sm:$0xff] %v2754_v29  ;;  %v99_v33 = vld [vmem:[#allocation8 + $0x30] sm:$0xff]  ;;  %v97_v40 = vld [vmem:[#allocation8 + $0x20] sm:$0xff]  ;;  %v244_v41 = vld [vmem:[#allocation8 + $0x118] sm:$0xff] }
  0x1c   :  { %142 = vmatpush.msra.mxu0 %v129_v20  ;;  %68 = vst [vmem:[#allocation2 + $0x18] sm:$0xff] %v2758_v32  ;;  %v123_v42 = vld [vmem:[#allocation8 + $0x98] sm:$0xff]  ;;  %v71_v45 = vld [vmem:[#allocation5 + $0x20] sm:$0xff]  ;;  %v243_v46 = vld [vmem:[#allocation8 + $0x110] sm:$0xff] }
  0x1d   :  { %189 = vmatpush.msra.mxu1 %v102_v21  ;;  %264 = vmatpush.msra.mxu2 %v249_v22  ;;  %69 = vst [vmem:[#allocation2 + $0x20] sm:$0xff] %v2761_v34  ;;  %v96_v44 = vld [vmem:[#allocation8 + $0x18] sm:$0xff]  ;;  %v122_v47 = vld [vmem:[#allocation8 + $0x90] sm:$0xff]  ;;  %v242_v49 = vld [vmem:[#allocation8 + $0x108] sm:$0xff] }
  0x1e   :  { %143 = vmatpush.msra.mxu0 %v128_v23  ;;  %75 = vst [vmem:[#allocation2 + $0x30] sm:$0xff] %v71_v45  ;;  %v95_v48 = vld [vmem:[#allocation8 + $0x10] sm:$0xff]  ;;  %v121_v50 = vld [vmem:[#allocation8 + $0x88] sm:$0xff]  ;;  %v241_v52 = vld [vmem:[#allocation8 + $0x100] sm:$0xff] }
  0x1f   :  { %190 = vmatpush.msra.mxu1 %v101_v24  ;;  %265 = vmatpush.msra.mxu2 %v248_v25  ;;  %v94_v51 = vld [vmem:[#allocation8 + $0x8] sm:$0xff]  ;;  %v120_v53 = vld [vmem:[#allocation8 + $0x80] sm:$0xff]  ;;  %v73_v59 = vld [vmem:[#allocation5 + $0x30] sm:$0xff] }
  0x20   :  { %144 = vmatpush.msra.mxu0 %v127_v26  ;;  %v93_v55 = vld [vmem:[#allocation8] sm:$0xff]  ;;  %v72_v56 = vld [vmem:[#allocation5 + $0x28] sm:$0xff]  ;;  %77 = vst [vmem:[#allocation2 + $0x40] sm:$0xff] %v73_v59  ;;  %v74_v62 = vld [vmem:[#allocation5 + $0x38] sm:$0xff] }
  0x21   :  { %191 = vmatpush.msra.mxu1 %v100_v28  ;;  %266 = vmatpush.msra.mxu2 %v247_v30  ;;  %v83_v43 = vld [vmem:[#allocation2 + $0x7] sm:$0xff]  ;;  %76 = vst [vmem:[#allocation2 + $0x38] sm:$0xff] %v72_v56  ;;  %v239_v12 = vld [vmem:[#allocation2 + $0x51] sm:$0xff] }
  0x22   :  { %145 = vmatpush.msra.mxu0 %v126_v31  ;;  %989 = vst [vmem:[#allocation2] sm:$0xff] %v2705_v0  ;;  %v230_v54 = vld [vmem:[#allocation2 + $0x9] sm:$0xff] }
  0x23   :  { %192 = vmatpush.msra.mxu1 %v99_v33  ;;  %267 = vmatpush.msra.mxu2 %v246_v35  ;;  %v231_v57 = vld [vmem:[#allocation2 + $0x11] sm:$0xff]  ;;  %78 = vst [vmem:[#allocation2 + $0x48] sm:$0xff] %v74_v62 }
  0x24   :  { %146 = vmatpush.msra.mxu0 %v125_v36  ;;  %v84_v58 = vld [vmem:[#allocation2 + $0xf] sm:$0xff]  ;;  %v232_v60 = vld [vmem:[#allocation2 + $0x19] sm:$0xff]  ;;  %v233_v4 = vld [vmem:[#allocation2 + $0x21] sm:$0xff] }
  0x25   :  { %193 = vmatpush.msra.mxu1 %v98_v37  ;;  %268 = vmatpush.msra.mxu2 %v245_v38  ;;  %v85_v61 = vld [vmem:[#allocation2 + $0x17] sm:$0xff]  ;;  %v234_v63 = vld [vmem:[#allocation2 + $0x29] sm:$0xff]  ;;  %v86_v5 = vld [vmem:[#allocation2 + $0x1f] sm:$0xff] }
  0x26   :  { %147 = vmatpush.msra.mxu0 %v124_v39  ;;  %v88_v2 = vld [vmem:[#allocation2 + $0x2f] sm:$0xff]  ;;  %v87_v8 = vld [vmem:[#allocation2 + $0x27] sm:$0xff] }
  0x27   :  { %194 = vmatpush.msra.mxu1 %v97_v40  ;;  %269 = vmatpush.msra.mxu2 %v244_v41 }
  0x28   :  { %148 = vmatpush.msra.mxu0 %v123_v42  ;;  %v235_v1 = vld [vmem:[#allocation2 + $0x31] sm:$0xff]  ;;  %v236_v6 = vld [vmem:[#allocation2 + $0x39] sm:$0xff] }
  0x29   :  { %195 = vmatpush.msra.mxu1 %v96_v44  ;;  %270 = vmatpush.msra.mxu2 %v243_v46  ;;  %v89_v3 = vld [vmem:[#allocation2 + $0x37] sm:$0xff]  ;;  %v90_v7 = vld [vmem:[#allocation2 + $0x3f] sm:$0xff] }
  0x2a   :  { %149 = vmatpush.msra.mxu0 %v122_v47  ;;  %742 = vst [vmem:[#allocation2 + $0x30] sm:$0xff] %v2705_v0  ;;  %v237_v9 = vld [vmem:[#allocation2 + $0x41] sm:$0xff]  ;;  %v238_v10 = vld [vmem:[#allocation2 + $0x49] sm:$0xff] }
  0x2b   :  { %196 = vmatpush.msra.mxu1 %v95_v48  ;;  %271 = vmatpush.msra.mxu2 %v242_v49  ;;  %743 = vst [vmem:[#allocation2 + $0x38] sm:$0xff] %v2705_v0  ;;  %v91_v11 = vld [vmem:[#allocation2 + $0x47] sm:$0xff]  ;;  %v92_v13 = vld [vmem:[#allocation2 + $0x4f] sm:$0xff]  ;;  %v2706_v49 = vmov 64.0  }
  0x2c   :  { %150 = vmatpush.msra.mxu0 %v121_v50  ;;  %2565 = vrcp.f32 %v2706_v49 }
  0x2d   :  { %197 = vmatpush.msra.mxu1 %v94_v51  ;;  %272 = vmatpush.msra.mxu2 %v241_v52 }
  0x2e   :  { %151 = vmatpush.msra.mxu0 %v120_v53  ;;  %273 = vmatmul.f32.vlgmr.msra.gmra.mxu2 %v230_v54 }
  0x2f   :  { %198 = vmatpush.msra.mxu1 %v93_v55  ;;  %152 = vmatmul.f32.vlgmr.msra.gmra.mxu0 %v2752_v27 }
  0x30   :  { %199 = vmatmul.f32.vlgmr.msra.gmra.mxu1 %v83_v43 }
  0x36   :  { %276 = vmatmul.f32.gmra.mxu2 %v231_v57  ;;  %v2566_v57 = vpop.eup %2565 }
  0x37   :  { %155 = vmatmul.f32.gmra.mxu0 %v2754_v29  ;;  %vm339_vm0 = vweird.f32 %v2566_v57 }
  0x38   :  { %202 = vmatmul.f32.gmra.mxu1 %v84_v58 }
  0x3e   :  { %279 = vmatmul.f32.gmra.mxu2 %v232_v60 }
  0x3f   :  { %158 = vmatmul.f32.gmra.mxu0 %v2758_v32 }
  0x40   :  { %205 = vmatmul.f32.gmra.mxu1 %v85_v61 }
  0x46   :  { %282 = vmatmul.f32.gmra.mxu2 %v233_v4 }
  0x47   :  { %161 = vmatmul.f32.gmra.mxu0 %v2761_v34 }
  0x48   :  { %208 = vmatmul.f32.gmra.mxu1 %v86_v5 }
  0x4e   :  { %285 = vmatmul.f32.gmra.mxu2 %v234_v63 }
  0x4f   :  { %164 = vmatmul.f32.gmra.mxu0 %v2705_v0 }
  0x50   :  { %211 = vmatmul.f32.gmra.mxu1 %v87_v8 }
  0x56   :  { %288 = vmatmul.f32.gmra.mxu2 %v235_v1  ;;  %v335_v1 = vmul.f32 64.0, %v2566_v57 }
  0x57   :  { %167 = vmatmul.f32.gmra.mxu0 %v71_v45 }
  0x58   :  { %214 = vmatmul.f32.gmra.mxu1 %v88_v2 }
  0x5e   :  { %291 = vmatmul.f32.gmra.mxu2 %v236_v6 }
  0x5f   :  { %170 = vmatmul.f32.gmra.mxu0 %v72_v56 }
  0x60   :  { %217 = vmatmul.f32.gmra.mxu1 %v89_v3 }
  0x66   :  { %294 = vmatmul.f32.gmra.mxu2 %v237_v9 }
  0x67   :  { %173 = vmatmul.f32.gmra.mxu0 %v73_v59 }
  0x68   :  { %220 = vmatmul.f32.gmra.mxu1 %v90_v7  ;;  %v336_v7 = vsub.f32 1.0, %v335_v1 }
  0x6e   :  { %297 = vmatmul.f32.gmra.mxu2 %v238_v10 }
  0x6f   :  { %176 = vmatmul.f32.gmra.mxu0 %v74_v62 }
  0x70   :  { %223 = vmatmul.f32.gmra.mxu1 %v91_v11  ;;  %v337_v11 = vmul.f32 %v2566_v57, %v336_v7  ;;  %v510_v7 = vld [vmem:[#allocation8 + $0x258] sm:$0xff] }
  0x76   :  { %300 = vmatmul.f32.gmra.mxu2 %v239_v12 }
  0x77   :  { %179 = vmatmul.f32.gmra.mxu0 %v2705_v0 }
  0x78   :  { %226 = vmatmul.f32.gmra.mxu1 %v92_v13 }
  0xac   :  { %v153_v14 = vpop.f32.mrf.mxu0 }
  0xad   :  { %v200_v15 = vpop.f32.mrf.mxu1 }
  0xae   :  { %v201_v35 = vadd.f32 %v200_v15, %v153_v14  ;;  %v338_v15 = vadd.f32 %v2566_v57, %v337_v11 }
  0xb1   :  { %v274_v16 = vpop.f32.mrf.mxu2 }
  0xb2   :  { %v2775_v40 = vadd.f32 %v274_v16, %v201_v35 }
  0xb4   :  { %v156_v17 = vpop.f32.mrf.mxu0 }
  0xb5   :  { %v203_v18 = vpop.f32.mrf.mxu1 }
  0xb6   :  { %v204_v32 = vadd.f32 %v203_v18, %v156_v17 }
  0xb9   :  { %v277_v19 = vpop.f32.mrf.mxu2 }
  0xba   :  { %v2773_v37 = vadd.f32 %v277_v19, %v204_v32  ;;  %v340_v19 = vsel %vm339_vm0, %v2566_v57, %v338_v15  ;;  %v604_v15 = vld [vmem:[#allocation8 + $0x2e0] sm:$0xff] }
  0xbc   :  { %v159_v20 = vpop.f32.mrf.mxu0  ;;  %v314_v42 = vadd.f32 %v2773_v37, %v2775_v40 }
  0xbd   :  { %v206_v21 = vpop.f32.mrf.mxu1 }
  0xbe   :  { %v207_v36 = vadd.f32 %v206_v21, %v159_v20 }
  0xc1   :  { %v280_v22 = vpop.f32.mrf.mxu2 }
  0xc2   :  { %v2777_v41 = vadd.f32 %v280_v22, %v207_v36 }
  0xc4   :  { %v162_v23 = vpop.f32.mrf.mxu0  ;;  %v315_v46 = vadd.f32 %v314_v42, %v2777_v41 }
  0xc5   :  { %v209_v24 = vpop.f32.mrf.mxu1 }
  0xc6   :  { %v210_v38 = vadd.f32 %v209_v24, %v162_v23 }
  0xc9   :  { %v283_v25 = vpop.f32.mrf.mxu2 }
  0xca   :  { %v2781_v43 = vadd.f32 %v283_v25, %v210_v38 }
  0xcc   :  { %v165_v26 = vpop.f32.mrf.mxu0  ;;  %v316_v47 = vadd.f32 %v315_v46, %v2781_v43 }
  0xcd   :  { %v212_v27 = vpop.f32.mrf.mxu1 }
  0xce   :  { %v317_v53 = vrot.slane %v316_v47, 4 }
  0xd0   :  { %v318_v61 = vadd.f32 %v317_v53, %v316_v47 }
  0xd1   :  { %v286_v28 = vpop.f32.mrf.mxu2 }
  0xd2   :  { %v319_v4 = vrot.slane %v318_v61, 2 }
  0xd4   :  { %v168_v29 = vpop.f32.mrf.mxu0  ;;  %v320_v9 = vadd.f32 %v319_v4, %v318_v61 }
  0xd5   :  { %v215_v30 = vpop.f32.mrf.mxu1 }
  0xd6   :  { %v216_v51 = vadd.f32 %v215_v30, %v168_v29  ;;  %v321_v13 = vrot.slane %v320_v9, 1 }
  0xd8   :  { %v322_v17 = vadd.f32 %v321_v13, %v320_v9  ;;  %v606_v9 = vld [vmem:[#allocation8 + $0x2f0] sm:$0xff]  ;;  %v508_v13 = vld [vmem:[#allocation8 + $0x248] sm:$0xff] }
  0xd9   :  { %v289_v31 = vpop.f32.mrf.mxu2 }
  0xda   :  { %v2787_v58 = vadd.f32 %v289_v31, %v216_v51 }
  0xdc   :  { %v171_v33 = vpop.f32.mrf.mxu0 }
  0xdd   :  { %v218_v34 = vpop.f32.mrf.mxu1 }
  0xde   :  { %v219_v48 = vadd.f32 %v218_v34, %v171_v33 }
  0xe1   :  { %v292_v39 = vpop.f32.mrf.mxu2 }
  0xe2   :  { %v2785_v54 = vadd.f32 %v292_v39, %v219_v48 }
  0xe4   :  { %v174_v44 = vpop.f32.mrf.mxu0  ;;  %v324_v62 = vadd.f32 %v2785_v54, %v2787_v58 }
  0xe5   :  { %v221_v45 = vpop.f32.mrf.mxu1 }
  0xe6   :  { %v222_v52 = vadd.f32 %v221_v45, %v174_v44 }
  0xe9   :  { %v295_v50 = vpop.f32.mrf.mxu2 }
  0xea   :  { %v2789_v59 = vadd.f32 %v295_v50, %v222_v52  ;;  %v514_v52 = vld [vmem:[#allocation8 + $0x278] sm:$0xff] }
  0xeb   :  { %515 = vmatpush.msra.mxu3 %v514_v52  ;;  %v380_v52 = vld [vmem:[#allocation10 + $0x1] sm:$0x1] }
  0xec   :  { %v177_v55 = vpop.f32.mrf.mxu0  ;;  %v325_v2 = vadd.f32 %v324_v62, %v2789_v59  ;;  %v512_v62 = vld [vmem:[#allocation8 + $0x268] sm:$0xff] }
  0xed   :  { %v224_v56 = vpop.f32.mrf.mxu1 }
  0xee   :  { %v225_v60 = vadd.f32 %v224_v56, %v177_v55  ;;  %v513_v56 = vld [vmem:[#allocation8 + $0x270] sm:$0xff] }
  0xef   :  { %516 = vmatpush.msra.mxu3 %v513_v56 }
  0xf1   :  { %v298_v63 = vpop.f32.mrf.mxu2  ;;  %517 = vmatpush.msra.mxu3 %v512_v62 }
  0xf2   :  { %v2794_v3 = vadd.f32 %v298_v63, %v225_v60 }
  0xf4   :  { %v326_v5 = vadd.f32 %v325_v2, %v2794_v3  ;;  %v180_v6 = vpop.f32.mrf.mxu0  ;;  %v511_v2 = vld [vmem:[#allocation8 + $0x260] sm:$0xff] }
  0xf5   :  { %v227_v49 = vpop.f32.mrf.mxu1  ;;  %518 = vmatpush.msra.mxu3 %v511_v2  ;;  %v607_v6 = vld [vmem:[#allocation8 + $0x2f8] sm:$0xff] }
  0xf6   :  { %v327_v8 = vrot.slane %v326_v5, 4  ;;  %608 = vmatpush.msrb.mxu0 %v607_v6 }
  0xf7   :  { %519 = vmatpush.msra.mxu3 %v510_v7 }
  0xf8   :  { %v328_v10 = vadd.f32 %v327_v8, %v326_v5  ;;  %609 = vmatpush.msrb.mxu0 %v606_v9 }
  0xf9   :  { %v301_v61 = vpop.f32.mrf.mxu2 }
  0xfa   :  { %v329_v12 = vrot.slane %v328_v10, 2  ;;  %v489_v61 = vld [vmem:[#allocation8 + $0x1e8] sm:$0xff] }
  0xfc   :  { %v330_v14 = vadd.f32 %v329_v12, %v328_v10  ;;  %v509_v10 = vld [vmem:[#allocation8 + $0x250] sm:$0xff]  ;;  %v605_v12 = vld [vmem:[#allocation8 + $0x2e8] sm:$0xff] }
  0xfd   :  { %520 = vmatpush.msra.mxu3 %v509_v10  ;;  %610 = vmatpush.msrb.mxu0 %v605_v12 }
  0xfe   :  { %v331_v16 = vrot.slane %v330_v14, 1 }
  0xff   :  { %521 = vmatpush.msra.mxu3 %v508_v13  ;;  %611 = vmatpush.msrb.mxu0 %v604_v15 }
 0x100   :  { %v332_v18 = vadd.f32 %v331_v16, %v330_v14  ;;  %v507_v16 = vld [vmem:[#allocation8 + $0x240] sm:$0xff] }
 0x101   :  { %522 = vmatpush.msra.mxu3 %v507_v16  ;;  %v487_v16 = vld [vmem:[#allocation8 + $0x1d8] sm:$0xff] }
 0x102   :  { %v333_v20 = vadd.f32 %v332_v18, %v322_v17  ;;  %v603_v18 = vld [vmem:[#allocation8 + $0x2d8] sm:$0xff] }
 0x103   :  { %612 = vmatpush.msrb.mxu0 %v603_v18  ;;  %v486_v18 = vld [vmem:[#allocation8 + $0x1d0] sm:$0xff] }
 0x104   :  { %v2797_v21 = vmul.f32 %v340_v19, %v333_v20  ;;  %v506_v20 = vld [vmem:[#allocation8 + $0x238] sm:$0xff] }
 0x105   :  { %523 = vmatpush.msra.mxu3 %v506_v20 }
 0x106   :  { %v342_v22 = vsub.f32 %v2775_v40, %v2797_v21  ;;  %v343_v23 = vsub.f32 %v2773_v37, %v2797_v21  ;;  %v344_v24 = vsub.f32 %v2777_v41, %v2797_v21  ;;  %v360_v25 = vsub.f32 %v2787_v58, %v2797_v21 }
 0x107   :  { %v361_v26 = vsub.f32 %v2785_v54, %v2797_v21  ;;  %v362_v27 = vsub.f32 %v2789_v59, %v2797_v21  ;;  %v345_v28 = vsub.f32 %v2781_v43, %v2797_v21  ;;  %v363_v31 = vsub.f32 %v2794_v3, %v2797_v21 }
 0x108   :  { %v346_v29 = vmul.f32 %v342_v22, %v342_v22  ;;  %v347_v30 = vmul.f32 %v343_v23, %v343_v23  ;;  %v364_v32 = vmul.f32 %v360_v25, %v360_v25  ;;  %v348_v34 = vmul.f32 %v344_v24, %v344_v24  ;;  %v602_v22 = vld [vmem:[#allocation8 + $0x2d0] sm:$0xff]  ;;  %v601_v24 = vld [vmem:[#allocation8 + $0x2c8] sm:$0xff] }
 0x109   :  { %v365_v33 = vmul.f32 %v361_v26, %v361_v26  ;;  %v366_v36 = vmul.f32 %v362_v27, %v362_v27  ;;  %v349_v39 = vmul.f32 %v345_v28, %v345_v28  ;;  %v367_v44 = vmul.f32 %v363_v31, %v363_v31  ;;  %v505_v23 = vld [vmem:[#allocation8 + $0x230] sm:$0xff]  ;;  %613 = vmatpush.msrb.mxu0 %v602_v22  ;;  %v504_v25 = vld [vmem:[#allocation8 + $0x228] sm:$0xff]  ;;  %v503_v26 = vld [vmem:[#allocation8 + $0x220] sm:$0xff] }
 0x10a   :  { %v350_v35 = vadd.f32 %v347_v30, %v346_v29  ;;  %524 = vmatpush.msra.mxu3 %v505_v23  ;;  %v599_v29 = vld [vmem:[#allocation8 + $0x2b8] sm:$0xff] }
 0x10b   :  { %v368_v38 = vadd.f32 %v365_v33, %v364_v32  ;;  %614 = vmatpush.msrb.mxu0 %v601_v24  ;;  %v502_v30 = vld [vmem:[#allocation8 + $0x218] sm:$0xff]  ;;  %v598_v32 = vld [vmem:[#allocation8 + $0x2b0] sm:$0xff]  ;;  %v485_v24 = vld [vmem:[#allocation8 + $0x1c8] sm:$0xff] }
 0x10c   :  { %v351_v42 = vadd.f32 %v350_v35, %v348_v34  ;;  %525 = vmatpush.msra.mxu3 %v504_v25  ;;  %v501_v33 = vld [vmem:[#allocation8 + $0x210] sm:$0xff]  ;;  %v597_v35 = vld [vmem:[#allocation8 + $0x2a8] sm:$0xff]  ;;  %v484_v25 = vld [vmem:[#allocation8 + $0x1c0] sm:$0xff] }
 0x10d   :  { %v369_v45 = vadd.f32 %v368_v38, %v366_v36  ;;  %v500_v36 = vld [vmem:[#allocation8 + $0x208] sm:$0xff] }
 0x10e   :  { %v352_v46 = vadd.f32 %v351_v42, %v349_v39  ;;  %526 = vmatpush.msra.mxu3 %v503_v26  ;;  %v596_v39 = vld [vmem:[#allocation8 + $0x2a0] sm:$0xff]  ;;  %v595_v42 = vld [vmem:[#allocation8 + $0x298] sm:$0xff] }
 0x10f   :  { %v370_v47 = vadd.f32 %v369_v45, %v367_v44  ;;  %v499_v44 = vld [vmem:[#allocation8 + $0x200] sm:$0xff] }
 0x110   :  { %v353_v48 = vrot.slane %v352_v46, 4  ;;  %527 = vmatpush.msra.mxu3 %v502_v30  ;;  %v379_v45 = vld [vmem:[#allocation10] sm:$0x1] }
 0x111   :  { %v371_v50 = vrot.slane %v370_v47, 4 }
 0x112   :  { %v354_v51 = vadd.f32 %v353_v48, %v352_v46  ;;  %528 = vmatpush.msra.mxu3 %v501_v33  ;;  %v491_v48 = vld [vmem:[#allocation8 + $0x1f8] sm:$0xff] }
 0x113   :  { %v372_v53 = vadd.f32 %v371_v50, %v370_v47  ;;  %v594_v47 = vld [vmem:[#allocation8 + $0x290] sm:$0xff]  ;;  %v593_v50 = vld [vmem:[#allocation8 + $0x288] sm:$0xff] }
 0x114   :  { %v355_v55 = vrot.slane %v354_v51, 2  ;;  %529 = vmatpush.msra.mxu3 %v500_v36  ;;  %v481_v36 = vld [vmem:[#allocation8 + $0x1a8] sm:$0xff] }
 0x115   :  { %v373_v57 = vrot.slane %v372_v53, 2 }
 0x116   :  { %v356_v60 = vadd.f32 %v355_v55, %v354_v51  ;;  %530 = vmatpush.msra.mxu3 %v499_v44 }
 0x117   :  { %v374_v63 = vadd.f32 %v373_v57, %v372_v53  ;;  %v592_v53 = vld [vmem:[#allocation8 + $0x280] sm:$0xff] }
 0x118   :  { %v357_v1 = vrot.slane %v356_v60, 1  ;;  %550 = vmatpush.msrb.mxu3 %v491_v48 }
 0x119   :  { %v375_v4 = vrot.slane %v374_v63, 1 }
 0x11a   :  { %v358_v5 = vadd.f32 %v357_v1, %v356_v60  ;;  %v490_v60 = vld [vmem:[#allocation8 + $0x1f0] sm:$0xff] }
 0x11b   :  { %v376_v8 = vadd.f32 %v375_v4, %v374_v63  ;;  %551 = vmatpush.msrb.mxu3 %v490_v60  ;;  %v590_v60 = vld [vmem:[#allocation4 + $0x31] sm:$0xff] }
 0x11d   :  { %v377_v11 = vadd.f32 %v376_v8, %v358_v5  ;;  %552 = vmatpush.msrb.mxu3 %v489_v61 }
 0x11f   :  { %v378_v14 = vmul.f32 %v377_v11, %v340_v19  ;;  %v600_v19 = vld [vmem:[#allocation8 + $0x2c0] sm:$0xff] }
 0x120   :  { %615 = vmatpush.msrb.mxu0 %v600_v19 }
 0x121   :  { %v381_v17 = vadd.f32 1e-05, %v378_v14 }
 0x122   :  { %616 = vmatpush.msrb.mxu0 %v599_v29 }
 0x123   :  { %2567 = vrsqrt.f32 %v381_v17  ;;  %vm388_vm2 = vweird.f32 %v381_v17 }
 0x124   :  { %617 = vmatpush.msrb.mxu0 %v598_v32 }
 0x126   :  { %618 = vmatpush.msrb.mxu0 %v597_v35  ;;  %v482_v35 = vld [vmem:[#allocation8 + $0x1b0] sm:$0xff] }
 0x128   :  { %619 = vmatpush.msrb.mxu0 %v596_v39 }
 0x129   :  { %v2568_v27 = vpop.eup %2567 }
 0x12a   :  { %v383_v28 = vmul.f32 %v2568_v27, %v381_v17  ;;  %vm389_vm1 = vweird.f32 %v2568_v27  ;;  %620 = vmatpush.msrb.mxu0 %v595_v42 }
 0x12b   :  { %vm390_vm3 = vmor %vm388_vm2, %vm389_vm1 }
 0x12c   :  { %v384_v31 = vmul.f32 %v2568_v27, %v383_v28  ;;  %621 = vmatpush.msrb.mxu0 %v594_v47  ;;  %v483_v28 = vld [vmem:[#allocation8 + $0x1b8] sm:$0xff] }
 0x12e   :  { %v385_v34 = vmul.f32 0.5, %v384_v31  ;;  %622 = vmatpush.msrb.mxu0 %v593_v50  ;;  %v479_v50 = vld [vmem:[#allocation8 + $0x198] sm:$0xff] }
 0x130   :  { %v386_v38 = vsub.f32 1.5, %v385_v34  ;;  %623 = vmatpush.msrb.mxu0 %v592_v53 }
 0x132   :  { %v387_v46 = vmul.f32 %v2568_v27, %v386_v38 }
 0x134   :  { %v391_v49 = vsel %vm390_vm3, %v2568_v27, %v387_v46  ;;  %v480_v46 = vld [vmem:[#allocation8 + $0x1a0] sm:$0xff] }
 0x135   :  { %v392_v51 = vmul.f32 %v391_v49, %v379_v45 }
 0x137   :  { %v393_v55 = vmul.f32 %v392_v51, %v2797_v21  ;;  %v395_v56 = vperm.slane %v392_v51, 0  ;;  %v478_v51 = vld [vmem:[#allocation8 + $0x190] sm:$0xff] }
 0x139   :  { %v394_v57 = vsub.f32 %v380_v52, %v393_v55  ;;  %v398_v62 = vmul.f32 %v395_v56, %v2777_v41  ;;  %v399_v63 = vmul.f32 %v395_v56, %v2781_v43  ;;  %v401_v2 = vmul.f32 %v395_v56, %v2787_v58 }
 0x13a   :  { %v402_v4 = vmul.f32 %v395_v56, %v2785_v54  ;;  %v403_v5 = vmul.f32 %v395_v56, %v2789_v59  ;;  %v404_v21 = vmul.f32 %v395_v56, %v2794_v3  ;;  %v396_v6 = vmul.f32 %v395_v56, %v2775_v40  ;;  %v488_v40 = vld [vmem:[#allocation8 + $0x1e0] sm:$0xff] }
 0x13b   :  { %v406_v1 = vperm.slane %v394_v57, 0  ;;  %v397_v7 = vmul.f32 %v395_v56, %v2773_v37  ;;  %553 = vmatpush.msrb.mxu3 %v488_v40  ;;  %v477_v56 = vld [vmem:[#allocation8 + $0x188] sm:$0xff]  ;;  %v476_v57 = vld [vmem:[#allocation8 + $0x180] sm:$0xff] }
 0x13d   :  { %v409_v8 = vadd.f32 %v406_v1, %v398_v62  ;;  %v410_v9 = vadd.f32 %v406_v1, %v399_v63  ;;  %v412_v41 = vadd.f32 %v406_v1, %v401_v2  ;;  %v413_v10 = vadd.f32 %v406_v1, %v402_v4  ;;  %554 = vmatpush.msrb.mxu3 %v487_v16 }
 0x13e   :  { %v414_v43 = vadd.f32 %v406_v1, %v403_v5  ;;  %v415_v11 = vadd.f32 %v406_v1, %v404_v21  ;;  %v407_v12 = vadd.f32 %v406_v1, %v396_v6  ;;  %v408_v14 = vadd.f32 %v406_v1, %v397_v7 }
 0x13f   :  { %v419_v13 = vmax.f32 %v409_v8, 0.0  ;;  %v420_v58 = vmax.f32 %v410_v9, 0.0  ;;  %v422_v54 = vmax.f32 %v412_v41, 0.0  ;;  %v423_v15 = vmax.f32 %v413_v10, 0.0  ;;  %555 = vmatpush.msrb.mxu3 %v486_v18 }
 0x140   :  { %v424_v59 = vmax.f32 %v414_v43, 0.0  ;;  %v425_v3 = vmax.f32 %v415_v11, 0.0  ;;  %v417_v37 = vmax.f32 %v407_v12, 0.0  ;;  %v418_v17 = vmax.f32 %v408_v14, 0.0 }
 0x141   :  { %429 = vst [vmem:[#allocation3 + $0x18] sm:$0xff] %v419_v13  ;;  %556 = vmatpush.msrb.mxu3 %v485_v24 }
 0x142   :  { %430 = vst [vmem:[#allocation3 + $0x20] sm:$0xff] %v420_v58 }
 0x143   :  { %432 = vst [vmem:[#allocation3 + $0x30] sm:$0xff] %v422_v54  ;;  %557 = vmatpush.msrb.mxu3 %v484_v25  ;;  %v2707_v54 = vmov 32.0  }
 0x144   :  { %433 = vst [vmem:[#allocation3 + $0x38] sm:$0xff] %v423_v15  ;;  %2569 = vrcp.f32 %v2707_v54 }
 0x145   :  { %434 = vst [vmem:[#allocation3 + $0x40] sm:$0xff] %v424_v59  ;;  %558 = vmatpush.msrb.mxu3 %v483_v28 }
 0x146   :  { %435 = vst [vmem:[#allocation3 + $0x48] sm:$0xff] %v425_v3 }
 0x147   :  { %427 = vst [vmem:[#allocation3 + $0x8] sm:$0xff] %v417_v37  ;;  %559 = vmatpush.msrb.mxu3 %v482_v35 }
 0x148   :  { %428 = vst [vmem:[#allocation3 + $0x10] sm:$0xff] %v418_v17 }
 0x149   :  { %v444_v20 = vld [vmem:[#allocation3 + $0x18] ss:$2 sm:$0xff]  ;;  %v448_v22 = vld [vmem:[#allocation3 + $0x19] ss:$2 sm:$0xff]  ;;  %560 = vmatpush.msrb.mxu3 %v481_v36 }
 0x14a   :  { %v450_v23 = vmax.f32 %v444_v20, %v448_v22  ;;  %758 = vst [vmem:[#allocation3 + $0x20] sm:$0xff] %v2705_v0  ;;  %v2570_v59 = vpop.eup %2569 }
 0x14b   :  { %v454_v19 = vld [vmem:[#allocation3 + $0x30] ss:$2 sm:$0xff]  ;;  %v458_v26 = vld [vmem:[#allocation3 + $0x31] ss:$2 sm:$0xff]  ;;  %561 = vmatpush.msrb.mxu3 %v480_v46  ;;  %v666_v17 = vmul.f32 32.0, %v2570_v59  ;;  %vm670_vm4 = vweird.f32 %v2570_v59 }
 0x14c   :  { %452 = vst [vmem:[#allocation4 + $0x10] sm:$0xff] %v450_v23  ;;  %v461_v27 = vmax.f32 %v454_v19, %v458_v26 }
 0x14d   :  { %v456_v29 = vld [vmem:[#allocation3 + $0x40] ss:$2 sm:$0xff]  ;;  %v460_v30 = vld [vmem:[#allocation3 + $0x41] ss:$2 sm:$0xff]  ;;  %562 = vmatpush.msrb.mxu3 %v479_v50  ;;  %v667_v24 = vsub.f32 1.0, %v666_v17 }
 0x14e   :  { %v462_v31 = vmax.f32 %v456_v29, %v460_v30  ;;  %463 = vst [vmem:[#allocation4 + $0x20] sm:$0xff] %v461_v27  ;;  %v791_v17 = vld [vmem:[#allocation8 + $0x3a8] sm:$0xff] }
 0x14f   :  { %v442_v32 = vld [vmem:[#allocation3 + $0x8] ss:$2 sm:$0xff]  ;;  %v446_v33 = vld [vmem:[#allocation3 + $0x9] ss:$2 sm:$0xff]  ;;  %563 = vmatpush.msrb.mxu3 %v478_v51  ;;  %v668_v28 = vmul.f32 %v2570_v59, %v667_v24  ;;  %v801_v51 = vld [vmem:[#allocation8 + $0x3f8] sm:$0xff] }
 0x150   :  { %464 = vst [vmem:[#allocation4 + $0x28] sm:$0xff] %v462_v31  ;;  %v449_v34 = vmax.f32 %v442_v32, %v446_v33  ;;  %802 = vmatpush.msrb.mxu2 %v801_v51  ;;  %v873_v24 = vld [vmem:[#allocation8 + $0x440] sm:$0xff] }
 0x151   :  { %757 = vst [vmem:[#allocation3 + $0x10] sm:$0xff] %v2705_v0  ;;  %564 = vmatpush.msrb.mxu3 %v477_v56  ;;  %v669_v32 = vadd.f32 %v2570_v59, %v668_v28 }
 0x152   :  { %451 = vst [vmem:[#allocation4 + $0x8] sm:$0xff] %v449_v34  ;;  %531 = vmatmul.f32.vlgmr.msra.gmra.mxu3 %v449_v34 }
 0x153   :  { %v586_v52 = vld [vmem:[#allocation4 + $0x11] sm:$0xff]  ;;  %565 = vmatpush.msrb.mxu3 %v476_v57  ;;  %v671_v36 = vsel %vm670_vm4, %v2570_v59, %v669_v32 }
 0x154   :  { %v471_v55 = vld [vmem:[#allocation4 + $0x17] sm:$0xff] }
 0x155   :  { %v587_v38 = vld [vmem:[#allocation4 + $0x19] sm:$0xff] }
 0x156   :  { %v472_v42 = vld [vmem:[#allocation4 + $0x1f] sm:$0xff] }
 0x157   :  { %v588_v39 = vld [vmem:[#allocation4 + $0x21] sm:$0xff]  ;;  %v589_v45 = vld [vmem:[#allocation4 + $0x29] sm:$0xff]  ;;  %v876_v59 = vld [vmem:[#allocation8 + $0x458] sm:$0xff] }
 0x158   :  { %v473_v44 = vld [vmem:[#allocation4 + $0x27] sm:$0xff]  ;;  %v474_v47 = vld [vmem:[#allocation4 + $0x2f] sm:$0xff] }
 0x159   :  { %1225 = vst [vmem:[#allocation4 + $0x20] sm:$0xff] %v2705_v0  ;;  %v585_v48 = vld [vmem:[#allocation4 + $0x9] sm:$0xff] }
 0x15a   :  { %v469_v49 = vld [vmem:[#allocation4 + $0x7] sm:$0xff]  ;;  %1226 = vst [vmem:[#allocation4 + $0x28] sm:$0xff] %v2705_v0  ;;  %624 = vmatmul.f32.vlgmr.msrb.gmra.mxu0 %v585_v48  ;;  %534 = vmatmul.f32.gmra.mxu3 %v450_v23  ;;  %v470_v53 = vld [vmem:[#allocation4 + $0xf] sm:$0xff] }
 0x15b   :  { %1223 = vst [vmem:[#allocation4] sm:$0xff] %v2705_v0 }
 0x15c   :  { %1874 = vst [vmem:[#allocation4 + $0x2c] sm:$0xf] %v2705_v0 }
 0x15d   :  { %1224 = vst [vmem:[#allocation4 + $0x10] sm:$0xff] %v2705_v0 }
 0x162   :  { %627 = vmatmul.f32.gmra.mxu0 %v586_v52  ;;  %537 = vmatmul.f32.gmra.mxu3 %v2705_v0 }
 0x16a   :  { %630 = vmatmul.f32.gmra.mxu0 %v587_v38  ;;  %540 = vmatmul.f32.gmra.mxu3 %v461_v27 }
 0x172   :  { %633 = vmatmul.f32.gmra.mxu0 %v588_v39  ;;  %543 = vmatmul.f32.gmra.mxu3 %v462_v31 }
 0x17a   :  { %636 = vmatmul.f32.gmra.mxu0 %v589_v45  ;;  %546 = vmatmul.f32.gmra.mxu3 %v2705_v0 }
 0x182   :  { %566 = vmatmul.f32.vlgmr.msrb.gmra.mxu3 %v469_v49  ;;  %639 = vmatmul.f32.gmra.mxu0 %v590_v60  ;;  %v799_v60 = vld [vmem:[#allocation8 + $0x3e8] sm:$0xff] }
 0x18a   :  { %569 = vmatmul.f32.gmra.mxu3 %v470_v53 }
 0x192   :  { %572 = vmatmul.f32.gmra.mxu3 %v471_v55  ;;  %v800_v55 = vld [vmem:[#allocation8 + $0x3f0] sm:$0xff] }
 0x193   :  { %803 = vmatpush.msrb.mxu2 %v800_v55  ;;  %v699_v55 = vld [vmem:[#allocation10 + $0x3] sm:$0x1] }
 0x195   :  { %804 = vmatpush.msrb.mxu2 %v799_v60 }
 0x19a   :  { %575 = vmatmul.f32.gmra.mxu3 %v472_v42 }
 0x1a2   :  { %578 = vmatmul.f32.gmra.mxu3 %v473_v44 }
 0x1aa   :  { %581 = vmatmul.f32.gmra.mxu3 %v474_v47 }
 0x1d5   :  { %v532_v61 = vpop.f32.mrf.mxu3 }
 0x1d7   :  { %v625_v62 = vpop.f32.mrf.mxu0 }
 0x1dd   :  { %v535_v63 = vpop.f32.mrf.mxu3 }
 0x1df   :  { %v628_v1 = vpop.f32.mrf.mxu0 }
 0x1e5   :  { %v538_v2 = vpop.f32.mrf.mxu3 }
 0x1e7   :  { %v631_v4 = vpop.f32.mrf.mxu0 }
 0x1e8   :  { %v797_v4 = vld [vmem:[#allocation8 + $0x3d8] sm:$0xff] }
 0x1ed   :  { %v541_v5 = vpop.f32.mrf.mxu3 }
 0x1ef   :  { %v634_v6 = vpop.f32.mrf.mxu0 }
 0x1f5   :  { %v544_v21 = vpop.f32.mrf.mxu3 }
 0x1f7   :  { %v637_v8 = vpop.f32.mrf.mxu0 }
 0x1fd   :  { %v547_v7 = vpop.f32.mrf.mxu3 }
 0x1fe   :  { %v796_v7 = vld [vmem:[#allocation8 + $0x3d0] sm:$0xff] }
 0x1ff   :  { %v640_v9 = vpop.f32.mrf.mxu0 }
 0x205   :  { %v567_v0 = vpop.f32.mrf.mxu3 }
 0x206   :  { %v568_v11 = vadd.f32 %v567_v0, %v532_v61 }
 0x208   :  { %v2835_v13 = vadd.f32 %v625_v62, %v568_v11 }
 0x20d   :  { %v570_v41 = vpop.f32.mrf.mxu3 }
 0x20e   :  { %v571_v43 = vadd.f32 %v570_v41, %v535_v63  ;;  %v798_v63 = vld [vmem:[#allocation8 + $0x3e0] sm:$0xff]  ;;  %v795_v41 = vld [vmem:[#allocation8 + $0x3c8] sm:$0xff] }
 0x20f   :  { %805 = vmatpush.msrb.mxu2 %v798_v63 }
 0x210   :  { %v2833_v12 = vadd.f32 %v628_v1, %v571_v43 }
 0x211   :  { %806 = vmatpush.msrb.mxu2 %v797_v4 }
 0x212   :  { %v649_v14 = vadd.f32 %v2833_v12, %v2835_v13 }
 0x213   :  { %807 = vmatpush.msrb.mxu2 %v796_v7 }
 0x214   :  { %v650_v15 = vrot.slane %v649_v14, 4 }
 0x215   :  { %v573_v10 = vpop.f32.mrf.mxu3  ;;  %808 = vmatpush.msrb.mxu2 %v795_v41 }
 0x216   :  { %v651_v16 = vadd.f32 %v650_v15, %v649_v14  ;;  %v878_v10 = vld [vmem:[#allocation8 + $0x468] sm:$0xff]  ;;  %v877_v14 = vld [vmem:[#allocation8 + $0x460] sm:$0xff]  ;;  %v793_v15 = vld [vmem:[#allocation8 + $0x3b8] sm:$0xff] }
 0x218   :  { %v652_v22 = vrot.slane %v651_v16, 2 }
 0x21a   :  { %v653_v26 = vadd.f32 %v652_v22, %v651_v16  ;;  %v875_v16 = vld [vmem:[#allocation8 + $0x450] sm:$0xff]  ;;  %v874_v22 = vld [vmem:[#allocation8 + $0x448] sm:$0xff] }
 0x21c   :  { %v654_v30 = vrot.slane %v653_v26, 1 }
 0x21d   :  { %v576_v58 = vpop.f32.mrf.mxu3 }
 0x21e   :  { %v577_v3 = vadd.f32 %v576_v58, %v541_v5  ;;  %v655_v34 = vadd.f32 %v654_v30, %v653_v26  ;;  %v880_v5 = vld [vmem:[#allocation8 + $0x478] sm:$0xff]  ;;  %v794_v58 = vld [vmem:[#allocation8 + $0x3c0] sm:$0xff]  ;;  %v788_v26 = vld [vmem:[#allocation8 + $0x390] sm:$0xff] }
 0x21f   :  { %881 = vmatpush.msra.mxu3 %v880_v5  ;;  %809 = vmatpush.msrb.mxu2 %v794_v58  ;;  %v870_v30 = vld [vmem:[#allocation8 + $0x428] sm:$0xff]  ;;  %v767_v58 = vld [vmem:[#allocation8 + $0x310] sm:$0xff] }
 0x220   :  { %v2839_v18 = vadd.f32 %v634_v6, %v577_v3 }
 0x221   :  { %810 = vmatpush.msrb.mxu2 %v793_v15 }
 0x225   :  { %v579_v40 = vpop.f32.mrf.mxu3 }
 0x226   :  { %v580_v37 = vadd.f32 %v579_v40, %v544_v21  ;;  %v792_v40 = vld [vmem:[#allocation8 + $0x3b0] sm:$0xff] }
 0x227   :  { %811 = vmatpush.msrb.mxu2 %v792_v40 }
 0x228   :  { %v2841_v20 = vadd.f32 %v637_v8, %v580_v37  ;;  %v879_v8 = vld [vmem:[#allocation8 + $0x470] sm:$0xff] }
 0x229   :  { %882 = vmatpush.msra.mxu3 %v879_v8  ;;  %812 = vmatpush.msrb.mxu2 %v791_v17  ;;  %v765_v17 = vld [vmem:[#allocation8 + $0x300] sm:$0xff] }
 0x22a   :  { %v657_v23 = vadd.f32 %v2841_v20, %v2839_v18 }
 0x22b   :  { %883 = vmatpush.msra.mxu3 %v878_v10 }
 0x22c   :  { %v658_v25 = vrot.slane %v657_v23, 4 }
 0x22d   :  { %v582_v19 = vpop.f32.mrf.mxu3  ;;  %884 = vmatpush.msra.mxu3 %v877_v14 }
 0x22e   :  { %v659_v27 = vadd.f32 %v658_v25, %v657_v23  ;;  %v790_v23 = vld [vmem:[#allocation8 + $0x3a0] sm:$0xff]  ;;  %v789_v25 = vld [vmem:[#allocation8 + $0x398] sm:$0xff] }
 0x22f   :  { %885 = vmatpush.msra.mxu3 %v876_v59  ;;  %813 = vmatpush.msrb.mxu2 %v790_v23  ;;  %v872_v19 = vld [vmem:[#allocation8 + $0x438] sm:$0xff]  ;;  %v766_v59 = vld [vmem:[#allocation8 + $0x308] sm:$0xff] }
 0x230   :  { %v660_v29 = vrot.slane %v659_v27, 2 }
 0x231   :  { %886 = vmatpush.msra.mxu3 %v875_v16  ;;  %814 = vmatpush.msrb.mxu2 %v789_v25 }
 0x232   :  { %v661_v31 = vadd.f32 %v660_v29, %v659_v27  ;;  %v871_v27 = vld [vmem:[#allocation8 + $0x430] sm:$0xff] }
 0x233   :  { %887 = vmatpush.msra.mxu3 %v874_v22  ;;  %815 = vmatpush.msrb.mxu2 %v788_v26 }
 0x234   :  { %v662_v33 = vrot.slane %v661_v31, 1 }
 0x235   :  { %888 = vmatpush.msra.mxu3 %v873_v24 }
 0x236   :  { %v663_v35 = vadd.f32 %v662_v33, %v661_v31  ;;  %v787_v31 = vld [vmem:[#allocation8 + $0x388] sm:$0xff]  ;;  %v869_v33 = vld [vmem:[#allocation8 + $0x420] sm:$0xff] }
 0x237   :  { %889 = vmatpush.msra.mxu3 %v872_v19  ;;  %816 = vmatpush.msrb.mxu2 %v787_v31 }
 0x238   :  { %v664_v38 = vadd.f32 %v663_v35, %v655_v34  ;;  %v786_v34 = vld [vmem:[#allocation8 + $0x380] sm:$0xff]  ;;  %v868_v35 = vld [vmem:[#allocation8 + $0x418] sm:$0xff] }
 0x239   :  { %890 = vmatpush.msra.mxu3 %v871_v27  ;;  %817 = vmatpush.msrb.mxu2 %v786_v34  ;;  %v863_v27 = vld [vmem:[#allocation3 + $0x21] sm:$0xff] }
 0x23a   :  { %v2845_v39 = vmul.f32 %v671_v36, %v664_v38  ;;  %v867_v38 = vld [vmem:[#allocation8 + $0x410] sm:$0xff] }
 0x23b   :  { %891 = vmatpush.msra.mxu3 %v870_v30 }
 0x23c   :  { %v673_v42 = vsub.f32 %v2835_v13, %v2845_v39  ;;  %v674_v44 = vsub.f32 %v2833_v12, %v2845_v39  ;;  %v685_v45 = vsub.f32 %v2839_v18, %v2845_v39  ;;  %v686_v46 = vsub.f32 %v2841_v20, %v2845_v39 }
 0x23d   :  { %892 = vmatpush.msra.mxu3 %v869_v33 }
 0x23e   :  { %v675_v47 = vmul.f32 %v673_v42, %v673_v42  ;;  %v676_v48 = vmul.f32 %v674_v44, %v674_v44  ;;  %v687_v49 = vmul.f32 %v685_v45, %v685_v45  ;;  %v688_v50 = vmul.f32 %v686_v46, %v686_v46  ;;  %v780_v42 = vld [vmem:[#allocation8 + $0x378] sm:$0xff]  ;;  %v866_v45 = vld [vmem:[#allocation8 + $0x408] sm:$0xff]  ;;  %v779_v46 = vld [vmem:[#allocation8 + $0x370] sm:$0xff] }
 0x23f   :  { %893 = vmatpush.msra.mxu3 %v868_v35  ;;  %831 = vmatpush.msra.mxu2 %v780_v42 }
 0x240   :  { %v677_v52 = vadd.f32 %v676_v48, %v675_v47  ;;  %v689_v53 = vadd.f32 %v688_v50, %v687_v49  ;;  %v698_v47 = vld [vmem:[#allocation10 + $0x2] sm:$0x1]  ;;  %v778_v50 = vld [vmem:[#allocation8 + $0x368] sm:$0xff] }
 0x241   :  { %894 = vmatpush.msra.mxu3 %v867_v38  ;;  %832 = vmatpush.msra.mxu2 %v779_v46  ;;  %v865_v49 = vld [vmem:[#allocation8 + $0x400] sm:$0xff] }
 0x242   :  { %v678_v56 = vrot.slane %v677_v52, 4  ;;  %v690_v57 = vrot.slane %v689_v53, 4 }
 0x243   :  { %895 = vmatpush.msra.mxu3 %v866_v45  ;;  %833 = vmatpush.msra.mxu2 %v778_v50  ;;  %v2708_v45 = vmov 16.0  }
 0x244   :  { %v679_v61 = vadd.f32 %v678_v56, %v677_v52  ;;  %v691_v62 = vadd.f32 %v690_v57, %v689_v53  ;;  %v777_v52 = vld [vmem:[#allocation8 + $0x360] sm:$0xff]  ;;  %v776_v56 = vld [vmem:[#allocation8 + $0x358] sm:$0xff] }
 0x245   :  { %896 = vmatpush.msra.mxu3 %v865_v49  ;;  %834 = vmatpush.msra.mxu2 %v777_v52 }
 0x246   :  { %v680_v1 = vrot.slane %v679_v61, 2  ;;  %v692_v2 = vrot.slane %v691_v62, 2 }
 0x247   :  { %835 = vmatpush.msra.mxu2 %v776_v56 }
 0x248   :  { %v681_v21 = vadd.f32 %v680_v1, %v679_v61  ;;  %v693_v6 = vadd.f32 %v692_v2, %v691_v62  ;;  %v775_v62 = vld [vmem:[#allocation8 + $0x350] sm:$0xff] }
 0x249   :  { %836 = vmatpush.msra.mxu2 %v775_v62 }
 0x24a   :  { %v682_v0 = vrot.slane %v681_v21, 1  ;;  %v694_v9 = vrot.slane %v693_v6, 1 }
 0x24c   :  { %v683_v43 = vadd.f32 %v682_v0, %v681_v21  ;;  %v695_v11 = vadd.f32 %v694_v9, %v693_v6  ;;  %v774_v21 = vld [vmem:[#allocation8 + $0x348] sm:$0xff]  ;;  %v773_v0 = vld [vmem:[#allocation8 + $0x340] sm:$0xff]  ;;  %v772_v9 = vld [vmem:[#allocation8 + $0x338] sm:$0xff] }
 0x24d   :  { %837 = vmatpush.msra.mxu2 %v774_v21 }
 0x24e   :  { %v696_v54 = vadd.f32 %v695_v11, %v683_v43  ;;  %v768_v11 = vld [vmem:[#allocation8 + $0x318] sm:$0xff] }
 0x24f   :  { %838 = vmatpush.msra.mxu2 %v773_v0 }
 0x250   :  { %v697_v3 = vmul.f32 %v696_v54, %v671_v36 }
 0x251   :  { %839 = vmatpush.msra.mxu2 %v772_v9 }
 0x252   :  { %v700_v37 = vadd.f32 1e-05, %v697_v3  ;;  %v2862_v3 = vld [vmem:[#allocation3 + $0x58] sm:$0xff] }
 0x254   :  { %2571 = vrsqrt.f32 %v700_v37  ;;  %vm707_vm6 = vweird.f32 %v700_v37 }
 0x255   :  { %2573 = vrcp.f32 %v2708_v45 }
 0x25a   :  { %v2572_v28 = vpop.eup %2571 }
 0x25b   :  { %v702_v29 = vmul.f32 %v2572_v28, %v700_v37  ;;  %vm708_vm5 = vweird.f32 %v2572_v28 }
 0x25c   :  { %vm709_vm7 = vmor %vm707_vm6, %vm708_vm5 }
 0x25d   :  { %v703_v32 = vmul.f32 %v2572_v28, %v702_v29 }
 0x25f   :  { %v704_v36 = vmul.f32 0.5, %v703_v32 }
 0x261   :  { %v705_v44 = vsub.f32 1.5, %v704_v36 }
 0x263   :  { %v706_v48 = vmul.f32 %v2572_v28, %v705_v44 }
 0x265   :  { %v710_v51 = vsel %vm709_vm7, %v2572_v28, %v706_v48  ;;  %v2574_v48 = vpop.eup %2573 }
 0x266   :  { %v711_v53 = vmul.f32 %v710_v51, %v698_v47  ;;  %v929_v51 = vmul.f32 16.0, %v2574_v48  ;;  %vm933_vm8 = vweird.f32 %v2574_v48 }
 0x268   :  { %v712_v57 = vmul.f32 %v711_v53, %v2845_v39  ;;  %v714_v60 = vperm.slane %v711_v53, 0  ;;  %v930_v56 = vsub.f32 1.0, %v929_v51 }
 0x26a   :  { %v713_v61 = vsub.f32 %v699_v55, %v712_v57  ;;  %v715_v63 = vmul.f32 %v714_v60, %v2835_v13  ;;  %v716_v1 = vmul.f32 %v714_v60, %v2833_v12  ;;  %v718_v2 = vmul.f32 %v714_v60, %v2839_v18  ;;  %v771_v12 = vld [vmem:[#allocation8 + $0x330] sm:$0xff]  ;;  %v770_v18 = vld [vmem:[#allocation8 + $0x328] sm:$0xff] }
 0x26b   :  { %v719_v4 = vmul.f32 %v714_v60, %v2841_v20  ;;  %840 = vmatpush.msra.mxu2 %v771_v12  ;;  %v769_v20 = vld [vmem:[#allocation8 + $0x320] sm:$0xff]  ;;  %v931_v62 = vmul.f32 %v2574_v48, %v930_v56 }
 0x26c   :  { %v721_v5 = vperm.slane %v713_v61, 0  ;;  %v1006_v56 = vld [vmem:[#allocation8 + $0x4c0] sm:$0xff] }
 0x26d   :  { %841 = vmatpush.msra.mxu2 %v770_v18  ;;  %v1030_v18 = vld [vmem:[#allocation8 + $0x558] sm:$0xff] }
 0x26e   :  { %v722_v6 = vadd.f32 %v721_v5, %v715_v63  ;;  %v723_v7 = vadd.f32 %v721_v5, %v716_v1  ;;  %v725_v8 = vadd.f32 %v721_v5, %v718_v2  ;;  %v726_v39 = vadd.f32 %v721_v5, %v719_v4 }
 0x26f   :  { %842 = vmatpush.msra.mxu2 %v769_v20  ;;  %v932_v5 = vadd.f32 %v2574_v48, %v931_v62  ;;  %v1113_v20 = vld [vmem:[#allocation8 + $0x5f8] sm:$0xff] }
 0x270   :  { %v728_v41 = vmax.f32 %v722_v6, 0.0  ;;  %v729_v10 = vmax.f32 %v723_v7, 0.0  ;;  %v731_v13 = vmax.f32 %v725_v8, 0.0  ;;  %v732_v43 = vmax.f32 %v726_v39, 0.0  ;;  %v1034_v6 = vld [vmem:[#allocation8 + $0x578] sm:$0xff]  ;;  %v1033_v39 = vld [vmem:[#allocation8 + $0x570] sm:$0xff]  ;;  %1114 = vmatpush.msra.mxu0 %v1113_v20 }
 0x271   :  { %843 = vmatpush.msra.mxu2 %v768_v11  ;;  %1035 = vmatpush.msrb.mxu1 %v1034_v6  ;;  %v2889_v0 = vsel %vm933_vm8, %v2574_v48, %v932_v5  ;;  %v1013_v11 = vld [vmem:[#allocation8 + $0x4f8] sm:$0xff]  ;;  %v1107_v48 = vld [vmem:[#allocation8 + $0x5c8] sm:$0xff] }
 0x272   :  { %734 = vst [vmem:[#allocation2 + $0x8] sm:$0xff] %v728_v41  ;;  %v1032_v41 = vld [vmem:[#allocation8 + $0x568] sm:$0xff]  ;;  %v1022_v62 = vld [vmem:[#allocation8 + $0x518] sm:$0xff] }
 0x273   :  { %735 = vst [vmem:[#allocation2 + $0x10] sm:$0xff] %v729_v10  ;;  %844 = vmatpush.msra.mxu2 %v767_v58  ;;  %1036 = vmatpush.msrb.mxu1 %v1033_v39  ;;  %v1103_v6 = vld [vmem:[#allocation8 + $0x5a8] sm:$0xff]  ;;  %v1102_v39 = vld [vmem:[#allocation8 + $0x5a0] sm:$0xff] }
 0x274   :  { %737 = vst [vmem:[#allocation2 + $0x20] sm:$0xff] %v731_v13  ;;  %v1031_v13 = vld [vmem:[#allocation8 + $0x560] sm:$0xff]  ;;  %v999_v20 = vld [vmem:[#allocation8 + $0x488] sm:$0xff] }
 0x275   :  { %738 = vst [vmem:[#allocation2 + $0x28] sm:$0xff] %v732_v43  ;;  %845 = vmatpush.msra.mxu2 %v766_v59  ;;  %1037 = vmatpush.msrb.mxu1 %v1032_v41  ;;  %v1112_v59 = vld [vmem:[#allocation8 + $0x5f0] sm:$0xff]  ;;  %v1001_v41 = vld [vmem:[#allocation8 + $0x498] sm:$0xff] }
 0x276   :  { %1115 = vmatpush.msra.mxu0 %v1112_v59 }
 0x277   :  { %846 = vmatpush.msra.mxu2 %v765_v17  ;;  %1038 = vmatpush.msrb.mxu1 %v1031_v13  ;;  %v1100_v13 = vld [vmem:[#allocation8 + $0x590] sm:$0xff] }
 0x279   :  { %1039 = vmatpush.msrb.mxu1 %v1030_v18  ;;  %v1099_v18 = vld [vmem:[#allocation8 + $0x588] sm:$0xff] }
 0x27a   :  { %v745_v14 = vld [vmem:[#allocation2 + $0x8] ss:$2 sm:$0xff]  ;;  %v747_v54 = vld [vmem:[#allocation2 + $0x9] ss:$2 sm:$0xff] }
 0x27b   :  { %v2860_v15 = vmax.f32 %v745_v14, %v747_v54  ;;  %990 = vst [vmem:[#allocation2 + $0x10] sm:$0xff] %v2862_v3  ;;  %v1029_v54 = vld [vmem:[#allocation8 + $0x550] sm:$0xff] }
 0x27c   :  { %v751_v40 = vld [vmem:[#allocation2 + $0x20] ss:$2 sm:$0xff]  ;;  %v753_v16 = vld [vmem:[#allocation2 + $0x21] ss:$2 sm:$0xff]  ;;  %1040 = vmatpush.msrb.mxu1 %v1029_v54 }
 0x27d   :  { %992 = vst [vmem:[#allocation2 + $0x28] sm:$0xff] %v2862_v3  ;;  %818 = vmatmul.f32.vlgmr.msrb.gmra.mxu2 %v2860_v15  ;;  %v2867_v37 = vmax.f32 %v751_v40, %v753_v16  ;;  %v1012_v40 = vld [vmem:[#allocation8 + $0x4f0] sm:$0xff]  ;;  %v1098_v54 = vld [vmem:[#allocation8 + $0x580] sm:$0xff] }
 0x27e   :  { %1438 = vst [vmem:[#allocation2 + $0x2c] sm:$0xf] %v2862_v3  ;;  %1064 = vmatpush.msrb.mxu2 %v1013_v11 }
 0x27f   :  { %749 = vst [vmem:[#allocation3 + $0x8] sm:$0xff] %v2860_v15 }
 0x280   :  { %755 = vst [vmem:[#allocation3 + $0x18] sm:$0xff] %v2867_v37  ;;  %1065 = vmatpush.msrb.mxu2 %v1012_v40 }
 0x281   :  { %991 = vst [vmem:[#allocation2 + $0x20] sm:$0xff] %v2862_v3 }
 0x285   :  { %821 = vmatmul.f32.gmra.mxu2 %v2862_v3 }
 0x286   :  { %v860_v22 = vld [vmem:[#allocation3 + $0x9] sm:$0xff] }
 0x287   :  { %v760_v23 = vld [vmem:[#allocation3 + $0x7] sm:$0xff]  ;;  %897 = vmatmul.f32.vlgmr.msra.gmra.mxu3 %v860_v22  ;;  %v861_v24 = vld [vmem:[#allocation3 + $0x11] sm:$0xff]  ;;  %v763_v26 = vld [vmem:[#allocation3 + $0x1f] sm:$0xff] }
 0x288   :  { %2271 = vst [vmem:[#allocation3] sm:$0xff] %v2862_v3  ;;  %v761_v25 = vld [vmem:[#allocation3 + $0xf] sm:$0xff]  ;;  %v762_v19 = vld [vmem:[#allocation3 + $0x17] sm:$0xff] }
 0x289   :  { %1631 = vst [vmem:[#allocation3 + $0x14] sm:$0xf] %v2862_v3  ;;  %v862_v28 = vld [vmem:[#allocation3 + $0x19] sm:$0xff]  ;;  %v1028_v22 = vld [vmem:[#allocation8 + $0x548] sm:$0xff] }
 0x28a   :  { %1630 = vst [vmem:[#allocation3 + $0xc] sm:$0xff] %v2862_v3  ;;  %1041 = vmatpush.msrb.mxu1 %v1028_v22 }
 0x28b   :  { %1633 = vst [vmem:[#allocation3 + $0x24] sm:$0xff] %v2862_v3 }
 0x28c   :  { %1632 = vst [vmem:[#allocation3 + $0x1c] sm:$0xff] %v2862_v3 }
 0x28d   :  { %824 = vmatmul.f32.gmra.mxu2 %v2867_v37 }
 0x28f   :  { %900 = vmatmul.f32.gmra.mxu3 %v861_v24  ;;  %v1011_v24 = vld [vmem:[#allocation8 + $0x4e8] sm:$0xff] }
 0x290   :  { %1066 = vmatpush.msrb.mxu2 %v1011_v24 }
 0x295   :  { %827 = vmatmul.f32.gmra.mxu2 %v2862_v3 }
 0x297   :  { %903 = vmatmul.f32.gmra.mxu3 %v862_v28  ;;  %v1010_v28 = vld [vmem:[#allocation8 + $0x4e0] sm:$0xff] }
 0x298   :  { %1067 = vmatpush.msrb.mxu2 %v1010_v28 }
 0x29d   :  { %847 = vmatmul.f32.vlgmr.msra.gmra.mxu2 %v760_v23  ;;  %v1111_v23 = vld [vmem:[#allocation8 + $0x5e8] sm:$0xff] }
 0x29e   :  { %1116 = vmatpush.msra.mxu0 %v1111_v23 }
 0x29f   :  { %906 = vmatmul.f32.gmra.mxu3 %v863_v27  ;;  %v1110_v27 = vld [vmem:[#allocation8 + $0x5e0] sm:$0xff] }
 0x2a0   :  { %1117 = vmatpush.msra.mxu0 %v1110_v27 }
 0x2a5   :  { %850 = vmatmul.f32.gmra.mxu2 %v761_v25 }
 0x2ad   :  { %853 = vmatmul.f32.gmra.mxu2 %v762_v19 }
 0x2b5   :  { %856 = vmatmul.f32.gmra.mxu2 %v763_v26  ;;  %v1027_v26 = vld [vmem:[#allocation8 + $0x540] sm:$0xff] }
 0x2b6   :  { %1042 = vmatpush.msrb.mxu1 %v1027_v26 }
 0x300   :  { %v819_v29 = vpop.f32.mrf.mxu2 }
 0x308   :  { %v822_v30 = vpop.f32.mrf.mxu2 }
 0x30a   :  { %v898_v31 = vpop.f32.mrf.mxu3 }
 0x310   :  { %v825_v32 = vpop.f32.mrf.mxu2 }
 0x312   :  { %v901_v33 = vpop.f32.mrf.mxu3 }
 0x313   :  { %v1009_v33 = vld [vmem:[#allocation8 + $0x4d8] sm:$0xff] }
 0x314   :  { %1068 = vmatpush.msrb.mxu2 %v1009_v33 }
 0x318   :  { %v828_v34 = vpop.f32.mrf.mxu2 }
 0x31a   :  { %v904_v35 = vpop.f32.mrf.mxu3 }
 0x320   :  { %v848_v36 = vpop.f32.mrf.mxu2 }
 0x321   :  { %v849_v42 = vadd.f32 %v848_v36, %v819_v29  ;;  %v1025_v36 = vld [vmem:[#allocation8 + $0x530] sm:$0xff] }
 0x322   :  { %v907_v38 = vpop.f32.mrf.mxu3 }
 0x323   :  { %v2881_v44 = vadd.f32 %v898_v31, %v849_v42  ;;  %v1026_v31 = vld [vmem:[#allocation8 + $0x538] sm:$0xff]  ;;  %v1108_v38 = vld [vmem:[#allocation8 + $0x5d0] sm:$0xff] }
 0x324   :  { %1043 = vmatpush.msrb.mxu1 %v1026_v31  ;;  %v1008_v42 = vld [vmem:[#allocation8 + $0x4d0] sm:$0xff] }
 0x325   :  { %v914_v47 = vrot.slane %v2881_v44, 4  ;;  %1069 = vmatpush.msrb.mxu2 %v1008_v42 }
 0x326   :  { %1044 = vmatpush.msrb.mxu1 %v1025_v36 }
 0x327   :  { %v915_v49 = vadd.f32 %v914_v47, %v2881_v44  ;;  %v1024_v47 = vld [vmem:[#allocation8 + $0x528] sm:$0xff] }
 0x328   :  { %v851_v46 = vpop.f32.mrf.mxu2  ;;  %1045 = vmatpush.msrb.mxu1 %v1024_v47 }
 0x329   :  { %v916_v53 = vrot.slane %v915_v49, 2 }
 0x32b   :  { %v917_v60 = vadd.f32 %v916_v53, %v915_v49  ;;  %v1007_v49 = vld [vmem:[#allocation8 + $0x4c8] sm:$0xff]  ;;  %v1106_v53 = vld [vmem:[#allocation8 + $0x5c0] sm:$0xff] }
 0x32c   :  { %1070 = vmatpush.msrb.mxu2 %v1007_v49 }
 0x32d   :  { %v918_v2 = vrot.slane %v917_v60, 1 }
 0x32e   :  { %1071 = vmatpush.msrb.mxu2 %v1006_v56 }
 0x32f   :  { %v919_v7 = vadd.f32 %v918_v2, %v917_v60  ;;  %v1005_v60 = vld [vmem:[#allocation8 + $0x4b8] sm:$0xff]  ;;  %v1104_v2 = vld [vmem:[#allocation8 + $0x5b0] sm:$0xff] }
 0x330   :  { %v854_v50 = vpop.f32.mrf.mxu2  ;;  %1072 = vmatpush.msrb.mxu2 %v1005_v60 }
 0x331   :  { %v855_v52 = vadd.f32 %v854_v50, %v825_v32  ;;  %v1109_v32 = vld [vmem:[#allocation8 + $0x5d8] sm:$0xff] }
 0x332   :  { %1118 = vmatpush.msra.mxu0 %v1109_v32 }
 0x333   :  { %v2885_v55 = vadd.f32 %v904_v35, %v855_v52  ;;  %v1023_v52 = vld [vmem:[#allocation8 + $0x520] sm:$0xff] }
 0x334   :  { %1119 = vmatpush.msra.mxu0 %v1108_v38  ;;  %1046 = vmatpush.msrb.mxu1 %v1023_v52 }
 0x335   :  { %v921_v57 = vrot.slane %v2885_v55, 4 }
 0x336   :  { %1120 = vmatpush.msra.mxu0 %v1107_v48  ;;  %1047 = vmatpush.msrb.mxu1 %v1022_v62 }
 0x337   :  { %v922_v61 = vadd.f32 %v921_v57, %v2885_v55 }
 0x338   :  { %v857_v63 = vpop.f32.mrf.mxu2  ;;  %1121 = vmatpush.msra.mxu0 %v1106_v53 }
 0x339   :  { %v923_v1 = vrot.slane %v922_v61, 2 }
 0x33b   :  { %v924_v4 = vadd.f32 %v923_v1, %v922_v61  ;;  %v1105_v61 = vld [vmem:[#allocation8 + $0x5b8] sm:$0xff]  ;;  %v1004_v1 = vld [vmem:[#allocation8 + $0x4b0] sm:$0xff] }
 0x33c   :  { %1122 = vmatpush.msra.mxu0 %v1105_v61  ;;  %1073 = vmatpush.msrb.mxu2 %v1004_v1 }
 0x33d   :  { %v925_v21 = vrot.slane %v924_v4, 1 }
 0x33e   :  { %1123 = vmatpush.msra.mxu0 %v1104_v2 }
 0x33f   :  { %v926_v8 = vadd.f32 %v925_v21, %v924_v4  ;;  %v1021_v4 = vld [vmem:[#allocation8 + $0x510] sm:$0xff]  ;;  %v1003_v21 = vld [vmem:[#allocation8 + $0x4a8] sm:$0xff] }
 0x340   :  { %1048 = vmatpush.msrb.mxu1 %v1021_v4  ;;  %1124 = vmatpush.msra.mxu0 %v1103_v6 }
 0x341   :  { %v927_v9 = vadd.f32 %v926_v8, %v919_v7  ;;  %v1020_v7 = vld [vmem:[#allocation8 + $0x508] sm:$0xff]  ;;  %v1002_v8 = vld [vmem:[#allocation8 + $0x4a0] sm:$0xff]  ;;  %1074 = vmatpush.msrb.mxu2 %v1003_v21 }
 0x342   :  { %1049 = vmatpush.msrb.mxu1 %v1020_v7  ;;  %1125 = vmatpush.msra.mxu0 %v1102_v39  ;;  %v1268_v7 = vld [vmem:[#allocation8 + $0x6f8] sm:$0xff] }
 0x343   :  { %v2892_v10 = vmul.f32 %v2889_v0, %v927_v9  ;;  %v1101_v9 = vld [vmem:[#allocation8 + $0x598] sm:$0xff]  ;;  %1075 = vmatpush.msrb.mxu2 %v1002_v8  ;;  %1269 = vmatpush.msrb.mxu3 %v1268_v7 }
 0x344   :  { %1126 = vmatpush.msra.mxu0 %v1101_v9  ;;  %v1247_v39 = vld [vmem:[#allocation8 + $0x678] sm:$0xff] }
 0x345   :  { %v936_v43 = vsub.f32 %v2881_v44, %v2892_v10  ;;  %v945_v12 = vsub.f32 %v2885_v55, %v2892_v10  ;;  %1076 = vmatpush.msrb.mxu2 %v1001_v41  ;;  %v1267_v41 = vld [vmem:[#allocation8 + $0x6f0] sm:$0xff] }
 0x346   :  { %1127 = vmatpush.msra.mxu0 %v1100_v13  ;;  %v1246_v13 = vld [vmem:[#allocation8 + $0x670] sm:$0xff]  ;;  %1270 = vmatpush.msrb.mxu3 %v1267_v41  ;;  %v1329_v41 = vld [vmem:[#allocation8 + $0x748] sm:$0xff] }
 0x347   :  { %v937_v58 = vmul.f32 %v936_v43, %v936_v43  ;;  %v946_v14 = vmul.f32 %v945_v12, %v945_v12  ;;  %v1019_v43 = vld [vmem:[#allocation8 + $0x500] sm:$0xff]  ;;  %v1000_v12 = vld [vmem:[#allocation8 + $0x490] sm:$0xff] }
 0x348   :  { %1050 = vmatpush.msrb.mxu1 %v1019_v43  ;;  %1077 = vmatpush.msrb.mxu2 %v1000_v12 }
 0x349   :  { %v938_v16 = vrot.slane %v937_v58, 4  ;;  %v947_v17 = vrot.slane %v946_v14, 4  ;;  %1128 = vmatpush.msra.mxu0 %v1099_v18  ;;  %v1266_v18 = vld [vmem:[#allocation8 + $0x6e8] sm:$0xff] }
 0x34a   :  { %1078 = vmatpush.msrb.mxu2 %v999_v20  ;;  %1292 = vmatpush.msra.mxu1 %v1247_v39  ;;  %v1245_v20 = vld [vmem:[#allocation8 + $0x668] sm:$0xff]  ;;  %v1255_v39 = vld [vmem:[#allocation8 + $0x690] sm:$0xff] }
 0x34b   :  { %v939_v25 = vadd.f32 %v938_v16, %v937_v58  ;;  %v948_v19 = vadd.f32 %v947_v17, %v946_v14  ;;  %v998_v14 = vld [vmem:[#allocation8 + $0x480] sm:$0xff]  ;;  %1129 = vmatpush.msra.mxu0 %v1098_v54  ;;  %1271 = vmatpush.msrb.mxu3 %v1266_v18  ;;  %v1254_v18 = vld [vmem:[#allocation8 + $0x688] sm:$0xff] }
 0x34c   :  { %1079 = vmatpush.msrb.mxu2 %v998_v14  ;;  %v955_v17 = vld [vmem:[#allocation10 + $0x4] sm:$0x1]  ;;  %1293 = vmatpush.msra.mxu1 %v1246_v13  ;;  %v1470_v13 = vld [vmem:[#allocation8 + $0x9c8] sm:$0xff] }
 0x34d   :  { %v940_v29 = vrot.slane %v939_v25, 2  ;;  %v949_v30 = vrot.slane %v948_v19, 2  ;;  %v1244_v14 = vld [vmem:[#allocation8 + $0x660] sm:$0xff] }
 0x34e   :  { %1294 = vmatpush.msra.mxu1 %v1245_v20  ;;  %v1233_v20 = vld [vmem:[#allocation8 + $0x608] sm:$0xff] }
 0x34f   :  { %v941_v34 = vadd.f32 %v940_v29, %v939_v25  ;;  %v950_v35 = vadd.f32 %v949_v30, %v948_v19  ;;  %v956_v25 = vld [vmem:[#allocation10 + $0x5] sm:$0x1] }
 0x350   :  { %1295 = vmatpush.msra.mxu1 %v1244_v14 }
 0x351   :  { %v942_v45 = vrot.slane %v941_v34, 1  ;;  %v951_v46 = vrot.slane %v950_v35, 1 }
 0x353   :  { %v943_v50 = vadd.f32 %v942_v45, %v941_v34  ;;  %v952_v51 = vadd.f32 %v951_v46, %v950_v35  ;;  %v1096_v45 = vld [vmem:[#allocation2 + $0x21] sm:$0xff] }
 0x355   :  { %v953_v57 = vadd.f32 %v952_v51, %v943_v50 }
 0x357   :  { %v954_v63 = vmul.f32 %v953_v57, %v2889_v0 }
 0x359   :  { %v957_v5 = vadd.f32 1e-05, %v954_v63 }
 0x35b   :  { %2575 = vrsqrt.f32 %v957_v5  ;;  %vm964_vm10 = vweird.f32 %v957_v5 }
 0x361   :  { %v2576_v11 = vpop.eup %2575 }
 0x362   :  { %v959_v58 = vmul.f32 %v2576_v11, %v957_v5  ;;  %vm965_vm9 = vweird.f32 %v2576_v11 }
 0x363   :  { %vm966_vm11 = vmor %vm964_vm10, %vm965_vm9  ;;  %vm2003_vm10 = vcmask 1041408  }
 0x364   :  { %v960_v59 = vmul.f32 %v2576_v11, %v959_v58  ;;  %v1265_v58 = vld [vmem:[#allocation8 + $0x6e0] sm:$0xff] }
 0x365   :  { %1272 = vmatpush.msrb.mxu3 %v1265_v58  ;;  %v1469_v58 = vld [vmem:[#allocation8 + $0x9c0] sm:$0xff] }
 0x366   :  { %v961_v40 = vmul.f32 0.5, %v960_v59 }
 0x368   :  { %v962_v16 = vsub.f32 1.5, %v961_v40  ;;  %v1264_v40 = vld [vmem:[#allocation8 + $0x6d8] sm:$0xff] }
 0x369   :  { %1273 = vmatpush.msrb.mxu3 %v1264_v40  ;;  %v1327_v40 = vld [vmem:[#allocation8 + $0x738] sm:$0xff] }
 0x36a   :  { %v963_v22 = vmul.f32 %v2576_v11, %v962_v16  ;;  %v1243_v16 = vld [vmem:[#allocation8 + $0x658] sm:$0xff] }
 0x36b   :  { %1296 = vmatpush.msra.mxu1 %v1243_v16  ;;  %v1468_v16 = vld [vmem:[#allocation8 + $0x9b8] sm:$0xff] }
 0x36c   :  { %v967_v23 = vsel %vm966_vm11, %v2576_v11, %v963_v22  ;;  %v1263_v22 = vld [vmem:[#allocation8 + $0x6d0] sm:$0xff] }
 0x36d   :  { %v968_v24 = vmul.f32 %v967_v23, %v955_v17  ;;  %v1242_v23 = vld [vmem:[#allocation8 + $0x650] sm:$0xff]  ;;  %1274 = vmatpush.msrb.mxu3 %v1263_v22 }
 0x36e   :  { %1297 = vmatpush.msra.mxu1 %v1242_v23  ;;  %v1541_v23 = vld [vmem:[#allocation8 + $0xa78] sm:$0xff] }
 0x36f   :  { %v969_v19 = vmul.f32 %v968_v24, %v2892_v10  ;;  %v971_v26 = vperm.slane %v968_v24, 0 }
 0x371   :  { %v970_v27 = vsub.f32 %v956_v25, %v969_v19  ;;  %v972_v28 = vmul.f32 %v971_v26, %v2881_v44  ;;  %v974_v29 = vmul.f32 %v971_v26, %v2885_v55  ;;  %v1262_v25 = vld [vmem:[#allocation8 + $0x6c8] sm:$0xff] }
 0x372   :  { %v1241_v19 = vld [vmem:[#allocation8 + $0x648] sm:$0xff]  ;;  %1275 = vmatpush.msrb.mxu3 %v1262_v25  ;;  %v1326_v25 = vld [vmem:[#allocation8 + $0x730] sm:$0xff] }
 0x373   :  { %v976_v30 = vperm.slane %v970_v27, 0  ;;  %1298 = vmatpush.msra.mxu1 %v1241_v19  ;;  %v1467_v19 = vld [vmem:[#allocation8 + $0x9b0] sm:$0xff] }
 0x375   :  { %v977_v31 = vadd.f32 %v976_v30, %v972_v28  ;;  %v979_v32 = vadd.f32 %v976_v30, %v974_v29  ;;  %v1261_v28 = vld [vmem:[#allocation8 + $0x6c0] sm:$0xff]  ;;  %v1335_v30 = vld [vmem:[#allocation8 + $0x778] sm:$0xff] }
 0x376   :  { %v1240_v29 = vld [vmem:[#allocation8 + $0x640] sm:$0xff]  ;;  %1276 = vmatpush.msrb.mxu3 %v1261_v28  ;;  %1336 = vmatpush.msra.mxu2 %v1335_v30  ;;  %v1540_v28 = vld [vmem:[#allocation8 + $0xa70] sm:$0xff]  ;;  %v1466_v30 = vld [vmem:[#allocation8 + $0x9a8] sm:$0xff] }
 0x377   :  { %v981_v33 = vmax.f32 %v977_v31, 0.0  ;;  %v983_v34 = vmax.f32 %v979_v32, 0.0  ;;  %v1476_v31 = vld [vmem:[#allocation8 + $0x9f8] sm:$0xff]  ;;  %1299 = vmatpush.msra.mxu1 %v1240_v29  ;;  %v1325_v29 = vld [vmem:[#allocation8 + $0x728] sm:$0xff] }
 0x378   :  { %1477 = vmatpush.msrb.mxu0 %v1476_v31  ;;  %v1455_v31 = vld [vmem:[#allocation8 + $0x968] sm:$0xff] }
 0x379   :  { %987 = vst [vmem:[#allocation2 + $0x18] sm:$0xff] %v983_v34  ;;  %1051 = vmatmul.f32.vlgmr.msrb.gmra.mxu1 %v981_v33 }
 0x37a   :  { %985 = vst [vmem:[#allocation2 + $0x8] sm:$0xff] %v981_v33 }
 0x380   :  { %v1094_v44 = vld [vmem:[#allocation2 + $0x11] sm:$0xff]  ;;  %v1095_v38 = vld [vmem:[#allocation2 + $0x19] sm:$0xff] }
 0x381   :  { %v993_v35 = vld [vmem:[#allocation2 + $0x7] sm:$0xff]  ;;  %1054 = vmatmul.f32.gmra.mxu1 %v2862_v3  ;;  %v994_v10 = vld [vmem:[#allocation2 + $0xf] sm:$0xff]  ;;  %v995_v55 = vld [vmem:[#allocation2 + $0x17] sm:$0xff] }
 0x382   :  { %v1093_v36 = vld [vmem:[#allocation2 + $0x9] sm:$0xff]  ;;  %1080 = vmatmul.f32.vlgmr.msrb.gmra.mxu2 %v993_v35  ;;  %1433 = vst [vmem:[#allocation2] sm:$0xff] %v2862_v3  ;;  %v996_v42 = vld [vmem:[#allocation2 + $0x1f] sm:$0xff] }
 0x383   :  { %1130 = vmatmul.f32.vlgmr.msra.gmra.mxu0 %v1093_v36  ;;  %1434 = vst [vmem:[#allocation2 + $0xc] sm:$0xff] %v2862_v3  ;;  %v1239_v35 = vld [vmem:[#allocation8 + $0x638] sm:$0xff]  ;;  %v1334_v36 = vld [vmem:[#allocation8 + $0x770] sm:$0xff] }
 0x384   :  { %1435 = vst [vmem:[#allocation2 + $0x14] sm:$0xf] %v2862_v3  ;;  %1300 = vmatpush.msra.mxu1 %v1239_v35  ;;  %1337 = vmatpush.msra.mxu2 %v1334_v36  ;;  %v1538_v35 = vld [vmem:[#allocation8 + $0xa60] sm:$0xff]  ;;  %v1323_v36 = vld [vmem:[#allocation8 + $0x718] sm:$0xff] }
 0x385   :  { %1436 = vst [vmem:[#allocation2 + $0x1c] sm:$0xff] %v2862_v3 }
 0x386   :  { %1437 = vst [vmem:[#allocation2 + $0x24] sm:$0xff] %v2862_v3 }
 0x387   :  { %2080 = vst [vmem:[#allocation2 + $0x2a] sm:$0x3f] %v2862_v3 }
 0x389   :  { %1057 = vmatmul.f32.gmra.mxu1 %v983_v34  ;;  %v1260_v34 = vld [vmem:[#allocation8 + $0x6b8] sm:$0xff] }
 0x38a   :  { %1083 = vmatmul.f32.gmra.mxu2 %v994_v10  ;;  %1277 = vmatpush.msrb.mxu3 %v1260_v34  ;;  %v1475_v10 = vld [vmem:[#allocation8 + $0x9f0] sm:$0xff]  ;;  %v1454_v34 = vld [vmem:[#allocation8 + $0x960] sm:$0xff] }
 0x38b   :  { %1133 = vmatmul.f32.gmra.mxu0 %v1094_v44 }
 0x38c   :  { %1478 = vmatpush.msrb.mxu0 %v1475_v10  ;;  %v1464_v10 = vld [vmem:[#allocation8 + $0x998] sm:$0xff] }
 0x391   :  { %1060 = vmatmul.f32.gmra.mxu1 %v2862_v3 }
 0x392   :  { %1086 = vmatmul.f32.gmra.mxu2 %v995_v55 }
 0x393   :  { %1136 = vmatmul.f32.gmra.mxu0 %v1095_v38  ;;  %v1259_v38 = vld [vmem:[#allocation8 + $0x6b0] sm:$0xff] }
 0x394   :  { %1278 = vmatpush.msrb.mxu3 %v1259_v38  ;;  %v1322_v38 = vld [vmem:[#allocation8 + $0x710] sm:$0xff] }
 0x39a   :  { %1089 = vmatmul.f32.gmra.mxu2 %v996_v42  ;;  %v1238_v42 = vld [vmem:[#allocation8 + $0x630] sm:$0xff] }
 0x39b   :  { %1139 = vmatmul.f32.gmra.mxu0 %v1096_v45  ;;  %v1333_v45 = vld [vmem:[#allocation8 + $0x768] sm:$0xff]  ;;  %1301 = vmatpush.msra.mxu1 %v1238_v42  ;;  %v1463_v42 = vld [vmem:[#allocation8 + $0x990] sm:$0xff] }
 0x39c   :  { %1338 = vmatpush.msra.mxu2 %v1333_v45  ;;  %v1452_v45 = vld [vmem:[#allocation8 + $0x950] sm:$0xff] }
 0x3f6   :  { %v1052_v46 = vpop.f32.mrf.mxu1 }
 0x3fe   :  { %v1055_v47 = vpop.f32.mrf.mxu1 }
 0x400   :  { %v1131_v48 = vpop.f32.mrf.mxu0 }
 0x405   :  { %v1081_v49 = vpop.f32.mrf.mxu2 }
 0x406   :  { %v1058_v50 = vpop.f32.mrf.mxu1  ;;  %v1082_v52 = vadd.f32 %v1081_v49, %v1052_v46  ;;  %v1474_v46 = vld [vmem:[#allocation8 + $0x9e8] sm:$0xff] }
 0x407   :  { %v1258_v49 = vld [vmem:[#allocation8 + $0x6a8] sm:$0xff]  ;;  %1479 = vmatpush.msrb.mxu0 %v1474_v46  ;;  %v1536_v46 = vld [vmem:[#allocation8 + $0xa50] sm:$0xff] }
 0x408   :  { %v1134_v51 = vpop.f32.mrf.mxu0  ;;  %v2910_v53 = vadd.f32 %v1131_v48, %v1082_v52  ;;  %1279 = vmatpush.msrb.mxu3 %v1258_v49  ;;  %v1473_v52 = vld [vmem:[#allocation8 + $0x9e0] sm:$0xff]  ;;  %v1462_v49 = vld [vmem:[#allocation8 + $0x988] sm:$0xff] }
 0x409   :  { %v1332_v51 = vld [vmem:[#allocation8 + $0x760] sm:$0xff]  ;;  %1480 = vmatpush.msrb.mxu0 %v1473_v52  ;;  %v1535_v52 = vld [vmem:[#allocation8 + $0xa48] sm:$0xff] }
 0x40a   :  { %v1147_v61 = vrot.slane %v2910_v53, 4  ;;  %1339 = vmatpush.msra.mxu2 %v1332_v51 }
 0x40c   :  { %v1148_v3 = vadd.f32 %v1147_v61, %v2910_v53  ;;  %v1236_v61 = vld [vmem:[#allocation8 + $0x620] sm:$0xff] }
 0x40d   :  { %v1084_v56 = vpop.f32.mrf.mxu2 }
 0x40e   :  { %v1061_v57 = vpop.f32.mrf.mxu1  ;;  %v1149_v2 = vrot.slane %v1148_v3, 2 }
 0x410   :  { %v1137_v60 = vpop.f32.mrf.mxu0  ;;  %v1150_v21 = vadd.f32 %v1149_v2, %v1148_v3  ;;  %v1331_v3 = vld [vmem:[#allocation8 + $0x758] sm:$0xff] }
 0x411   :  { %1340 = vmatpush.msra.mxu2 %v1331_v3  ;;  %v1256_v2 = vld [vmem:[#allocation8 + $0x698] sm:$0xff]  ;;  %v1534_v3 = vld [vmem:[#allocation8 + $0xa40] sm:$0xff] }
 0x412   :  { %v1151_v43 = vrot.slane %v1150_v21, 1 }
 0x414   :  { %v1152_v54 = vadd.f32 %v1151_v43, %v1150_v21  ;;  %v1330_v21 = vld [vmem:[#allocation8 + $0x750] sm:$0xff] }
 0x415   :  { %v1087_v62 = vpop.f32.mrf.mxu2  ;;  %1341 = vmatpush.msra.mxu2 %v1330_v21  ;;  %v1532_v21 = vld [vmem:[#allocation8 + $0xa30] sm:$0xff] }
 0x416   :  { %v1088_v63 = vadd.f32 %v1087_v62, %v1058_v50  ;;  %v1237_v50 = vld [vmem:[#allocation8 + $0x628] sm:$0xff]  ;;  %v1472_v62 = vld [vmem:[#allocation8 + $0x9d8] sm:$0xff] }
 0x417   :  { %1302 = vmatpush.msra.mxu1 %v1237_v50  ;;  %1481 = vmatpush.msrb.mxu0 %v1472_v62  ;;  %v1451_v50 = vld [vmem:[#allocation8 + $0x948] sm:$0xff]  ;;  %v1449_v62 = vld [vmem:[#allocation8 + $0x938] sm:$0xff] }
 0x418   :  { %v1140_v1 = vpop.f32.mrf.mxu0  ;;  %v2914_v4 = vadd.f32 %v1137_v60, %v1088_v63  ;;  %v1257_v60 = vld [vmem:[#allocation8 + $0x6a0] sm:$0xff]  ;;  %1342 = vmatpush.msra.mxu2 %v1329_v41 }
 0x419   :  { %1280 = vmatpush.msrb.mxu3 %v1257_v60  ;;  %1303 = vmatpush.msra.mxu1 %v1236_v61  ;;  %v1450_v60 = vld [vmem:[#allocation8 + $0x940] sm:$0xff] }
 0x41a   :  { %v1154_v5 = vrot.slane %v2914_v4, 4 }
 0x41b   :  { %1281 = vmatpush.msrb.mxu3 %v1256_v2  ;;  %v1448_v2 = vld [vmem:[#allocation8 + $0x930] sm:$0xff] }
 0x41c   :  { %v1155_v6 = vadd.f32 %v1154_v5, %v2914_v4  ;;  %v1235_v5 = vld [vmem:[#allocation8 + $0x618] sm:$0xff] }
 0x41d   :  { %v1090_v8 = vpop.f32.mrf.mxu2  ;;  %1304 = vmatpush.msra.mxu1 %v1235_v5  ;;  %1282 = vmatpush.msrb.mxu3 %v1255_v39  ;;  %v1531_v39 = vld [vmem:[#allocation8 + $0xa28] sm:$0xff] }
 0x41e   :  { %v1156_v9 = vrot.slane %v1155_v6, 2 }
 0x41f   :  { %1283 = vmatpush.msrb.mxu3 %v1254_v18  ;;  %v1182_v18 = vld [vmem:[#allocation10 + $0x5] sm:$0x1] }
 0x420   :  { %v1157_v12 = vadd.f32 %v1156_v9, %v1155_v6  ;;  %v1471_v6 = vld [vmem:[#allocation8 + $0x9d0] sm:$0xff] }
 0x421   :  { %v1234_v9 = vld [vmem:[#allocation8 + $0x610] sm:$0xff]  ;;  %1482 = vmatpush.msrb.mxu0 %v1471_v6  ;;  %v1447_v6 = vld [vmem:[#allocation8 + $0x928] sm:$0xff] }
 0x422   :  { %v1158_v11 = vrot.slane %v1157_v12, 1  ;;  %1305 = vmatpush.msra.mxu1 %v1234_v9  ;;  %v1446_v9 = vld [vmem:[#allocation8 + $0x920] sm:$0xff] }
 0x423   :  { %1483 = vmatpush.msrb.mxu0 %v1470_v13  ;;  %v1530_v13 = vld [vmem:[#allocation8 + $0xa20] sm:$0xff] }
 0x424   :  { %v1159_v59 = vadd.f32 %v1158_v11, %v1157_v12  ;;  %v1328_v11 = vld [vmem:[#allocation8 + $0x740] sm:$0xff]  ;;  %1306 = vmatpush.msra.mxu1 %v1233_v20  ;;  %v1529_v20 = vld [vmem:[#allocation8 + $0xa18] sm:$0xff] }
 0x425   :  { %1343 = vmatpush.msra.mxu2 %v1328_v11  ;;  %1484 = vmatpush.msrb.mxu0 %v1469_v58 }
 0x426   :  { %v1160_v17 = vadd.f32 %v1159_v59, %v1152_v54  ;;  %v1253_v54 = vld [vmem:[#allocation8 + $0x680] sm:$0xff] }
 0x427   :  { %v1232_v59 = vld [vmem:[#allocation8 + $0x600] sm:$0xff]  ;;  %1284 = vmatpush.msrb.mxu3 %v1253_v54  ;;  %1344 = vmatpush.msra.mxu2 %v1327_v40  ;;  %v1528_v54 = vld [vmem:[#allocation8 + $0xa10] sm:$0xff]  ;;  %v1443_v40 = vld [vmem:[#allocation8 + $0x908] sm:$0xff] }
 0x428   :  { %v2919_v24 = vmul.f32 %v1160_v17, %v2889_v0  ;;  %v1457_v17 = vld [vmem:[#allocation8 + $0x978] sm:$0xff]  ;;  %1307 = vmatpush.msra.mxu1 %v1232_v59  ;;  %1485 = vmatpush.msrb.mxu0 %v1468_v16  ;;  %v1527_v16 = vld [vmem:[#allocation8 + $0xa08] sm:$0xff] }
 0x429   :  { %1500 = vmatpush.msra.mxu3 %v1457_v17  ;;  %1345 = vmatpush.msra.mxu2 %v1326_v25  ;;  %v1442_v25 = vld [vmem:[#allocation8 + $0x900] sm:$0xff] }
 0x42a   :  { %v1162_v26 = vsub.f32 %v2910_v53, %v2919_v24  ;;  %v1171_v27 = vsub.f32 %v2914_v4, %v2919_v24  ;;  %1542 = vmatpush.msrb.mxu1 %v1541_v23  ;;  %1486 = vmatpush.msrb.mxu0 %v1467_v19  ;;  %v1526_v19 = vld [vmem:[#allocation8 + $0xa00] sm:$0xff] }
 0x42b   :  { %1346 = vmatpush.msra.mxu2 %v1325_v29 }
 0x42c   :  { %v1163_v32 = vmul.f32 %v1162_v26, %v1162_v26  ;;  %v1172_v33 = vmul.f32 %v1171_v27, %v1171_v27  ;;  %v1456_v26 = vld [vmem:[#allocation8 + $0x970] sm:$0xff]  ;;  %1543 = vmatpush.msrb.mxu1 %v1540_v28  ;;  %1487 = vmatpush.msrb.mxu0 %v1466_v30 }
 0x42d   :  { %1501 = vmatpush.msra.mxu3 %v1456_v26 }
 0x42e   :  { %v1164_v44 = vrot.slane %v1163_v32, 4  ;;  %v1173_v55 = vrot.slane %v1172_v33, 4 }
 0x42f   :  { %1502 = vmatpush.msra.mxu3 %v1455_v31 }
 0x430   :  { %v1165_v47 = vadd.f32 %v1164_v44, %v1163_v32  ;;  %v1174_v48 = vadd.f32 %v1173_v55, %v1172_v33  ;;  %v1324_v32 = vld [vmem:[#allocation8 + $0x720] sm:$0xff]  ;;  %v1453_v44 = vld [vmem:[#allocation8 + $0x958] sm:$0xff] }
 0x431   :  { %v1465_v33 = vld [vmem:[#allocation8 + $0x9a0] sm:$0xff]  ;;  %1347 = vmatpush.msra.mxu2 %v1324_v32  ;;  %1503 = vmatpush.msra.mxu3 %v1454_v34  ;;  %v1537_v55 = vld [vmem:[#allocation8 + $0xa58] sm:$0xff] }
 0x432   :  { %v1166_v56 = vrot.slane %v1165_v47, 2  ;;  %v1175_v57 = vrot.slane %v1174_v48, 2  ;;  %1488 = vmatpush.msrb.mxu0 %v1465_v33  ;;  %v2936_v33 = vld [vmem:[#allocation3 + $0x58] sm:$0xff] }
 0x433   :  { %1348 = vmatpush.msra.mxu2 %v1323_v36  ;;  %1504 = vmatpush.msra.mxu3 %v1453_v44 }
 0x434   :  { %v1167_v63 = vadd.f32 %v1166_v56, %v1165_v47  ;;  %v1176_v1 = vadd.f32 %v1175_v57, %v1174_v48  ;;  %1489 = vmatpush.msrb.mxu0 %v1464_v10  ;;  %v1321_v47 = vld [vmem:[#allocation8 + $0x708] sm:$0xff]  ;;  %v1320_v56 = vld [vmem:[#allocation8 + $0x700] sm:$0xff] }
 0x435   :  { %1349 = vmatpush.msra.mxu2 %v1322_v38  ;;  %1505 = vmatpush.msra.mxu3 %v1452_v45  ;;  %v1461_v57 = vld [vmem:[#allocation8 + $0x980] sm:$0xff] }
 0x436   :  { %v1168_v7 = vrot.slane %v1167_v63, 1  ;;  %v1177_v8 = vrot.slane %v1176_v1, 1  ;;  %1490 = vmatpush.msrb.mxu0 %v1463_v42  ;;  %v2709_v42 = vmov 8.0  }
 0x437   :  { %1350 = vmatpush.msra.mxu2 %v1321_v47  ;;  %1506 = vmatpush.msra.mxu3 %v1451_v50 }
 0x438   :  { %v1169_v43 = vadd.f32 %v1168_v7, %v1167_v63  ;;  %v1178_v12 = vadd.f32 %v1177_v8, %v1176_v1  ;;  %1491 = vmatpush.msrb.mxu0 %v1462_v49  ;;  %v1533_v1 = vld [vmem:[#allocation8 + $0xa38] sm:$0xff]  ;;  %v1181_v7 = vld [vmem:[#allocation10 + $0x4] sm:$0x1] }
 0x439   :  { %1351 = vmatpush.msra.mxu2 %v1320_v56  ;;  %1507 = vmatpush.msra.mxu3 %v1450_v60 }
 0x43a   :  { %v1179_v14 = vadd.f32 %v1178_v12, %v1169_v43  ;;  %1492 = vmatpush.msrb.mxu0 %v1461_v57  ;;  %v1445_v12 = vld [vmem:[#allocation8 + $0x918] sm:$0xff] }
 0x43b   :  { %1508 = vmatpush.msra.mxu3 %v1449_v62 }
 0x43c   :  { %v1180_v22 = vmul.f32 %v1179_v14, %v2889_v0  ;;  %v1539_v0 = vld [vmem:[#allocation8 + $0xa68] sm:$0xff]  ;;  %v1444_v14 = vld [vmem:[#allocation8 + $0x910] sm:$0xff] }
 0x43d   :  { %1544 = vmatpush.msrb.mxu1 %v1539_v0  ;;  %1509 = vmatpush.msra.mxu3 %v1448_v2 }
 0x43e   :  { %v2926_v27 = vadd.f32 1e-05, %v1180_v22 }
 0x43f   :  { %1545 = vmatpush.msrb.mxu1 %v1538_v35  ;;  %1510 = vmatpush.msra.mxu3 %v1447_v6 }
 0x440   :  { %2577 = vrsqrt.f32 %v2926_v27  ;;  %vm1190_vm13 = vweird.f32 %v2926_v27 }
 0x441   :  { %1546 = vmatpush.msrb.mxu1 %v1537_v55  ;;  %1511 = vmatpush.msra.mxu3 %v1446_v9  ;;  %2579 = vrcp.f32 %v2709_v42  ;;  %v1653_v42 = vld [vmem:[#allocation8 + $0x7e8] sm:$0xff] }
 0x443   :  { %1547 = vmatpush.msrb.mxu1 %v1536_v46  ;;  %1512 = vmatpush.msra.mxu3 %v1445_v12 }
 0x445   :  { %1548 = vmatpush.msrb.mxu1 %v1535_v52  ;;  %1513 = vmatpush.msra.mxu3 %v1444_v14 }
 0x446   :  { %v2578_v48 = vpop.eup %2577 }
 0x447   :  { %v1185_v51 = vmul.f32 %v2578_v48, %v2926_v27  ;;  %1549 = vmatpush.msrb.mxu1 %v1534_v3  ;;  %vm1191_vm12 = vweird.f32 %v2578_v48  ;;  %1514 = vmatpush.msra.mxu3 %v1443_v40  ;;  %v2580_v49 = vpop.eup %2579 }
 0x448   :  { %vm1192_vm14 = vmor %vm1190_vm13, %vm1191_vm12  ;;  %v1379_v60 = vmul.f32 8.0, %v2580_v49  ;;  %vm1383_vm0 = vweird.f32 %v2580_v49 }
 0x449   :  { %v1186_v61 = vmul.f32 %v2578_v48, %v1185_v51  ;;  %1550 = vmatpush.msrb.mxu1 %v1533_v1  ;;  %1515 = vmatpush.msra.mxu3 %v1442_v25 }
 0x44a   :  { %v1380_v1 = vsub.f32 1.0, %v1379_v60 }
 0x44b   :  { %v1187_v63 = vmul.f32 0.5, %v1186_v61  ;;  %1551 = vmatpush.msrb.mxu1 %v1532_v21 }
 0x44d   :  { %v1188_v5 = vsub.f32 1.5, %v1187_v63  ;;  %1552 = vmatpush.msrb.mxu1 %v1531_v39  ;;  %v1381_v39 = vmul.f32 %v2580_v49, %v1380_v1  ;;  %v1751_v1 = vld [vmem:[#allocation8 + $0x8d8] sm:$0xff] }
 0x44f   :  { %v1189_v8 = vmul.f32 %v2578_v48, %v1188_v5  ;;  %1553 = vmatpush.msrb.mxu1 %v1530_v13 }
 0x451   :  { %v1193_v41 = vsel %vm1192_vm14, %v2578_v48, %v1189_v8  ;;  %1554 = vmatpush.msrb.mxu1 %v1529_v20 }
 0x452   :  { %v1194_v43 = vmul.f32 %v1193_v41, %v1181_v7 }
 0x453   :  { %1555 = vmatpush.msrb.mxu1 %v1528_v54 }
 0x454   :  { %v1195_v11 = vmul.f32 %v1194_v43, %v2919_v24  ;;  %v1197_v58 = vperm.slane %v1194_v43, 0 }
 0x455   :  { %1556 = vmatpush.msrb.mxu1 %v1527_v16 }
 0x456   :  { %v1196_v59 = vsub.f32 %v1182_v18, %v1195_v11  ;;  %v1198_v17 = vmul.f32 %v1197_v58, %v2910_v53  ;;  %v1200_v22 = vmul.f32 %v1197_v58, %v2914_v4  ;;  %v1382_v18 = vadd.f32 %v2580_v49, %v1381_v39  ;;  %v1750_v39 = vld [vmem:[#allocation8 + $0x8d0] sm:$0xff] }
 0x457   :  { %1557 = vmatpush.msrb.mxu1 %v1526_v19 }
 0x458   :  { %v1202_v23 = vperm.slane %v1196_v59, 0 }
 0x45a   :  { %v1203_v24 = vadd.f32 %v1202_v23, %v1198_v17  ;;  %v1205_v26 = vadd.f32 %v1202_v23, %v1200_v22  ;;  %v2951_v17 = vsel %vm1383_vm0, %v2580_v49, %v1382_v18  ;;  %v1649_v18 = vld [vmem:[#allocation8 + $0x7c8] sm:$0xff] }
 0x45c   :  { %v1211_v27 = vadd.f32 %v1203_v24, %v2860_v15  ;;  %v1213_v28 = vadd.f32 %v1205_v26, %v2867_v37 }
 0x45e   :  { %v1215_v29 = vmax.f32 %v1211_v27, 0.0  ;;  %v1217_v30 = vmax.f32 %v1213_v28, 0.0 }
 0x460   :  { %1221 = vst [vmem:[#allocation4 + $0x18] sm:$0xff] %v1217_v30 }
 0x461   :  { %1219 = vst [vmem:[#allocation4 + $0x8] sm:$0xff] %v1215_v29 }
 0x467   :  { %v1251_v15 = vld [vmem:[#allocation4 + $0x18] ss:$2 sm:$0xff]  ;;  %v1230_v37 = vld [vmem:[#allocation4 + $0x17] ss:$2 sm:$0xff] }
 0x468   :  { %v1249_v53 = vld [vmem:[#allocation4 + $0x8] ss:$2 sm:$0xff]  ;;  %v1228_v4 = vld [vmem:[#allocation4 + $0x7] ss:$2 sm:$0xff]  ;;  %v1459_v35 = vld [vmem:[#allocation4 + $0x18] ss:$2 sm:$0xff] }
 0x469   :  { %v1316_v31 = vld [vmem:[#allocation4 + $0x9] ss:$2 sm:$0xff]  ;;  %1285 = vmatmul.f32.vlgmr.msrb.gmra.mxu3 %v1249_v53  ;;  %1308 = vmatmul.f32.vlgmr.msra.gmra.mxu1 %v1228_v4  ;;  %v1458_v0 = vld [vmem:[#allocation4 + $0x8] ss:$2 sm:$0xff]  ;;  %v1318_v34 = vld [vmem:[#allocation4 + $0x19] ss:$2 sm:$0xff] }
 0x46a   :  { %v1439_v32 = vld [vmem:[#allocation4 + $0x7] ss:$2 sm:$0xff]  ;;  %1352 = vmatmul.f32.vlgmr.msra.gmra.mxu2 %v1316_v31  ;;  %1493 = vmatmul.f32.vlgmr.msrb.gmra.mxu0 %v1458_v0  ;;  %v1440_v10 = vld [vmem:[#allocation4 + $0x17] ss:$2 sm:$0xff] }
 0x46b   :  { %1869 = vst [vmem:[#allocation4] sm:$0xff] %v2936_v33  ;;  %v1523_v36 = vld [vmem:[#allocation4 + $0x9] ss:$2 sm:$0xff]  ;;  %v1524_v44 = vld [vmem:[#allocation4 + $0x19] ss:$2 sm:$0xff] }
 0x46c   :  { %v1676_v53 = vld [vmem:[#allocation8 + $0x878] sm:$0xff] }
 0x46d   :  { %v1655_v4 = vld [vmem:[#allocation8 + $0x7f8] sm:$0xff]  ;;  %1677 = vmatpush.msrb.mxu2 %v1676_v53 }
 0x46e   :  { %v1755_v31 = vld [vmem:[#allocation8 + $0x8f8] sm:$0xff]  ;;  %1706 = vmatpush.msra.mxu0 %v1655_v4  ;;  %v1667_v4 = vld [vmem:[#allocation8 + $0x830] sm:$0xff] }
 0x46f   :  { %1756 = vmatpush.msrb.mxu3 %v1755_v31  ;;  %v1646_v31 = vld [vmem:[#allocation8 + $0x7b0] sm:$0xff] }
 0x471   :  { %1288 = vmatmul.f32.gmra.mxu3 %v1251_v15  ;;  %1311 = vmatmul.f32.gmra.mxu1 %v1230_v37 }
 0x472   :  { %1355 = vmatmul.f32.gmra.mxu2 %v1318_v34  ;;  %1496 = vmatmul.f32.gmra.mxu0 %v1459_v35  ;;  %v1675_v34 = vld [vmem:[#allocation8 + $0x870] sm:$0xff] }
 0x473   :  { %v1654_v35 = vld [vmem:[#allocation8 + $0x7f0] sm:$0xff]  ;;  %1678 = vmatpush.msrb.mxu2 %v1675_v34  ;;  %v1666_v34 = vld [vmem:[#allocation8 + $0x828] sm:$0xff] }
 0x474   :  { %1707 = vmatpush.msra.mxu0 %v1654_v35  ;;  %v1645_v35 = vld [vmem:[#allocation8 + $0x7a8] sm:$0xff] }
 0x476   :  { %1708 = vmatpush.msra.mxu0 %v1653_v42 }
 0x479   :  { %1516 = vmatmul.f32.vlgmr.msra.gmra.mxu3 %v1439_v32  ;;  %1558 = vmatmul.f32.vlgmr.msrb.gmra.mxu1 %v1523_v36  ;;  %v1754_v36 = vld [vmem:[#allocation8 + $0x8f0] sm:$0xff] }
 0x47a   :  { %1757 = vmatpush.msrb.mxu3 %v1754_v36  ;;  %v1745_v36 = vld [vmem:[#allocation8 + $0x8a8] sm:$0xff] }
 0x481   :  { %1519 = vmatmul.f32.gmra.mxu3 %v1440_v10  ;;  %1561 = vmatmul.f32.gmra.mxu1 %v1524_v44 }
 0x4e6   :  { %v1309_v55 = vpop.f32.mrf.mxu1 }
 0x4e7   :  { %v1494_v2 = vpop.f32.mrf.mxu0 }
 0x4ec   :  { %v1286_v38 = vpop.f32.mrf.mxu3 }
 0x4ed   :  { %v1310_v45 = vadd.f32 %v1309_v55, %v1286_v38  ;;  %v1353_v46 = vpop.f32.mrf.mxu2  ;;  %v1674_v38 = vld [vmem:[#allocation8 + $0x868] sm:$0xff] }
 0x4ee   :  { %v1312_v51 = vpop.f32.mrf.mxu1  ;;  %1679 = vmatpush.msrb.mxu2 %v1674_v38  ;;  %v1665_v38 = vld [vmem:[#allocation8 + $0x820] sm:$0xff] }
 0x4ef   :  { %v2939_v47 = vadd.f32 %v1353_v46, %v1310_v45  ;;  %v1497_v54 = vpop.f32.mrf.mxu0  ;;  %v1753_v45 = vld [vmem:[#allocation8 + $0x8e8] sm:$0xff] }
 0x4f0   :  { %1758 = vmatpush.msrb.mxu3 %v1753_v45 }
 0x4f1   :  { %v1362_v48 = vsel %vm1361_vm15, %v2939_v47, 0.0 }
 0x4f2   :  { %v1363_v50 = vrot.slane %v1362_v48, 4 }
 0x4f4   :  { %v1364_v52 = vadd.f32 %v1363_v50, %v1362_v48  ;;  %v1289_v56 = vpop.f32.mrf.mxu3 }
 0x4f5   :  { %v1313_v57 = vadd.f32 %v1312_v51, %v1289_v56  ;;  %v1356_v61 = vpop.f32.mrf.mxu2  ;;  %v1673_v51 = vld [vmem:[#allocation8 + $0x860] sm:$0xff] }
 0x4f6   :  { %v1365_v62 = vrot.slane %v1364_v52, 2  ;;  %v1559_v7 = vpop.f32.mrf.mxu1  ;;  %v1752_v56 = vld [vmem:[#allocation8 + $0x8e0] sm:$0xff]  ;;  %1680 = vmatpush.msrb.mxu2 %v1673_v51  ;;  %v1743_v51 = vld [vmem:[#allocation8 + $0x898] sm:$0xff] }
 0x4f7   :  { %v2943_v3 = vadd.f32 %v1356_v61, %v1313_v57  ;;  %1759 = vmatpush.msrb.mxu3 %v1752_v56 }
 0x4f8   :  { %v1366_v21 = vadd.f32 %v1365_v62, %v1364_v52  ;;  %v1652_v52 = vld [vmem:[#allocation8 + $0x7e0] sm:$0xff]  ;;  %v1672_v62 = vld [vmem:[#allocation8 + $0x858] sm:$0xff] }
 0x4f9   :  { %v1370_v63 = vsel %vm1361_vm15, %v2943_v3, 0.0  ;;  %1709 = vmatpush.msra.mxu0 %v1652_v52  ;;  %1681 = vmatpush.msrb.mxu2 %v1672_v62 }
 0x4fa   :  { %v1371_v5 = vrot.slane %v1370_v63, 4  ;;  %v1367_v43 = vrot.slane %v1366_v21, 1  ;;  %1760 = vmatpush.msrb.mxu3 %v1751_v1  ;;  %v1662_v1 = vld [vmem:[#allocation8 + $0x808] sm:$0xff] }
 0x4fc   :  { %v1372_v6 = vadd.f32 %v1371_v5, %v1370_v63  ;;  %v1517_v8 = vpop.f32.mrf.mxu3  ;;  %v1368_v14 = vadd.f32 %v1367_v43, %v1366_v21  ;;  %v1651_v63 = vld [vmem:[#allocation8 + $0x7d8] sm:$0xff]  ;;  %1761 = vmatpush.msrb.mxu3 %v1750_v39  ;;  %v1661_v39 = vld [vmem:[#allocation8 + $0x800] sm:$0xff] }
 0x4fd   :  { %v1518_v9 = vadd.f32 %v1517_v8, %v1494_v2  ;;  %1710 = vmatpush.msra.mxu0 %v1651_v63  ;;  %v1650_v8 = vld [vmem:[#allocation8 + $0x7d0] sm:$0xff] }
 0x4fe   :  { %v1373_v41 = vrot.slane %v1372_v6, 2  ;;  %v1562_v25 = vpop.f32.mrf.mxu1 }
 0x4ff   :  { %v2947_v13 = vadd.f32 %v1559_v7, %v1518_v9  ;;  %v1671_v7 = vld [vmem:[#allocation8 + $0x850] sm:$0xff]  ;;  %1711 = vmatpush.msra.mxu0 %v1650_v8 }
 0x500   :  { %v1374_v12 = vadd.f32 %v1373_v41, %v1372_v6  ;;  %1682 = vmatpush.msrb.mxu2 %v1671_v7 }
 0x501   :  { %v1567_v20 = vsel %vm1361_vm15, %v2947_v13, 0.0  ;;  %1712 = vmatpush.msra.mxu0 %v1649_v18 }
 0x502   :  { %v1375_v11 = vrot.slane %v1374_v12, 1  ;;  %v1568_v58 = vrot.slane %v1567_v20, 4 }
 0x504   :  { %v1376_v59 = vadd.f32 %v1375_v11, %v1374_v12  ;;  %v1569_v40 = vadd.f32 %v1568_v58, %v1567_v20  ;;  %v1520_v16 = vpop.f32.mrf.mxu3  ;;  %v1670_v12 = vld [vmem:[#allocation8 + $0x848] sm:$0xff] }
 0x505   :  { %v1521_v22 = vadd.f32 %v1520_v16, %v1497_v54  ;;  %v1749_v20 = vld [vmem:[#allocation8 + $0x8c8] sm:$0xff]  ;;  %1683 = vmatpush.msrb.mxu2 %v1670_v12  ;;  %v1669_v54 = vld [vmem:[#allocation8 + $0x840] sm:$0xff] }
 0x506   :  { %v1377_v23 = vadd.f32 %v1376_v59, %v1368_v14  ;;  %v1570_v26 = vrot.slane %v1569_v40, 2  ;;  %1762 = vmatpush.msrb.mxu3 %v1749_v20  ;;  %v1648_v59 = vld [vmem:[#allocation8 + $0x7c0] sm:$0xff] }
 0x507   :  { %v2953_v19 = vadd.f32 %v1562_v25, %v1521_v22  ;;  %1684 = vmatpush.msrb.mxu2 %v1669_v54  ;;  %1713 = vmatpush.msra.mxu0 %v1648_v59 }
 0x508   :  { %v2956_v24 = vmul.f32 %v2951_v17, %v1377_v23  ;;  %v1571_v15 = vadd.f32 %v1570_v26, %v1569_v40  ;;  %v1748_v40 = vld [vmem:[#allocation8 + $0x8c0] sm:$0xff]  ;;  %v1668_v26 = vld [vmem:[#allocation8 + $0x838] sm:$0xff] }
 0x509   :  { %v1575_v27 = vsel %vm1361_vm15, %v2953_v19, 0.0  ;;  %1763 = vmatpush.msrb.mxu3 %v1748_v40  ;;  %1685 = vmatpush.msrb.mxu2 %v1668_v26  ;;  %v1407_v40 = vld [vmem:[#allocation10 + $0x6] sm:$0x1] }
 0x50a   :  { %v1386_v28 = vsub.f32 %v2939_v47, %v2956_v24  ;;  %v1396_v29 = vsub.f32 %v2943_v3, %v2956_v24  ;;  %v1576_v30 = vrot.slane %v1575_v27, 4  ;;  %v1572_v49 = vrot.slane %v1571_v15, 1 }
 0x50b   :  { %1686 = vmatpush.msrb.mxu2 %v1667_v4 }
 0x50c   :  { %v1387_v0 = vmul.f32 %v1386_v28, %v1386_v28  ;;  %v1397_v32 = vmul.f32 %v1396_v29, %v1396_v29  ;;  %v1577_v37 = vadd.f32 %v1576_v30, %v1575_v27  ;;  %v1573_v21 = vadd.f32 %v1572_v49, %v1571_v15  ;;  %v1647_v27 = vld [vmem:[#allocation8 + $0x7b8] sm:$0xff] }
 0x50d   :  { %v1747_v28 = vld [vmem:[#allocation8 + $0x8b8] sm:$0xff]  ;;  %1714 = vmatpush.msra.mxu0 %v1647_v27  ;;  %1687 = vmatpush.msrb.mxu2 %v1666_v34 }
 0x50e   :  { %v1388_v10 = vsel %vm1361_vm15, %v1387_v0, 0.0  ;;  %v1398_v44 = vsel %vm1361_vm15, %v1397_v32, 0.0  ;;  %v1578_v55 = vrot.slane %v1577_v37, 2  ;;  %1764 = vmatpush.msrb.mxu3 %v1747_v28  ;;  %v1746_v0 = vld [vmem:[#allocation8 + $0x8b0] sm:$0xff]  ;;  %v1664_v49 = vld [vmem:[#allocation8 + $0x818] sm:$0xff] }
 0x50f   :  { %v1389_v46 = vrot.slane %v1388_v10, 4  ;;  %v1399_v48 = vrot.slane %v1398_v44, 4  ;;  %1715 = vmatpush.msra.mxu0 %v1646_v31  ;;  %1688 = vmatpush.msrb.mxu2 %v1665_v38  ;;  %v1638_v38 = vld [vmem:[#allocation2 + $0x1f] sm:$0xff] }
 0x510   :  { %v1579_v50 = vadd.f32 %v1578_v55, %v1577_v37  ;;  %1765 = vmatpush.msrb.mxu3 %v1746_v0 }
 0x511   :  { %v1390_v57 = vadd.f32 %v1389_v46, %v1388_v10  ;;  %v1400_v60 = vadd.f32 %v1399_v48, %v1398_v44  ;;  %1716 = vmatpush.msra.mxu0 %v1645_v35  ;;  %v1644_v46 = vld [vmem:[#allocation8 + $0x7a0] sm:$0xff]  ;;  %1689 = vmatpush.msrb.mxu2 %v1664_v49 }
 0x512   :  { %v1580_v61 = vrot.slane %v1579_v50, 1  ;;  %1766 = vmatpush.msrb.mxu3 %v1745_v36  ;;  %v1744_v48 = vld [vmem:[#allocation8 + $0x8a0] sm:$0xff] }
 0x513   :  { %v1391_v2 = vrot.slane %v1390_v57, 2  ;;  %v1401_v5 = vrot.slane %v1400_v60, 2  ;;  %1717 = vmatpush.msra.mxu0 %v1644_v46 }
 0x514   :  { %v1581_v6 = vadd.f32 %v1580_v61, %v1579_v50  ;;  %1767 = vmatpush.msrb.mxu3 %v1744_v48  ;;  %v1643_v50 = vld [vmem:[#allocation8 + $0x798] sm:$0xff]  ;;  %v1742_v61 = vld [vmem:[#allocation8 + $0x890] sm:$0xff] }
 0x515   :  { %v1392_v9 = vadd.f32 %v1391_v2, %v1390_v57  ;;  %v1402_v41 = vadd.f32 %v1401_v5, %v1400_v60  ;;  %1718 = vmatpush.msra.mxu0 %v1643_v50  ;;  %v1663_v57 = vld [vmem:[#allocation8 + $0x810] sm:$0xff]  ;;  %v1641_v2 = vld [vmem:[#allocation8 + $0x788] sm:$0xff] }
 0x516   :  { %v1582_v43 = vadd.f32 %v1581_v6, %v1573_v21  ;;  %1768 = vmatpush.msrb.mxu3 %v1743_v51  ;;  %v1642_v60 = vld [vmem:[#allocation8 + $0x790] sm:$0xff]  ;;  %1690 = vmatpush.msrb.mxu2 %v1663_v57  ;;  %v1741_v5 = vld [vmem:[#allocation8 + $0x888] sm:$0xff] }
 0x517   :  { %v1393_v11 = vrot.slane %v1392_v9, 1  ;;  %v1403_v58 = vrot.slane %v1402_v41, 1  ;;  %1719 = vmatpush.msra.mxu0 %v1642_v60 }
 0x518   :  { %v2967_v14 = vmul.f32 %v1582_v43, %v2951_v17  ;;  %1769 = vmatpush.msrb.mxu3 %v1742_v61  ;;  %1691 = vmatpush.msrb.mxu2 %v1662_v1 }
 0x519   :  { %v1394_v16 = vadd.f32 %v1393_v11, %v1392_v9  ;;  %v1404_v22 = vadd.f32 %v1403_v58, %v1402_v41  ;;  %1720 = vmatpush.msra.mxu0 %v1641_v2  ;;  %v1640_v9 = vld [vmem:[#allocation8 + $0x780] sm:$0xff] }
 0x51a   :  { %v1584_v23 = vsub.f32 %v2947_v13, %v2967_v14  ;;  %v1594_v25 = vsub.f32 %v2953_v19, %v2967_v14  ;;  %1770 = vmatpush.msrb.mxu3 %v1741_v5  ;;  %v1740_v41 = vld [vmem:[#allocation8 + $0x880] sm:$0xff]  ;;  %1692 = vmatpush.msrb.mxu2 %v1661_v39 }
 0x51b   :  { %v1405_v29 = vadd.f32 %v1404_v22, %v1394_v16  ;;  %1721 = vmatpush.msra.mxu0 %v1640_v9 }
 0x51c   :  { %v1585_v30 = vmul.f32 %v1584_v23, %v1584_v23  ;;  %v1595_v53 = vmul.f32 %v1594_v25, %v1594_v25  ;;  %1771 = vmatpush.msrb.mxu3 %v1740_v41  ;;  %v1408_v25 = vld [vmem:[#allocation10 + $0x7] sm:$0x1] }
 0x51d   :  { %v1406_v32 = vmul.f32 %v1405_v29, %v2951_v17 }
 0x51e   :  { %v1586_v15 = vsel %vm1361_vm15, %v1585_v30, 0.0  ;;  %v1596_v37 = vsel %vm1361_vm15, %v1595_v53, 0.0 }
 0x51f   :  { %v1409_v10 = vadd.f32 1e-05, %v1406_v32  ;;  %v1587_v44 = vrot.slane %v1586_v15, 4  ;;  %v1597_v55 = vrot.slane %v1596_v37, 4 }
 0x521   :  { %2581 = vrsqrt.f32 %v1409_v10  ;;  %v1588_v42 = vadd.f32 %v1587_v44, %v1586_v15  ;;  %v1598_v45 = vadd.f32 %v1597_v55, %v1596_v37  ;;  %vm1416_vm2 = vweird.f32 %v1409_v10  ;;  %v1659_v44 = vld [vmem:[#allocation2 + $0x20] sm:$0xff] }
 0x522   :  { %v1738_v55 = vld [vmem:[#allocation2 + $0x21] sm:$0xff] }
 0x523   :  { %v1589_v52 = vrot.slane %v1588_v42, 2  ;;  %v1599_v56 = vrot.slane %v1598_v45, 2  ;;  %2079 = vst [vmem:[#allocation2 + $0x22] sm:$0xff] %v2936_v33 }
 0x525   :  { %v1590_v62 = vadd.f32 %v1589_v52, %v1588_v42  ;;  %v1600_v63 = vadd.f32 %v1599_v56, %v1598_v45  ;;  %v1606_v42 = vld [vmem:[#allocation10 + $0x7] sm:$0x1]  ;;  %v1657_v52 = vld [vmem:[#allocation2 + $0x10] sm:$0xff] }
 0x526   :  { %v1636_v56 = vld [vmem:[#allocation2 + $0xf] sm:$0xff] }
 0x527   :  { %v2582_v21 = vpop.eup %2581  ;;  %v1591_v6 = vrot.slane %v1590_v62, 1  ;;  %v1601_v7 = vrot.slane %v1600_v63, 1 }
 0x528   :  { %v1411_v8 = vmul.f32 %v2582_v21, %v1409_v10  ;;  %vm1417_vm1 = vweird.f32 %v2582_v21  ;;  %v1605_v10 = vld [vmem:[#allocation10 + $0x6] sm:$0x1] }
 0x529   :  { %v1592_v43 = vadd.f32 %v1591_v6, %v1590_v62  ;;  %v1602_v12 = vadd.f32 %v1601_v7, %v1600_v63  ;;  %vm1418_vm3 = vmor %vm1416_vm2, %vm1417_vm1 }
 0x52a   :  { %v1412_v18 = vmul.f32 %v2582_v21, %v1411_v8 }
 0x52b   :  { %v1603_v20 = vadd.f32 %v1602_v12, %v1592_v43 }
 0x52c   :  { %v1413_v11 = vmul.f32 0.5, %v1412_v18 }
 0x52d   :  { %v1604_v58 = vmul.f32 %v1603_v20, %v2951_v17 }
 0x52e   :  { %v1414_v54 = vsub.f32 1.5, %v1413_v11 }
 0x52f   :  { %v1607_v59 = vadd.f32 1e-05, %v1604_v58 }
 0x530   :  { %v1415_v16 = vmul.f32 %v2582_v21, %v1414_v54 }
 0x531   :  { %2583 = vrsqrt.f32 %v1607_v59  ;;  %vm1614_vm5 = vweird.f32 %v1607_v59 }
 0x532   :  { %v1419_v22 = vsel %vm1418_vm3, %v2582_v21, %v1415_v16 }
 0x533   :  { %v1420_v23 = vmul.f32 %v1419_v22, %v1407_v40 }
 0x535   :  { %v1421_v26 = vmul.f32 %v1420_v23, %v2956_v24  ;;  %v1423_v27 = vperm.slane %v1420_v23, 0 }
 0x537   :  { %v2584_v28 = vpop.eup %2583  ;;  %v1422_v29 = vsub.f32 %v1408_v25, %v1421_v26  ;;  %v1424_v53 = vmul.f32 %v1423_v27, %v2939_v47  ;;  %v1425_v4 = vmul.f32 %v1423_v27, %v2943_v3 }
 0x538   :  { %v1609_v30 = vmul.f32 %v2584_v28, %v1607_v59  ;;  %vm1615_vm4 = vweird.f32 %v2584_v28 }
 0x539   :  { %v1426_v31 = vperm.slane %v1422_v29, 0  ;;  %vm1616_vm6 = vmor %vm1614_vm5, %vm1615_vm4  ;;  %v1893_v29 = vld [vmem:[#allocation8 + $0xaf8] sm:$0xff] }
 0x53a   :  { %v1610_v0 = vmul.f32 %v2584_v28, %v1609_v30  ;;  %1936 = vmatpush.msra.mxu2 %v1893_v29  ;;  %v1881_v29 = vld [vmem:[#allocation8 + $0xa98] sm:$0xff] }
 0x53b   :  { %v1427_v32 = vadd.f32 %v1426_v31, %v1424_v53  ;;  %v1428_v15 = vadd.f32 %v1426_v31, %v1425_v4  ;;  %v1911_v4 = vld [vmem:[#allocation8 + $0xb70] sm:$0xff] }
 0x53c   :  { %v1611_v37 = vmul.f32 0.5, %v1610_v0  ;;  %v1892_v31 = vld [vmem:[#allocation8 + $0xaf0] sm:$0xff] }
 0x53d   :  { %v1429_v34 = vmax.f32 %v1427_v32, 0.0  ;;  %v1430_v35 = vmax.f32 %v1428_v15, 0.0  ;;  %1937 = vmatpush.msra.mxu2 %v1892_v31  ;;  %v1910_v32 = vld [vmem:[#allocation8 + $0xb68] sm:$0xff] }
 0x53e   :  { %v1612_v36 = vsub.f32 1.5, %v1611_v37  ;;  %v1891_v15 = vld [vmem:[#allocation8 + $0xae8] sm:$0xff] }
 0x53f   :  { %1431 = vst [vmem:[#allocation2 + $0x8] sm:$0xf] %v1429_v34  ;;  %1938 = vmatpush.msra.mxu2 %v1891_v15  ;;  %v1880_v15 = vld [vmem:[#allocation8 + $0xa90] sm:$0xff] }
 0x540   :  { %1432 = vst [vmem:[#allocation2 + $0x18] sm:$0xf] %v1430_v35  ;;  %v1613_v24 = vmul.f32 %v2584_v28, %v1612_v36  ;;  %v1909_v35 = vld [vmem:[#allocation8 + $0xb60] sm:$0xff] }
 0x541   :  { %v1890_v36 = vld [vmem:[#allocation8 + $0xae0] sm:$0xff] }
 0x542   :  { %v1617_v47 = vsel %vm1616_vm6, %v2584_v28, %v1613_v24  ;;  %v1912_v28 = vld [vmem:[#allocation8 + $0xb78] sm:$0xff]  ;;  %1939 = vmatpush.msra.mxu2 %v1890_v36  ;;  %v1898_v36 = vld [vmem:[#allocation8 + $0xb08] sm:$0xff] }
 0x543   :  { %v1618_v3 = vmul.f32 %v1617_v47, %v1605_v10  ;;  %1913 = vmatpush.msra.mxu1 %v1912_v28  ;;  %v1908_v24 = vld [vmem:[#allocation8 + $0xb58] sm:$0xff]  ;;  %v1888_v47 = vld [vmem:[#allocation8 + $0xad0] sm:$0xff] }
 0x545   :  { %v1619_v45 = vmul.f32 %v1618_v3, %v2967_v14  ;;  %v1621_v46 = vperm.slane %v1618_v3, 0  ;;  %1914 = vmatpush.msra.mxu1 %v1911_v4  ;;  %v2113_v4 = vld [vmem:[#allocation8 + $0xe50] sm:$0xff] }
 0x546   :  { %v1656_v48 = vld [vmem:[#allocation2 + $0x8] sm:$0xff] }
 0x547   :  { %v1635_v49 = vld [vmem:[#allocation2 + $0x7] sm:$0xff]  ;;  %v1620_v51 = vsub.f32 %v1606_v42, %v1619_v45  ;;  %1693 = vmatmul.f32.vlgmr.msrb.gmra.mxu2 %v1656_v48  ;;  %v1736_v57 = vld [vmem:[#allocation2 + $0x11] sm:$0xff]  ;;  %v1622_v61 = vmul.f32 %v1621_v46, %v2947_v13  ;;  %v1623_v14 = vmul.f32 %v1621_v46, %v2953_v19  ;;  %v1737_v1 = vld [vmem:[#allocation2 + $0x19] sm:$0xff]  ;;  %1915 = vmatpush.msra.mxu1 %v1910_v32 }
 0x548   :  { %v1735_v50 = vld [vmem:[#allocation2 + $0x9] sm:$0xff]  ;;  %1722 = vmatmul.f32.vlgmr.msra.gmra.mxu0 %v1635_v49  ;;  %2075 = vst [vmem:[#allocation2] sm:$0xff] %v2936_v33  ;;  %v1637_v60 = vld [vmem:[#allocation2 + $0x17] sm:$0xff] }
 0x549   :  { %1772 = vmatmul.f32.vlgmr.msrb.gmra.mxu3 %v1735_v50  ;;  %2076 = vst [vmem:[#allocation2 + $0xa] sm:$0xff] %v2936_v33  ;;  %v1624_v62 = vperm.slane %v1620_v51, 0  ;;  %v1658_v63 = vld [vmem:[#allocation2 + $0x18] sm:$0xff]  ;;  %1916 = vmatpush.msra.mxu1 %v1909_v35  ;;  %v1906_v45 = vld [vmem:[#allocation8 + $0xb48] sm:$0xff]  ;;  %v1905_v50 = vld [vmem:[#allocation8 + $0xb40] sm:$0xff] }
 0x54a   :  { %2077 = vst [vmem:[#allocation2 + $0x12] sm:$0x3f] %v2936_v33  ;;  %v1887_v46 = vld [vmem:[#allocation8 + $0xac8] sm:$0xff]  ;;  %v1886_v51 = vld [vmem:[#allocation8 + $0xac0] sm:$0xff]  ;;  %v1899_v32 = vld [vmem:[#allocation8 + $0xb10] sm:$0xff] }
 0x54b   :  { %2078 = vst [vmem:[#allocation2 + $0x1a] sm:$0xff] %v2936_v33  ;;  %v1625_v2 = vadd.f32 %v1624_v62, %v1622_v61  ;;  %v1626_v5 = vadd.f32 %v1624_v62, %v1623_v14  ;;  %1917 = vmatpush.msra.mxu1 %v1908_v24  ;;  %v1904_v61 = vld [vmem:[#allocation8 + $0xb38] sm:$0xff] }
 0x54c   :  { %v1885_v14 = vld [vmem:[#allocation8 + $0xab8] sm:$0xff] }
 0x54d   :  { %1627 = vst [vmem:[#allocation3 + $0x8] sm:$0xf] %v1625_v2  ;;  %v2117_v2 = vld [vmem:[#allocation8 + $0xe70] sm:$0xff] }
 0x54e   :  { %1628 = vst [vmem:[#allocation3 + $0x18] sm:$0xf] %v1626_v5  ;;  %v1903_v5 = vld [vmem:[#allocation8 + $0xb30] sm:$0xff] }
 0x54f   :  { %1696 = vmatmul.f32.gmra.mxu2 %v1657_v52  ;;  %v1977_v52 = vld [vmem:[#allocation8 + $0xbf8] sm:$0xff] }
 0x550   :  { %1725 = vmatmul.f32.gmra.mxu0 %v1636_v56  ;;  %v2118_v56 = vld [vmem:[#allocation8 + $0xe78] sm:$0xff] }
 0x551   :  { %1775 = vmatmul.f32.gmra.mxu3 %v1736_v57  ;;  %1978 = vmatpush.msrb.mxu0 %v1977_v52  ;;  %v2098_v52 = vld [vmem:[#allocation8 + $0xdf0] sm:$0xff] }
 0x552   :  { %2119 = vmatpush.msra.mxu3 %v2118_v56  ;;  %v2182_v56 = vld [vmem:[#allocation8 + $0xef0] sm:$0xff] }
 0x554   :  { %2120 = vmatpush.msra.mxu3 %v2117_v2  ;;  %v2180_v2 = vld [vmem:[#allocation8 + $0xee0] sm:$0xff] }
 0x555   :  { %v3014_v24 = vld [vmem:[#allocation3 + $0x18] sm:$0xff] }
 0x557   :  { %1699 = vmatmul.f32.gmra.mxu2 %v1658_v63 }
 0x558   :  { %1728 = vmatmul.f32.gmra.mxu0 %v1637_v60 }
 0x559   :  { %1778 = vmatmul.f32.gmra.mxu3 %v1737_v1  ;;  %v1976_v1 = vld [vmem:[#allocation8 + $0xbf0] sm:$0xff] }
 0x55a   :  { %1979 = vmatpush.msrb.mxu0 %v1976_v1 }
 0x55f   :  { %1702 = vmatmul.f32.gmra.mxu2 %v1659_v44  ;;  %v1889_v44 = vld [vmem:[#allocation8 + $0xad8] sm:$0xff] }
 0x560   :  { %1731 = vmatmul.f32.gmra.mxu0 %v1638_v38  ;;  %1940 = vmatpush.msra.mxu2 %v1889_v44  ;;  %v1907_v38 = vld [vmem:[#allocation8 + $0xb50] sm:$0xff]  ;;  %v1970_v44 = vld [vmem:[#allocation8 + $0xbc0] sm:$0xff] }
 0x561   :  { %1781 = vmatmul.f32.gmra.mxu3 %v1738_v55  ;;  %1918 = vmatpush.msra.mxu1 %v1907_v38  ;;  %v2111_v38 = vld [vmem:[#allocation8 + $0xe40] sm:$0xff] }
 0x562   :  { %1941 = vmatpush.msra.mxu2 %v1888_v47 }
 0x563   :  { %1919 = vmatpush.msra.mxu1 %v1906_v45  ;;  %v1969_v45 = vld [vmem:[#allocation8 + $0xbb8] sm:$0xff] }
 0x564   :  { %1942 = vmatpush.msra.mxu2 %v1887_v46  ;;  %v2110_v46 = vld [vmem:[#allocation8 + $0xe38] sm:$0xff] }
 0x565   :  { %1920 = vmatpush.msra.mxu1 %v1905_v50  ;;  %v1968_v50 = vld [vmem:[#allocation8 + $0xbb0] sm:$0xff] }
 0x566   :  { %1943 = vmatpush.msra.mxu2 %v1886_v51  ;;  %v2109_v51 = vld [vmem:[#allocation8 + $0xe30] sm:$0xff] }
 0x567   :  { %1921 = vmatpush.msra.mxu1 %v1904_v61  ;;  %v2097_v61 = vld [vmem:[#allocation8 + $0xde8] sm:$0xff] }
 0x568   :  { %1944 = vmatpush.msra.mxu2 %v1885_v14  ;;  %v2181_v14 = vld [vmem:[#allocation8 + $0xee8] sm:$0xff] }
 0x569   :  { %1922 = vmatpush.msra.mxu1 %v1903_v5 }
 0x5c5   :  { %v1723_v13 = vpop.f32.mrf.mxu0 }
 0x5ca   :  { %v1694_v19 = vpop.f32.mrf.mxu2 }
 0x5cb   :  { %v1724_v21 = vadd.f32 %v1723_v13, %v1694_v19  ;;  %v1884_v13 = vld [vmem:[#allocation8 + $0xab0] sm:$0xff] }
 0x5cc   :  { %v1773_v6 = vpop.f32.mrf.mxu3  ;;  %1945 = vmatpush.msra.mxu2 %v1884_v13  ;;  %v1965_v13 = vld [vmem:[#allocation8 + $0xb98] sm:$0xff] }
 0x5cd   :  { %v2988_v7 = vadd.f32 %v1773_v6, %v1724_v21  ;;  %v1726_v8 = vpop.f32.mrf.mxu0  ;;  %v1975_v6 = vld [vmem:[#allocation8 + $0xbe8] sm:$0xff] }
 0x5ce   :  { %1980 = vmatpush.msrb.mxu0 %v1975_v6  ;;  %v2179_v6 = vld [vmem:[#allocation8 + $0xed8] sm:$0xff] }
 0x5cf   :  { %v1789_v9 = vsel %vm1361_vm15, %v2988_v7, 0.0 }
 0x5d0   :  { %v1790_v18 = vrot.slane %v1789_v9, 4 }
 0x5d2   :  { %v1697_v39 = vpop.f32.mrf.mxu2  ;;  %v1791_v20 = vadd.f32 %v1790_v18, %v1789_v9  ;;  %v1883_v9 = vld [vmem:[#allocation8 + $0xaa8] sm:$0xff]  ;;  %v1974_v18 = vld [vmem:[#allocation8 + $0xbe0] sm:$0xff] }
 0x5d3   :  { %v1727_v41 = vadd.f32 %v1726_v8, %v1697_v39  ;;  %v2116_v8 = vld [vmem:[#allocation8 + $0xe68] sm:$0xff]  ;;  %1946 = vmatpush.msra.mxu2 %v1883_v9  ;;  %1981 = vmatpush.msrb.mxu0 %v1974_v18  ;;  %v2105_v9 = vld [vmem:[#allocation8 + $0xe10] sm:$0xff] }
 0x5d4   :  { %v1776_v43 = vpop.f32.mrf.mxu3  ;;  %v1792_v16 = vrot.slane %v1791_v20, 2  ;;  %2121 = vmatpush.msra.mxu3 %v2116_v8  ;;  %v1902_v39 = vld [vmem:[#allocation8 + $0xb28] sm:$0xff]  ;;  %v1964_v8 = vld [vmem:[#allocation8 + $0xb90] sm:$0xff] }
 0x5d5   :  { %v2992_v12 = vadd.f32 %v1776_v43, %v1727_v41  ;;  %v1729_v11 = vpop.f32.mrf.mxu0  ;;  %1923 = vmatpush.msra.mxu1 %v1902_v39  ;;  %v1963_v18 = vld [vmem:[#allocation8 + $0xb88] sm:$0xff] }
 0x5d6   :  { %v1793_v25 = vadd.f32 %v1792_v16, %v1791_v20  ;;  %v2115_v20 = vld [vmem:[#allocation8 + $0xe60] sm:$0xff]  ;;  %v1973_v16 = vld [vmem:[#allocation8 + $0xbd8] sm:$0xff] }
 0x5d7   :  { %2122 = vmatpush.msra.mxu3 %v2115_v20  ;;  %1982 = vmatpush.msrb.mxu0 %v1973_v16  ;;  %v2104_v20 = vld [vmem:[#allocation8 + $0xe08] sm:$0xff]  ;;  %v2103_v16 = vld [vmem:[#allocation8 + $0xe00] sm:$0xff] }
 0x5d8   :  { %v1794_v30 = vrot.slane %v1793_v25, 1 }
 0x5da   :  { %v1700_v58 = vpop.f32.mrf.mxu2  ;;  %v1795_v37 = vadd.f32 %v1794_v30, %v1793_v25  ;;  %v3007_v30 = vld [vmem:[#allocation3 + $0x8] sm:$0xff] }
 0x5db   :  { %v1730_v54 = vadd.f32 %v1729_v11, %v1700_v58  ;;  %v1901_v11 = vld [vmem:[#allocation8 + $0xb20] sm:$0xff] }
 0x5dc   :  { %v1779_v59 = vpop.f32.mrf.mxu3  ;;  %v1882_v58 = vld [vmem:[#allocation8 + $0xaa0] sm:$0xff]  ;;  %1924 = vmatpush.msra.mxu1 %v1901_v11  ;;  %v2093_v11 = vld [vmem:[#allocation8 + $0xdc8] sm:$0xff] }
 0x5dd   :  { %v2994_v40 = vadd.f32 %v1779_v59, %v1730_v54  ;;  %1947 = vmatpush.msra.mxu2 %v1882_v58 }
 0x5df   :  { %v1797_v22 = vsel %vm1361_vm15, %v2994_v40, 0.0  ;;  %1948 = vmatpush.msra.mxu2 %v1881_v29  ;;  %v2175_v29 = vld [vmem:[#allocation8 + $0xeb8] sm:$0xff] }
 0x5e0   :  { %v1798_v23 = vrot.slane %v1797_v22, 4 }
 0x5e1   :  { %1949 = vmatpush.msra.mxu2 %v1880_v15  ;;  %v2174_v15 = vld [vmem:[#allocation8 + $0xeb0] sm:$0xff] }
 0x5e2   :  { %v1799_v26 = vadd.f32 %v1798_v23, %v1797_v22  ;;  %v2114_v22 = vld [vmem:[#allocation8 + $0xe58] sm:$0xff] }
 0x5e3   :  { %2123 = vmatpush.msra.mxu3 %v2114_v22  ;;  %v2092_v22 = vld [vmem:[#allocation8 + $0xdc0] sm:$0xff] }
 0x5e4   :  { %v1800_v27 = vrot.slane %v1799_v26, 2 }
 0x5e5   :  { %2124 = vmatpush.msra.mxu3 %v2113_v4 }
 0x5e6   :  { %v1801_v53 = vadd.f32 %v1800_v27, %v1799_v26  ;;  %v1900_v26 = vld [vmem:[#allocation8 + $0xb18] sm:$0xff] }
 0x5e7   :  { %1925 = vmatpush.msra.mxu1 %v1900_v26  ;;  %v1703_v26 = vpop.f32.mrf.mxu2 }
 0x5e8   :  { %v1802_v0 = vrot.slane %v1801_v53, 1 }
 0x5e9   :  { %1926 = vmatpush.msra.mxu1 %v1899_v32  ;;  %v2090_v32 = vld [vmem:[#allocation8 + $0xdb0] sm:$0xff] }
 0x5ea   :  { %v1803_v34 = vadd.f32 %v1802_v0, %v1801_v53  ;;  %v1972_v53 = vld [vmem:[#allocation8 + $0xbd0] sm:$0xff] }
 0x5eb   :  { %v3009_v0 = vld [vmem:[#allocation3 + $0x10] sm:$0xff]  ;;  %1983 = vmatpush.msrb.mxu0 %v1972_v53  ;;  %1927 = vmatpush.msra.mxu1 %v1898_v36  ;;  %v1827_v53 = vld [vmem:[#allocation10 + $0x6] sm:$0x1]  ;;  %v2089_v36 = vld [vmem:[#allocation8 + $0xda8] sm:$0xff] }
 0x5ec   :  { %v1804_v10 = vadd.f32 %v1803_v34, %v1795_v37  ;;  %2272 = vst [vmem:[#allocation3 + $0xa] sm:$0xff] %v2936_v33  ;;  %v1971_v37 = vld [vmem:[#allocation8 + $0xbc8] sm:$0xff] }
 0x5ed   :  { %v2112_v34 = vld [vmem:[#allocation8 + $0xe48] sm:$0xff]  ;;  %2273 = vst [vmem:[#allocation3 + $0x12] sm:$0x3f] %v2936_v33  ;;  %1984 = vmatpush.msrb.mxu0 %v1971_v37 }
 0x5ee   :  { %v2999_v55 = vmul.f32 %v1804_v10, %v2951_v17  ;;  %2125 = vmatpush.msra.mxu3 %v2112_v34  ;;  %v1879_v10 = vld [vmem:[#allocation8 + $0xa88] sm:$0xff]  ;;  %v1782_v34 = vpop.f32.mrf.mxu3 }
 0x5ef   :  { %1950 = vmatpush.msra.mxu2 %v1879_v10  ;;  %1985 = vmatpush.msrb.mxu0 %v1970_v44  ;;  %v2173_v10 = vld [vmem:[#allocation8 + $0xea8] sm:$0xff]  ;;  %v1828_v44 = vld [vmem:[#allocation10 + $0x7] sm:$0x1] }
 0x5f0   :  { %v1806_v3 = vsub.f32 %v2988_v7, %v2999_v55  ;;  %v1816_v42 = vsub.f32 %v2994_v40, %v2999_v55  ;;  %2126 = vmatpush.msra.mxu3 %v2111_v38 }
 0x5f1   :  { %1986 = vmatpush.msrb.mxu0 %v1969_v45  ;;  %v2172_v45 = vld [vmem:[#allocation8 + $0xea0] sm:$0xff] }
 0x5f2   :  { %v1807_v48 = vmul.f32 %v1806_v3, %v1806_v3  ;;  %v1817_v49 = vmul.f32 %v1816_v42, %v1816_v42  ;;  %v3018_v3 = vld [vmem:[#allocation3 + $0x20] sm:$0xff]  ;;  %2127 = vmatpush.msra.mxu3 %v2110_v46 }
 0x5f3   :  { %v1897_v42 = vld [vmem:[#allocation8 + $0xb00] sm:$0xff]  ;;  %2275 = vst [vmem:[#allocation3 + $0x22] sm:$0xff] %v2936_v33  ;;  %1987 = vmatpush.msrb.mxu0 %v1968_v50 }
 0x5f4   :  { %v1808_v57 = vsel %vm1361_vm15, %v1807_v48, 0.0  ;;  %v1818_v60 = vsel %vm1361_vm15, %v1817_v49, 0.0  ;;  %1928 = vmatpush.msra.mxu1 %v1897_v42  ;;  %v2099_v48 = vld [vmem:[#allocation8 + $0xdf8] sm:$0xff]  ;;  %2274 = vst [vmem:[#allocation3 + $0x1a] sm:$0xff] %v2936_v33  ;;  %2128 = vmatpush.msra.mxu3 %v2109_v51  ;;  %v1966_v33 = vld [vmem:[#allocation8 + $0xba0] sm:$0xff] }
 0x5f5   :  { %v1809_v62 = vrot.slane %v1808_v57, 4  ;;  %v1819_v63 = vrot.slane %v1818_v60, 4  ;;  %v2183_v49 = vld [vmem:[#allocation8 + $0xef8] sm:$0xff] }
 0x5f6   :  { %2142 = vmatpush.msrb.mxu1 %v2099_v48  ;;  %v2087_v48 = vld [vmem:[#allocation8 + $0xd98] sm:$0xff] }
 0x5f7   :  { %v1810_v19 = vadd.f32 %v1809_v62, %v1808_v57  ;;  %v1820_v21 = vadd.f32 %v1819_v63, %v1818_v60  ;;  %v1967_v57 = vld [vmem:[#allocation8 + $0xba8] sm:$0xff]  ;;  %v2107_v62 = vld [vmem:[#allocation8 + $0xe20] sm:$0xff] }
 0x5f8   :  { %2143 = vmatpush.msrb.mxu1 %v2098_v52  ;;  %v2108_v60 = vld [vmem:[#allocation8 + $0xe28] sm:$0xff]  ;;  %1988 = vmatpush.msrb.mxu0 %v1967_v57  ;;  %v2096_v63 = vld [vmem:[#allocation8 + $0xde0] sm:$0xff] }
 0x5f9   :  { %v1811_v41 = vrot.slane %v1810_v19, 2  ;;  %v1821_v43 = vrot.slane %v1820_v21, 2  ;;  %2129 = vmatpush.msra.mxu3 %v2108_v60  ;;  %v2170_v60 = vld [vmem:[#allocation8 + $0xe90] sm:$0xff] }
 0x5fa   :  { %2144 = vmatpush.msrb.mxu1 %v2097_v61  ;;  %1989 = vmatpush.msrb.mxu0 %v1966_v33 }
 0x5fb   :  { %v1812_v54 = vadd.f32 %v1811_v41, %v1810_v19  ;;  %v1822_v59 = vadd.f32 %v1821_v43, %v1820_v21  ;;  %2130 = vmatpush.msra.mxu3 %v2107_v62  ;;  %v2106_v19 = vld [vmem:[#allocation8 + $0xe18] sm:$0xff]  ;;  %v2094_v41 = vld [vmem:[#allocation8 + $0xdd0] sm:$0xff] }
 0x5fc   :  { %2145 = vmatpush.msrb.mxu1 %v2096_v63  ;;  %v2095_v21 = vld [vmem:[#allocation8 + $0xdd8] sm:$0xff]  ;;  %1990 = vmatpush.msrb.mxu0 %v1965_v13  ;;  %v2178_v43 = vld [vmem:[#allocation8 + $0xed0] sm:$0xff]  ;;  %v2085_v63 = vld [vmem:[#allocation8 + $0xd88] sm:$0xff] }
 0x5fd   :  { %v1813_v23 = vrot.slane %v1812_v54, 1  ;;  %v1823_v25 = vrot.slane %v1822_v59, 1  ;;  %2131 = vmatpush.msra.mxu3 %v2106_v19 }
 0x5fe   :  { %2146 = vmatpush.msrb.mxu1 %v2095_v21  ;;  %1991 = vmatpush.msrb.mxu0 %v1964_v8 }
 0x5ff   :  { %v1814_v27 = vadd.f32 %v1813_v23, %v1812_v54  ;;  %v1824_v28 = vadd.f32 %v1823_v25, %v1822_v59  ;;  %2132 = vmatpush.msra.mxu3 %v2105_v9  ;;  %v2177_v54 = vld [vmem:[#allocation8 + $0xec8] sm:$0xff]  ;;  %v1962_v59 = vld [vmem:[#allocation8 + $0xb80] sm:$0xff] }
 0x600   :  { %2147 = vmatpush.msrb.mxu1 %v2094_v41  ;;  %1992 = vmatpush.msrb.mxu0 %v1963_v18  ;;  %v2176_v23 = vld [vmem:[#allocation8 + $0xec0] sm:$0xff] }
 0x601   :  { %v1825_v31 = vadd.f32 %v1824_v28, %v1814_v27  ;;  %2133 = vmatpush.msra.mxu3 %v2104_v20  ;;  %v1732_v27 = vpop.f32.mrf.mxu0  ;;  %v2091_v28 = vld [vmem:[#allocation8 + $0xdb8] sm:$0xff] }
 0x602   :  { %2148 = vmatpush.msrb.mxu1 %v2093_v11  ;;  %1993 = vmatpush.msrb.mxu0 %v1962_v59 }
 0x603   :  { %v1826_v35 = vmul.f32 %v1825_v31, %v2951_v17  ;;  %v1878_v17 = vld [vmem:[#allocation8 + $0xa80] sm:$0xff]  ;;  %2134 = vmatpush.msra.mxu3 %v2103_v16  ;;  %v1733_v31 = vadd.f32 %v1732_v27, %v1703_v26 }
 0x604   :  { %1951 = vmatpush.msra.mxu2 %v1878_v17  ;;  %2149 = vmatpush.msrb.mxu1 %v2092_v22  ;;  %v2088_v17 = vld [vmem:[#allocation8 + $0xda0] sm:$0xff] }
 0x605   :  { %v3016_v47 = vadd.f32 1e-05, %v1826_v35 }
 0x606   :  { %2184 = vmatpush.msrb.mxu2 %v2183_v49  ;;  %2150 = vmatpush.msrb.mxu1 %v2091_v28  ;;  %v2171_v49 = vld [vmem:[#allocation8 + $0xe98] sm:$0xff] }
 0x607   :  { %2585 = vrsqrt.f32 %v3016_v47  ;;  %vm1836_vm8 = vweird.f32 %v3016_v47 }
 0x608   :  { %2185 = vmatpush.msrb.mxu2 %v2182_v56  ;;  %2151 = vmatpush.msrb.mxu1 %v2090_v32 }
 0x60a   :  { %2186 = vmatpush.msrb.mxu2 %v2181_v14  ;;  %2152 = vmatpush.msrb.mxu1 %v2089_v36 }
 0x60c   :  { %2187 = vmatpush.msrb.mxu2 %v2180_v2  ;;  %2153 = vmatpush.msrb.mxu1 %v2088_v17  ;;  %v2084_v2 = vld [vmem:[#allocation8 + $0xd80] sm:$0xff] }
 0x60d   :  { %v2586_v1 = vpop.eup %2585 }
 0x60e   :  { %v1831_v5 = vmul.f32 %v2586_v1, %v3016_v47  ;;  %2188 = vmatpush.msrb.mxu2 %v2179_v6  ;;  %vm1837_vm7 = vweird.f32 %v2586_v1  ;;  %v1788_v47 = vadd.f32 %v1782_v34, %v1733_v31  ;;  %2154 = vmatpush.msrb.mxu1 %v2087_v48 }
 0x60f   :  { %vm1838_vm9 = vmor %vm1836_vm8, %vm1837_vm7 }
 0x610   :  { %v1832_v39 = vmul.f32 %v2586_v1, %v1831_v5  ;;  %2189 = vmatpush.msrb.mxu2 %v2178_v43  ;;  %v2168_v5 = vld [vmem:[#allocation8 + $0xe80] sm:$0xff] }
 0x612   :  { %v1833_v58 = vmul.f32 0.5, %v1832_v39  ;;  %2190 = vmatpush.msrb.mxu2 %v2177_v54 }
 0x614   :  { %v1834_v25 = vsub.f32 1.5, %v1833_v58  ;;  %2191 = vmatpush.msrb.mxu2 %v2176_v23  ;;  %v2710_v23 = vmov 4.0  }
 0x615   :  { %2587 = vrcp.f32 %v2710_v23 }
 0x616   :  { %v1835_v4 = vmul.f32 %v2586_v1, %v1834_v25  ;;  %2192 = vmatpush.msrb.mxu2 %v2175_v29 }
 0x618   :  { %v1839_v37 = vsel %vm1838_vm9, %v2586_v1, %v1835_v4  ;;  %2193 = vmatpush.msrb.mxu2 %v2174_v15  ;;  %v2169_v1 = vld [vmem:[#allocation8 + $0xe88] sm:$0xff] }
 0x619   :  { %v1840_v35 = vmul.f32 %v1839_v37, %v1827_v53 }
 0x61a   :  { %2194 = vmatpush.msrb.mxu2 %v2173_v10 }
 0x61b   :  { %v1841_v38 = vmul.f32 %v1840_v35, %v2999_v55  ;;  %v1843_v42 = vperm.slane %v1840_v35, 0  ;;  %v2086_v55 = vld [vmem:[#allocation8 + $0xd90] sm:$0xff]  ;;  %v2588_v29 = vpop.eup %2587 }
 0x61c   :  { %2195 = vmatpush.msrb.mxu2 %v2172_v45  ;;  %2155 = vmatpush.msrb.mxu1 %v2086_v55  ;;  %v2021_v15 = vmul.f32 4.0, %v2588_v29  ;;  %vm2025_vm11 = vweird.f32 %v2588_v29 }
 0x61d   :  { %v1842_v46 = vsub.f32 %v1828_v44, %v1841_v38  ;;  %v1844_v50 = vmul.f32 %v1843_v42, %v2988_v7  ;;  %v1845_v51 = vmul.f32 %v1843_v42, %v2992_v12  ;;  %v1846_v52 = vmul.f32 %v1843_v42, %v2994_v40 }
 0x61e   :  { %v1847_v57 = vmul.f32 %v1843_v42, %v1788_v47  ;;  %2196 = vmatpush.msrb.mxu2 %v2171_v49  ;;  %2156 = vmatpush.msrb.mxu1 %v2085_v63  ;;  %v2022_v38 = vsub.f32 1.0, %v2021_v15  ;;  %v2294_v15 = vld [vmem:[#allocation8 + $0xc60] sm:$0xff] }
 0x61f   :  { %v1848_v56 = vperm.slane %v1842_v46, 0 }
 0x620   :  { %2197 = vmatpush.msrb.mxu2 %v2170_v60  ;;  %2157 = vmatpush.msrb.mxu1 %v2084_v2  ;;  %v2023_v48 = vmul.f32 %v2588_v29, %v2022_v38  ;;  %v2314_v38 = vld [vmem:[#allocation8 + $0xcd8] sm:$0xff] }
 0x621   :  { %v1849_v61 = vadd.f32 %v1848_v56, %v1844_v50  ;;  %v1850_v14 = vadd.f32 %v1848_v56, %v1845_v51  ;;  %v1851_v33 = vadd.f32 %v1848_v56, %v1846_v52  ;;  %v1852_v62 = vadd.f32 %v1848_v56, %v1847_v57 }
 0x622   :  { %2198 = vmatpush.msrb.mxu2 %v2169_v1  ;;  %v2024_v60 = vadd.f32 %v2588_v29, %v2023_v48  ;;  %v2313_v48 = vld [vmem:[#allocation8 + $0xcd0] sm:$0xff] }
 0x623   :  { %v1857_v7 = vadd.f32 %v3007_v30, %v1849_v61  ;;  %v1858_v12 = vadd.f32 %v3009_v0, %v1850_v14  ;;  %v1859_v40 = vadd.f32 %v3014_v24, %v1851_v33  ;;  %v1860_v13 = vadd.f32 %v3018_v3, %v1852_v62  ;;  %v3033_v30 = vld [vmem:[#allocation3 + $0x58] sm:$0xff] }
 0x624   :  { %2199 = vmatpush.msrb.mxu2 %v2168_v5 }
 0x625   :  { %v1861_v19 = vmax.f32 %v1857_v7, 0.0  ;;  %v1862_v21 = vmax.f32 %v1858_v12, 0.0  ;;  %v1863_v6 = vmax.f32 %v1859_v40, 0.0  ;;  %v1864_v8 = vmax.f32 %v1860_v13, 0.0 }
 0x626   :  { %v3053_v12 = vsel %vm2025_vm11, %v2588_v29, %v2024_v60  ;;  %v2395_v29 = vld [vmem:[#allocation8 + $0xd68] sm:$0xff] }
 0x627   :  { %1865 = vst [vmem:[#allocation4 + $0x8] sm:$0xff] %v1861_v19  ;;  %v2291_v60 = vld [vmem:[#allocation8 + $0xc48] sm:$0xff] }
 0x628   :  { %1866 = vst [vmem:[#allocation4 + $0x10] sm:$0xff] %v1862_v21 }
 0x629   :  { %1867 = vst [vmem:[#allocation4 + $0x18] sm:$0xff] %v1863_v6 }
 0x62a   :  { %1870 = vst [vmem:[#allocation4 + $0xc] sm:$0xff] %v3033_v30 }
 0x62b   :  { %1871 = vst [vmem:[#allocation4 + $0x14] sm:$0xf] %v3033_v30 }
 0x62c   :  { %1868 = vst [vmem:[#allocation4 + $0x20] sm:$0xff] %v1864_v8 }
 0x62d   :  { %1872 = vst [vmem:[#allocation4 + $0x1c] sm:$0xff] %v3033_v30 }
 0x62e   :  { %1873 = vst [vmem:[#allocation4 + $0x24] sm:$0xff] %v3033_v30 }
 0x62f   :  { %2516 = vst [vmem:[#allocation4 + $0x2a] sm:$0x3f] %v3033_v30 }
 0x632   :  { %v1894_v0 = vld [vmem:[#allocation4 + $0x8] ss:$2 sm:$0xff]  ;;  %v1875_v24 = vld [vmem:[#allocation4 + $0x7] ss:$2 sm:$0xff] }
 0x633   :  { %v1959_v3 = vld [vmem:[#allocation4 + $0x9] ss:$2 sm:$0xff]  ;;  %1929 = vmatmul.f32.vlgmr.msra.gmra.mxu1 %v1894_v0  ;;  %1952 = vmatmul.f32.vlgmr.msra.gmra.mxu2 %v1875_v24  ;;  %v2100_v39 = vld [vmem:[#allocation4 + $0x8] ss:$2 sm:$0xff] }
 0x634   :  { %v2081_v9 = vld [vmem:[#allocation4 + $0x7] ss:$2 sm:$0xff]  ;;  %1994 = vmatmul.f32.vlgmr.msrb.gmra.mxu0 %v1959_v3  ;;  %2135 = vmatmul.f32.vlgmr.msra.gmra.mxu3 %v2100_v39  ;;  %v2318_v3 = vld [vmem:[#allocation8 + $0xcf8] sm:$0xff] }
 0x635   :  { %2511 = vst [vmem:[#allocation4] sm:$0xff] %v3033_v30  ;;  %v1895_v41 = vld [vmem:[#allocation4 + $0x18] ss:$2 sm:$0xff]  ;;  %v1876_v43 = vld [vmem:[#allocation4 + $0x17] ss:$2 sm:$0xff]  ;;  %2319 = vmatpush.msra.mxu0 %v2318_v3 }
 0x636   :  { %v1960_v18 = vld [vmem:[#allocation4 + $0x19] ss:$2 sm:$0xff]  ;;  %v2101_v20 = vld [vmem:[#allocation4 + $0x18] ss:$2 sm:$0xff]  ;;  %v2165_v11 = vld [vmem:[#allocation4 + $0x9] ss:$2 sm:$0xff] }
 0x637   :  { %v2082_v58 = vld [vmem:[#allocation4 + $0x17] ss:$2 sm:$0xff] }
 0x638   :  { %v2166_v54 = vld [vmem:[#allocation4 + $0x19] ss:$2 sm:$0xff] }
 0x639   :  { %v2297_v39 = vld [vmem:[#allocation8 + $0xc78] sm:$0xff] }
 0x63a   :  { %2348 = vmatpush.msrb.mxu3 %v2297_v39 }
 0x63b   :  { %1932 = vmatmul.f32.gmra.mxu1 %v1895_v41  ;;  %1955 = vmatmul.f32.gmra.mxu2 %v1876_v43 }
 0x63c   :  { %1997 = vmatmul.f32.gmra.mxu0 %v1960_v18  ;;  %2138 = vmatmul.f32.gmra.mxu3 %v2101_v20  ;;  %v2317_v20 = vld [vmem:[#allocation8 + $0xcf0] sm:$0xff] }
 0x63d   :  { %2320 = vmatpush.msra.mxu0 %v2317_v20  ;;  %v2388_v20 = vld [vmem:[#allocation8 + $0xd30] sm:$0xff] }
 0x643   :  { %2158 = vmatmul.f32.vlgmr.msrb.gmra.mxu1 %v2081_v9  ;;  %2200 = vmatmul.f32.vlgmr.msrb.gmra.mxu2 %v2165_v11  ;;  %v2397_v9 = vld [vmem:[#allocation8 + $0xd78] sm:$0xff]  ;;  %v2296_v11 = vld [vmem:[#allocation8 + $0xc70] sm:$0xff] }
 0x644   :  { %2398 = vmatpush.msra.mxu1 %v2397_v9  ;;  %2349 = vmatpush.msrb.mxu3 %v2296_v11 }
 0x64b   :  { %2161 = vmatmul.f32.gmra.mxu1 %v2082_v58  ;;  %2203 = vmatmul.f32.gmra.mxu2 %v2166_v54  ;;  %v2396_v58 = vld [vmem:[#allocation8 + $0xd70] sm:$0xff] }
 0x64c   :  { %2399 = vmatpush.msra.mxu1 %v2396_v58 }
 0x64e   :  { %2400 = vmatpush.msra.mxu1 %v2395_v29  ;;  %v2386_v29 = vld [vmem:[#allocation8 + $0xd20] sm:$0xff] }
 0x6b0   :  { %v1930_v59 = vpop.f32.mrf.mxu1 }
 0x6b1   :  { %v1995_v16 = vpop.f32.mrf.mxu0 }
 0x6b6   :  { %v1953_v22 = vpop.f32.mrf.mxu2 }
 0x6b7   :  { %v1954_v25 = vadd.f32 %v1953_v22, %v1930_v59  ;;  %v2136_v10 = vpop.f32.mrf.mxu3 }
 0x6b8   :  { %v1933_v26 = vpop.f32.mrf.mxu1 }
 0x6b9   :  { %v3041_v27 = vadd.f32 %v1995_v16, %v1954_v25  ;;  %v1998_v37 = vpop.f32.mrf.mxu0 }
 0x6bb   :  { %v2004_v28 = vsel %vm2003_vm10, %v3041_v27, 0.0 }
 0x6bc   :  { %v2005_v53 = vrot.slane %v2004_v28, 4 }
 0x6be   :  { %v2006_v4 = vadd.f32 %v2005_v53, %v2004_v28  ;;  %v1956_v31 = vpop.f32.mrf.mxu2  ;;  %v2295_v28 = vld [vmem:[#allocation8 + $0xc68] sm:$0xff] }
 0x6bf   :  { %v1957_v32 = vadd.f32 %v1956_v31, %v1933_v26  ;;  %v2139_v14 = vpop.f32.mrf.mxu3  ;;  %v2316_v26 = vld [vmem:[#allocation8 + $0xce8] sm:$0xff]  ;;  %2350 = vmatpush.msrb.mxu3 %v2295_v28  ;;  %v2286_v28 = vld [vmem:[#allocation8 + $0xc20] sm:$0xff] }
 0x6c0   :  { %v2159_v34 = vpop.f32.mrf.mxu1  ;;  %v2007_v36 = vrot.slane %v2006_v4, 2  ;;  %2321 = vmatpush.msra.mxu0 %v2316_v26  ;;  %v2307_v26 = vld [vmem:[#allocation8 + $0xca0] sm:$0xff] }
 0x6c1   :  { %v3045_v35 = vadd.f32 %v1998_v37, %v1957_v32  ;;  %v2160_v47 = vadd.f32 %v2159_v34, %v2136_v10  ;;  %v2315_v32 = vld [vmem:[#allocation8 + $0xce0] sm:$0xff]  ;;  %2351 = vmatpush.msrb.mxu3 %v2294_v15  ;;  %v2385_v15 = vld [vmem:[#allocation8 + $0xd18] sm:$0xff] }
 0x6c2   :  { %v2008_v17 = vadd.f32 %v2007_v36, %v2006_v4  ;;  %v2394_v37 = vld [vmem:[#allocation8 + $0xd60] sm:$0xff]  ;;  %2322 = vmatpush.msra.mxu0 %v2315_v32  ;;  %v2285_v32 = vld [vmem:[#allocation8 + $0xc18] sm:$0xff] }
 0x6c3   :  { %v2012_v44 = vsel %vm2003_vm10, %v3045_v35, 0.0  ;;  %2401 = vmatpush.msra.mxu1 %v2394_v37 }
 0x6c4   :  { %v2013_v42 = vrot.slane %v2012_v44, 4  ;;  %v2009_v52 = vrot.slane %v2008_v17, 1  ;;  %2323 = vmatpush.msra.mxu0 %v2314_v38 }
 0x6c6   :  { %v2014_v45 = vadd.f32 %v2013_v42, %v2012_v44  ;;  %v2201_v46 = vpop.f32.mrf.mxu2  ;;  %v2010_v63 = vadd.f32 %v2009_v52, %v2008_v17  ;;  %v2293_v42 = vld [vmem:[#allocation8 + $0xc58] sm:$0xff]  ;;  %2324 = vmatpush.msra.mxu0 %v2313_v48 }
 0x6c7   :  { %v3049_v49 = vadd.f32 %v2201_v46, %v2160_v47  ;;  %v2393_v47 = vld [vmem:[#allocation8 + $0xd58] sm:$0xff]  ;;  %2352 = vmatpush.msrb.mxu3 %v2293_v42 }
 0x6c8   :  { %v2015_v50 = vrot.slane %v2014_v45, 2  ;;  %v2162_v55 = vpop.f32.mrf.mxu1  ;;  %2402 = vmatpush.msra.mxu1 %v2393_v47 }
 0x6c9   :  { %v2209_v51 = vsel %vm2003_vm10, %v3049_v49, 0.0  ;;  %v2163_v62 = vadd.f32 %v2162_v55, %v2139_v14  ;;  %v2312_v55 = vld [vmem:[#allocation8 + $0xcc8] sm:$0xff] }
 0x6ca   :  { %v2016_v56 = vadd.f32 %v2015_v50, %v2014_v45  ;;  %v2210_v57 = vrot.slane %v2209_v51, 4  ;;  %v2292_v50 = vld [vmem:[#allocation8 + $0xc50] sm:$0xff]  ;;  %2325 = vmatpush.msra.mxu0 %v2312_v55  ;;  %v2382_v55 = vld [vmem:[#allocation8 + $0xd00] sm:$0xff] }
 0x6cb   :  { %2353 = vmatpush.msrb.mxu3 %v2292_v50 }
 0x6cc   :  { %v2017_v61 = vrot.slane %v2016_v56, 1  ;;  %v2211_v33 = vadd.f32 %v2210_v57, %v2209_v51  ;;  %v2392_v51 = vld [vmem:[#allocation8 + $0xd50] sm:$0xff] }
 0x6cd   :  { %2403 = vmatpush.msra.mxu1 %v2392_v51  ;;  %2354 = vmatpush.msrb.mxu3 %v2291_v60  ;;  %v2303_v51 = vld [vmem:[#allocation8 + $0xc80] sm:$0xff] }
 0x6ce   :  { %v2018_v1 = vadd.f32 %v2017_v61, %v2016_v56  ;;  %v2204_v7 = vpop.f32.mrf.mxu2  ;;  %v2212_v5 = vrot.slane %v2211_v33, 2  ;;  %v2391_v61 = vld [vmem:[#allocation8 + $0xd48] sm:$0xff] }
 0x6cf   :  { %v3055_v40 = vadd.f32 %v2204_v7, %v2163_v62  ;;  %2404 = vmatpush.msra.mxu1 %v2391_v61  ;;  %v2290_v7 = vld [vmem:[#allocation8 + $0xc40] sm:$0xff] }
 0x6d0   :  { %v2019_v2 = vadd.f32 %v2018_v1, %v2010_v63  ;;  %v2213_v0 = vadd.f32 %v2212_v5, %v2211_v33  ;;  %v2311_v1 = vld [vmem:[#allocation8 + $0xcc0] sm:$0xff]  ;;  %2355 = vmatpush.msrb.mxu3 %v2290_v7 }
 0x6d1   :  { %v2217_v13 = vsel %vm2003_vm10, %v3055_v40, 0.0  ;;  %2326 = vmatpush.msra.mxu0 %v2311_v1 }
 0x6d2   :  { %v3060_v19 = vmul.f32 %v3053_v12, %v2019_v2  ;;  %v2218_v21 = vrot.slane %v2217_v13, 4  ;;  %v2214_v16 = vrot.slane %v2213_v0, 1  ;;  %v2390_v2 = vld [vmem:[#allocation8 + $0xd40] sm:$0xff] }
 0x6d3   :  { %2405 = vmatpush.msra.mxu1 %v2390_v2  ;;  %v2050_v2 = vld [vmem:[#allocation10 + $0x9] sm:$0x1] }
 0x6d4   :  { %v2028_v6 = vsub.f32 %v3041_v27, %v3060_v19  ;;  %v2038_v8 = vsub.f32 %v3045_v35, %v3060_v19  ;;  %v2219_v24 = vadd.f32 %v2218_v21, %v2217_v13  ;;  %v2215_v34 = vadd.f32 %v2214_v16, %v2213_v0  ;;  %v2389_v0 = vld [vmem:[#allocation8 + $0xd38] sm:$0xff]  ;;  %v2287_v16 = vld [vmem:[#allocation8 + $0xc28] sm:$0xff] }
 0x6d5   :  { %2406 = vmatpush.msra.mxu1 %v2389_v0 }
 0x6d6   :  { %v2029_v41 = vmul.f32 %v2028_v6, %v2028_v6  ;;  %v2039_v43 = vmul.f32 %v2038_v8, %v2038_v8  ;;  %v2220_v18 = vrot.slane %v2219_v24, 2  ;;  %v2310_v6 = vld [vmem:[#allocation8 + $0xcb8] sm:$0xff] }
 0x6d7   :  { %v2289_v8 = vld [vmem:[#allocation8 + $0xc38] sm:$0xff]  ;;  %2327 = vmatpush.msra.mxu0 %v2310_v6  ;;  %2407 = vmatpush.msra.mxu1 %v2388_v20 }
 0x6d8   :  { %v2030_v54 = vsel %vm2003_vm10, %v2029_v41, 0.0  ;;  %v2040_v59 = vsel %vm2003_vm10, %v2039_v43, 0.0  ;;  %v2221_v22 = vadd.f32 %v2220_v18, %v2219_v24  ;;  %2356 = vmatpush.msrb.mxu3 %v2289_v8  ;;  %v2309_v43 = vld [vmem:[#allocation8 + $0xcb0] sm:$0xff] }
 0x6d9   :  { %v2031_v23 = vrot.slane %v2030_v54, 4  ;;  %v2041_v25 = vrot.slane %v2040_v59, 4  ;;  %v2288_v18 = vld [vmem:[#allocation8 + $0xc30] sm:$0xff]  ;;  %2328 = vmatpush.msra.mxu0 %v2309_v43 }
 0x6da   :  { %v2222_v53 = vrot.slane %v2221_v22, 1  ;;  %2357 = vmatpush.msrb.mxu3 %v2288_v18 }
 0x6db   :  { %v2032_v4 = vadd.f32 %v2031_v23, %v2030_v54  ;;  %v2042_v31 = vadd.f32 %v2041_v25, %v2040_v59  ;;  %v2308_v59 = vld [vmem:[#allocation8 + $0xca8] sm:$0xff] }
 0x6dc   :  { %v2223_v36 = vadd.f32 %v2222_v53, %v2221_v22  ;;  %v2387_v22 = vld [vmem:[#allocation8 + $0xd28] sm:$0xff]  ;;  %2329 = vmatpush.msra.mxu0 %v2308_v59  ;;  %2358 = vmatpush.msrb.mxu3 %v2287_v16 }
 0x6dd   :  { %v2033_v10 = vrot.slane %v2032_v4, 2  ;;  %v2043_v44 = vrot.slane %v2042_v31, 2  ;;  %2408 = vmatpush.msra.mxu1 %v2387_v22  ;;  %v2248_v16 = vld [vmem:[#allocation10 + $0x9] sm:$0x1] }
 0x6de   :  { %v2224_v17 = vadd.f32 %v2223_v36, %v2215_v34  ;;  %2330 = vmatpush.msra.mxu0 %v2307_v26  ;;  %2359 = vmatpush.msrb.mxu3 %v2286_v28  ;;  %v2305_v36 = vld [vmem:[#allocation8 + $0xc90] sm:$0xff] }
 0x6df   :  { %v2034_v45 = vadd.f32 %v2033_v10, %v2032_v4  ;;  %v2044_v46 = vadd.f32 %v2043_v44, %v2042_v31  ;;  %2409 = vmatpush.msra.mxu1 %v2386_v29  ;;  %v2306_v31 = vld [vmem:[#allocation8 + $0xc98] sm:$0xff]  ;;  %v2284_v10 = vld [vmem:[#allocation8 + $0xc10] sm:$0xff] }
 0x6e0   :  { %v3069_v52 = vmul.f32 %v2224_v17, %v3053_v12  ;;  %2331 = vmatpush.msra.mxu0 %v2306_v31  ;;  %2360 = vmatpush.msrb.mxu3 %v2285_v32  ;;  %v2384_v44 = vld [vmem:[#allocation8 + $0xd10] sm:$0xff]  ;;  %v2304_v17 = vld [vmem:[#allocation8 + $0xc88] sm:$0xff] }
 0x6e1   :  { %v2035_v56 = vrot.slane %v2034_v45, 1  ;;  %v2045_v57 = vrot.slane %v2044_v46, 1  ;;  %2410 = vmatpush.msra.mxu1 %v2385_v15  ;;  %v2299_v32 = vld [vmem:[#allocation2 + $0x10] sm:$0xff] }
 0x6e2   :  { %v2226_v14 = vsub.f32 %v3049_v49, %v3069_v52  ;;  %v2236_v33 = vsub.f32 %v3055_v40, %v3069_v52  ;;  %2332 = vmatpush.msra.mxu0 %v2305_v36  ;;  %2361 = vmatpush.msrb.mxu3 %v2284_v10  ;;  %v2278_v15 = vld [vmem:[#allocation2 + $0xf] sm:$0xff]  ;;  %v2301_v36 = vld [vmem:[#allocation2 + $0x20] sm:$0xff] }
 0x6e3   :  { %v2036_v62 = vadd.f32 %v2035_v56, %v2034_v45  ;;  %v2046_v63 = vadd.f32 %v2045_v57, %v2044_v46  ;;  %2411 = vmatpush.msra.mxu1 %v2384_v44  ;;  %v2283_v45 = vld [vmem:[#allocation8 + $0xc08] sm:$0xff]  ;;  %v2282_v56 = vld [vmem:[#allocation8 + $0xc00] sm:$0xff] }
 0x6e4   :  { %v2227_v5 = vmul.f32 %v2226_v14, %v2226_v14  ;;  %v2237_v13 = vmul.f32 %v2236_v33, %v2236_v33  ;;  %v2383_v46 = vld [vmem:[#allocation8 + $0xd08] sm:$0xff]  ;;  %2333 = vmatpush.msra.mxu0 %v2304_v17  ;;  %2362 = vmatpush.msrb.mxu3 %v2283_v45 }
 0x6e5   :  { %v2047_v21 = vadd.f32 %v2046_v63, %v2036_v62  ;;  %2412 = vmatpush.msra.mxu1 %v2383_v46  ;;  %v2049_v62 = vld [vmem:[#allocation10 + $0x8] sm:$0x1] }
 0x6e6   :  { %v2228_v24 = vsel %vm2003_vm10, %v2227_v5, 0.0  ;;  %v2238_v3 = vsel %vm2003_vm10, %v2237_v13, 0.0  ;;  %2334 = vmatpush.msra.mxu0 %v2303_v51  ;;  %2363 = vmatpush.msrb.mxu3 %v2282_v56  ;;  %v2380_v10 = vld [vmem:[#allocation2 + $0x21] sm:$0xff] }
 0x6e7   :  { %v2048_v39 = vmul.f32 %v2047_v21, %v3053_v12  ;;  %v2229_v9 = vrot.slane %v2228_v24, 4  ;;  %v2239_v41 = vrot.slane %v2238_v3, 4  ;;  %2413 = vmatpush.msra.mxu1 %v2382_v55 }
 0x6e9   :  { %v2051_v11 = vadd.f32 1e-05, %v2048_v39  ;;  %v2230_v58 = vadd.f32 %v2229_v9, %v2228_v24  ;;  %v2240_v54 = vadd.f32 %v2239_v41, %v2238_v3 }
 0x6eb   :  { %2589 = vrsqrt.f32 %v2051_v11  ;;  %v2231_v23 = vrot.slane %v2230_v58, 2  ;;  %v2241_v25 = vrot.slane %v2240_v54, 2  ;;  %vm2058_vm13 = vweird.f32 %v2051_v11 }
 0x6ed   :  { %v2232_v53 = vadd.f32 %v2231_v23, %v2230_v58  ;;  %v2242_v4 = vadd.f32 %v2241_v25, %v2240_v54  ;;  %v2247_v58 = vld [vmem:[#allocation10 + $0x8] sm:$0x1] }
 0x6ef   :  { %v2233_v37 = vrot.slane %v2232_v53, 1  ;;  %v2243_v34 = vrot.slane %v2242_v4, 1 }
 0x6f1   :  { %v2590_v38 = vpop.eup %2589  ;;  %v2234_v42 = vadd.f32 %v2233_v37, %v2232_v53  ;;  %v2244_v47 = vadd.f32 %v2243_v34, %v2242_v4 }
 0x6f2   :  { %v2053_v48 = vmul.f32 %v2590_v38, %v2051_v11  ;;  %vm2059_vm12 = vweird.f32 %v2590_v38 }
 0x6f3   :  { %v2245_v50 = vadd.f32 %v2244_v47, %v2234_v42  ;;  %vm2060_vm14 = vmor %vm2058_vm13, %vm2059_vm12 }
 0x6f4   :  { %v2054_v57 = vmul.f32 %v2590_v38, %v2053_v48 }
 0x6f5   :  { %v2246_v60 = vmul.f32 %v2245_v50, %v3053_v12 }
 0x6f6   :  { %v2055_v61 = vmul.f32 0.5, %v2054_v57 }
 0x6f7   :  { %v2249_v14 = vadd.f32 1e-05, %v2246_v60 }
 0x6f8   :  { %v2056_v33 = vsub.f32 1.5, %v2055_v61 }
 0x6f9   :  { %2591 = vrsqrt.f32 %v2249_v14  ;;  %vm2256_vm0 = vweird.f32 %v2249_v14 }
 0x6fa   :  { %v2057_v63 = vmul.f32 %v2590_v38, %v2056_v33 }
 0x6fc   :  { %v2061_v1 = vsel %vm2060_vm14, %v2590_v38, %v2057_v63 }
 0x6fd   :  { %v2062_v7 = vmul.f32 %v2061_v1, %v2049_v62 }
 0x6ff   :  { %v2592_v5 = vpop.eup %2591  ;;  %v2063_v13 = vmul.f32 %v2062_v7, %v3060_v19  ;;  %v2065_v21 = vperm.slane %v2062_v7, 0 }
 0x700   :  { %v2251_v6 = vmul.f32 %v2592_v5, %v2249_v14  ;;  %vm2257_vm15 = vweird.f32 %v2592_v5 }
 0x701   :  { %v2064_v8 = vsub.f32 %v2050_v2, %v2063_v13  ;;  %v2066_v24 = vmul.f32 %v2065_v21, %v3041_v27  ;;  %v2067_v3 = vmul.f32 %v2065_v21, %v3045_v35  ;;  %vm2258_vm1 = vmor %vm2256_vm0, %vm2257_vm15 }
 0x702   :  { %v2252_v0 = vmul.f32 %v2592_v5, %v2251_v6 }
 0x703   :  { %v2068_v39 = vperm.slane %v2064_v8, 0 }
 0x704   :  { %v2253_v9 = vmul.f32 0.5, %v2252_v0 }
 0x705   :  { %v2069_v41 = vadd.f32 %v2068_v39, %v2066_v24  ;;  %v2070_v43 = vadd.f32 %v2068_v39, %v2067_v3 }
 0x706   :  { %v2254_v18 = vsub.f32 1.5, %v2253_v9 }
 0x707   :  { %v2071_v20 = vmax.f32 %v2069_v41, 0.0  ;;  %v2072_v11 = vmax.f32 %v2070_v43, 0.0 }
 0x708   :  { %v2255_v54 = vmul.f32 %v2592_v5, %v2254_v18 }
 0x709   :  { %2073 = vst [vmem:[#allocation2 + $0x8] sm:$0x3] %v2071_v20 }
 0x70a   :  { %2074 = vst [vmem:[#allocation2 + $0x18] sm:$0x3] %v2072_v11  ;;  %v2259_v19 = vsel %vm2258_vm1, %v2592_v5, %v2255_v54 }
 0x70b   :  { %v2260_v59 = vmul.f32 %v2259_v19, %v2247_v58 }
 0x70d   :  { %v2261_v27 = vmul.f32 %v2260_v59, %v3069_v52  ;;  %v2263_v35 = vperm.slane %v2260_v59, 0 }
 0x70f   :  { %v2262_v22 = vsub.f32 %v2248_v16, %v2261_v27  ;;  %v2264_v28 = vmul.f32 %v2263_v35, %v3049_v49  ;;  %v2265_v29 = vmul.f32 %v2263_v35, %v3055_v40  ;;  %v2280_v40 = vld [vmem:[#allocation2 + $0x1f] sm:$0xff] }
 0x710   :  { %v2298_v23 = vld [vmem:[#allocation2 + $0x8] sm:$0xff] }
 0x711   :  { %v2277_v25 = vld [vmem:[#allocation2 + $0x7] sm:$0xff]  ;;  %v2266_v53 = vperm.slane %v2262_v22, 0  ;;  %2335 = vmatmul.f32.vlgmr.msra.gmra.mxu0 %v2298_v23  ;;  %v2378_v52 = vld [vmem:[#allocation2 + $0x11] sm:$0xff]  ;;  %v2379_v49 = vld [vmem:[#allocation2 + $0x19] sm:$0xff] }
 0x712   :  { %v2377_v26 = vld [vmem:[#allocation2 + $0x9] sm:$0xff]  ;;  %2364 = vmatmul.f32.vlgmr.msrb.gmra.mxu3 %v2277_v25  ;;  %v2300_v37 = vld [vmem:[#allocation2 + $0x18] sm:$0xff] }
 0x713   :  { %2414 = vmatmul.f32.vlgmr.msra.gmra.mxu1 %v2377_v26  ;;  %v2267_v4 = vadd.f32 %v2266_v53, %v2264_v28  ;;  %v2268_v31 = vadd.f32 %v2266_v53, %v2265_v29  ;;  %v2279_v34 = vld [vmem:[#allocation2 + $0x17] sm:$0xff] }
 0x715   :  { %2269 = vst [vmem:[#allocation3 + $0x8] sm:$0x3] %v2267_v4 }
 0x716   :  { %2270 = vst [vmem:[#allocation3 + $0x18] sm:$0x3] %v2268_v31 }
 0x719   :  { %2338 = vmatmul.f32.gmra.mxu0 %v2299_v32 }
 0x71a   :  { %2367 = vmatmul.f32.gmra.mxu3 %v2278_v15 }
 0x71b   :  { %2417 = vmatmul.f32.gmra.mxu1 %v2378_v52 }
 0x721   :  { %2341 = vmatmul.f32.gmra.mxu0 %v2300_v37 }
 0x722   :  { %2370 = vmatmul.f32.gmra.mxu3 %v2279_v34 }
 0x723   :  { %2420 = vmatmul.f32.gmra.mxu1 %v2379_v49 }
 0x729   :  { %2344 = vmatmul.f32.gmra.mxu0 %v2301_v36 }
 0x72a   :  { %2373 = vmatmul.f32.gmra.mxu3 %v2280_v40  ;;  %v2469_v40 = vld [vmem:[#allocation10 + $0x8] sm:$0x1] }
 0x72b   :  { %2423 = vmatmul.f32.gmra.mxu1 %v2380_v10 }
 0x78e   :  { %v2336_v44 = vpop.f32.mrf.mxu0 }
 0x790   :  { %v2415_v38 = vpop.f32.mrf.mxu1 }
 0x795   :  { %v2365_v42 = vpop.f32.mrf.mxu3 }
 0x796   :  { %v2366_v47 = vadd.f32 %v2365_v42, %v2336_v44  ;;  %v2339_v45 = vpop.f32.mrf.mxu0 }
 0x798   :  { %v3085_v17 = vadd.f32 %v2415_v38, %v2366_v47  ;;  %v2418_v46 = vpop.f32.mrf.mxu1  ;;  %v2470_v47 = vld [vmem:[#allocation10 + $0x9] sm:$0x1] }
 0x79a   :  { %v2431_v50 = vsel %vm2003_vm10, %v3085_v17, 0.0 }
 0x79b   :  { %v2432_v57 = vrot.slane %v2431_v50, 4 }
 0x79d   :  { %v2368_v48 = vpop.f32.mrf.mxu3  ;;  %v2433_v55 = vadd.f32 %v2432_v57, %v2431_v50 }
 0x79e   :  { %v2369_v51 = vadd.f32 %v2368_v48, %v2339_v45  ;;  %v2342_v60 = vpop.f32.mrf.mxu0 }
 0x79f   :  { %v2434_v63 = vrot.slane %v2433_v55, 2 }
 0x7a0   :  { %v3089_v56 = vadd.f32 %v2418_v46, %v2369_v51  ;;  %v2421_v33 = vpop.f32.mrf.mxu1 }
 0x7a1   :  { %v2435_v2 = vadd.f32 %v2434_v63, %v2433_v55 }
 0x7a3   :  { %v2436_v21 = vrot.slane %v2435_v2, 1 }
 0x7a5   :  { %v2371_v61 = vpop.f32.mrf.mxu3  ;;  %v2437_v0 = vadd.f32 %v2436_v21, %v2435_v2  ;;  %v2495_v2 = vld [vmem:[#allocation3 + $0x8] sm:$0xff] }
 0x7a6   :  { %v2372_v14 = vadd.f32 %v2371_v61, %v2342_v60  ;;  %v2345_v34 = vpop.f32.mrf.mxu0  ;;  %v2496_v61 = vld [vmem:[#allocation3 + $0x10] sm:$0xff] }
 0x7a8   :  { %v2429_v62 = vadd.f32 %v2421_v33, %v2372_v14  ;;  %v2424_v38 = vpop.f32.mrf.mxu1 }
 0x7aa   :  { %v2439_v1 = vsel %vm2003_vm10, %v2429_v62, 0.0 }
 0x7ab   :  { %v2440_v7 = vrot.slane %v2439_v1, 4 }
 0x7ad   :  { %v2441_v5 = vadd.f32 %v2440_v7, %v2439_v1  ;;  %v2374_v49 = vpop.f32.mrf.mxu3  ;;  %v2498_v7 = vld [vmem:[#allocation3 + $0x20] sm:$0xff] }
 0x7ae   :  { %v2375_v10 = vadd.f32 %v2374_v49, %v2345_v34 }
 0x7af   :  { %v2442_v13 = vrot.slane %v2441_v5, 2 }
 0x7b0   :  { %v2430_v46 = vadd.f32 %v2424_v38, %v2375_v10 }
 0x7b1   :  { %v2443_v6 = vadd.f32 %v2442_v13, %v2441_v5  ;;  %v2497_v5 = vld [vmem:[#allocation3 + $0x18] sm:$0xff] }
 0x7b3   :  { %v2444_v8 = vrot.slane %v2443_v6, 1 }
 0x7b5   :  { %v2445_v24 = vadd.f32 %v2444_v8, %v2443_v6 }
 0x7b7   :  { %v2446_v3 = vadd.f32 %v2445_v24, %v2437_v0 }
 0x7b9   :  { %v2447_v39 = vmul.f32 %v2446_v3, %v3053_v12 }
 0x7bb   :  { %v2448_v9 = vsub.f32 %v3085_v17, %v2447_v39  ;;  %v2458_v41 = vsub.f32 %v2429_v62, %v2447_v39 }
 0x7bd   :  { %v2449_v43 = vmul.f32 %v2448_v9, %v2448_v9  ;;  %v2459_v18 = vmul.f32 %v2458_v41, %v2458_v41 }
 0x7bf   :  { %v2450_v20 = vsel %vm2003_vm10, %v2449_v43, 0.0  ;;  %v2460_v11 = vsel %vm2003_vm10, %v2459_v18, 0.0 }
 0x7c0   :  { %v2451_v58 = vrot.slane %v2450_v20, 4  ;;  %v2461_v54 = vrot.slane %v2460_v11, 4 }
 0x7c2   :  { %v2452_v19 = vadd.f32 %v2451_v58, %v2450_v20  ;;  %v2462_v59 = vadd.f32 %v2461_v54, %v2460_v11 }
 0x7c4   :  { %v2453_v16 = vrot.slane %v2452_v19, 2  ;;  %v2463_v27 = vrot.slane %v2462_v59, 2 }
 0x7c6   :  { %v2454_v35 = vadd.f32 %v2453_v16, %v2452_v19  ;;  %v2464_v22 = vadd.f32 %v2463_v27, %v2462_v59 }
 0x7c8   :  { %v2455_v23 = vrot.slane %v2454_v35, 1  ;;  %v2465_v25 = vrot.slane %v2464_v22, 1 }
 0x7ca   :  { %v2456_v26 = vadd.f32 %v2455_v23, %v2454_v35  ;;  %v2466_v28 = vadd.f32 %v2465_v25, %v2464_v22 }
 0x7cc   :  { %v2467_v29 = vadd.f32 %v2466_v28, %v2456_v26 }
 0x7ce   :  { %v2468_v53 = vmul.f32 %v2467_v29, %v3053_v12 }
 0x7d0   :  { %v2471_v4 = vadd.f32 1e-05, %v2468_v53 }
 0x7d2   :  { %2593 = vrsqrt.f32 %v2471_v4  ;;  %vm2478_vm3 = vweird.f32 %v2471_v4 }
 0x7d8   :  { %v2594_v31 = vpop.eup %2593 }
 0x7d9   :  { %v2473_v32 = vmul.f32 %v2594_v31, %v2471_v4  ;;  %vm2479_vm2 = vweird.f32 %v2594_v31 }
 0x7da   :  { %vm2480_vm4 = vmor %vm2478_vm3, %vm2479_vm2 }
 0x7db   :  { %v2474_v15 = vmul.f32 %v2594_v31, %v2473_v32 }
 0x7dd   :  { %v2475_v52 = vmul.f32 0.5, %v2474_v15 }
 0x7df   :  { %v2476_v37 = vsub.f32 1.5, %v2475_v52 }
 0x7e1   :  { %v2477_v36 = vmul.f32 %v2594_v31, %v2476_v37 }
 0x7e3   :  { %v2481_v44 = vsel %vm2480_vm4, %v2594_v31, %v2477_v36 }
 0x7e4   :  { %v2482_v42 = vmul.f32 %v2481_v44, %v2469_v40 }
 0x7e6   :  { %v2483_v12 = vmul.f32 %v2482_v42, %v2447_v39  ;;  %v2485_v45 = vperm.slane %v2482_v42, 0 }
 0x7e8   :  { %v2484_v48 = vsub.f32 %v2470_v47, %v2483_v12  ;;  %v2486_v50 = vmul.f32 %v2485_v45, %v3085_v17  ;;  %v2487_v51 = vmul.f32 %v2485_v45, %v3089_v56  ;;  %v2488_v57 = vmul.f32 %v2485_v45, %v2429_v62 }
 0x7e9   :  { %v2489_v60 = vmul.f32 %v2485_v45, %v2430_v46 }
 0x7ea   :  { %v2490_v55 = vperm.slane %v2484_v48, 0 }
 0x7ec   :  { %v2491_v14 = vadd.f32 %v2490_v55, %v2486_v50  ;;  %v2492_v33 = vadd.f32 %v2490_v55, %v2487_v51  ;;  %v2493_v63 = vadd.f32 %v2490_v55, %v2488_v57  ;;  %v2494_v1 = vadd.f32 %v2490_v55, %v2489_v60 }
 0x7ee   :  { %v2499_v13 = vadd.f32 %v2495_v2, %v2491_v14  ;;  %v2500_v21 = vadd.f32 %v2496_v61, %v2492_v33  ;;  %v2501_v6 = vadd.f32 %v2497_v5, %v2493_v63  ;;  %v2502_v8 = vadd.f32 %v2498_v7, %v2494_v1 }
 0x7f0   :  { %v2503_v0 = vmax.f32 %v2499_v13, 0.0  ;;  %v2504_v24 = vmax.f32 %v2500_v21, 0.0  ;;  %v2505_v17 = vmax.f32 %v2501_v6, 0.0  ;;  %v2506_v56 = vmax.f32 %v2502_v8, 0.0 }
 0x7f2   :  { %2507 = vst [vmem:[#allocation4 + $0x8] sm:$0xff] %v2503_v0 }
 0x7f3   :  { %2508 = vst [vmem:[#allocation4 + $0x10] sm:$0xff] %v2504_v24 }
 0x7f4   :  { %2512 = vst [vmem:[#allocation4 + $0xa] sm:$0xff] %v3033_v30 }
 0x7f5   :  { %2513 = vst [vmem:[#allocation4 + $0x12] sm:$0x3f] %v3033_v30 }
 0x7f6   :  { %2509 = vst [vmem:[#allocation4 + $0x18] sm:$0xff] %v2505_v17 }
 0x7f7   :  { %2510 = vst [vmem:[#allocation4 + $0x20] sm:$0xff] %v2506_v56 }
 0x7f8   :  { %2514 = vst [vmem:[#allocation4 + $0x1a] sm:$0xff] %v3033_v30 }
 0x7f9   :  { %2515 = vst [vmem:[#allocation4 + $0x22] sm:$0xff] %v3033_v30  ;;  %v2517_v62 = vld [vmem:[#allocation4 + $0x8] sm:$0x3] }
 0x7fa   :  { %v2518_v3 = vsel %vm2003_vm10, %v2517_v62, -inf }
 0x7fb   :  { %v2519_v39 = vrot.slane %v2518_v3, 4 }
 0x7fd   :  { %v2520_v9 = vmax.f32 %v2518_v3, %v2519_v39  ;;  %v2526_v41 = vld [vmem:[#allocation4 + $0x18] sm:$0x3] }
 0x7fe   :  { %v2527_v43 = vsel %vm2003_vm10, %v2526_v41, -inf }
 0x7ff   :  { %v2521_v18 = vrot.slane %v2520_v9, 2  ;;  %v2528_v20 = vrot.slane %v2527_v43, 4 }
 0x801   :  { %v2522_v11 = vmax.f32 %v2520_v9, %v2521_v18  ;;  %v2529_v58 = vmax.f32 %v2527_v43, %v2528_v20 }
 0x803   :  { %v2523_v54 = vrot.slane %v2522_v11, 1  ;;  %v2530_v19 = vrot.slane %v2529_v58, 2 }
 0x805   :  { %v2524_v59 = vmax.f32 %v2522_v11, %v2523_v54  ;;  %v2531_v16 = vmax.f32 %v2529_v58, %v2530_v19 }
 0x807   :  { %2525 = vst [vmem:[#allocation11] sm:$0x1] %v2524_v59  ;;  %v2532_v30 = vrot.slane %v2531_v16, 1 }
 0x809   :  { %v2533_v27 = vmax.f32 %v2531_v16, %v2532_v30 }
 0x80b   :  { %2534 = vst [vmem:[#allocation11 + $0x1] sm:$0x1] %v2533_v27 }
 0x80c   :  { %2545 = dma.vmem_to_hbm [thread:$0]  %s2541_s2, 32, %s2543_s30, [#allocation7]  }
 0x80d   :  { %2698 = dma.done.wait [#allocation7], 32  }
 0x80e   :  { %2699 = vsyncadd [#allocation7], 4294967264 }
 0x80f   :  { %2550 = vsyncpa [#allocation6], 1 }
 0x810   :  { %2551 = vsyncpa [#allocation9], 1 }
 0x811   :  { %2552 = vsyncpa [#allocation7], 1 }

</bundles_post_ra>
